<compile_context>
chip_gen: v6e
topology: v6e:2x2x1
jax: 0.10.0
libtpu: 0.0.40
codegen_flags: <defaults>
</compile_context>

<pallas_src>
import functools

import jax
import jax.numpy as jnp
from jax.experimental import pallas as pl
from jax.experimental.pallas import tpu as pltpu

# ---------------- synthetic WavLM config (small) ----------------
C0 = 16          # first conv channels
C1 = 16          # second conv channels (= feature-extractor output dim)
D = 32           # encoder embed dim (== opt.model_size)
H = 4            # attention heads
FFN = 64         # ffn inner dim
NLAYERS = 2      # transformer layers
CONV0_K, CONV0_S = 10, 5
CONV1_K, CONV1_S = 3, 2
POS_K, POS_G = 5, 4   # conv positional embedding (kernel, groups)
POS_PAD = POS_K // 2
EPS = 1e-5
NEG_INF = -1e30


def _gelu_exact(x):
    # exact erf GELU (PyTorch nn.GELU default)
    return 0.5 * x * (1.0 + jax.lax.erf(x * 0.7071067811865476))


def _layernorm(x, g, b):
    mu = jnp.mean(x, axis=-1, keepdims=True)
    xc = x - mu
    var = jnp.mean(xc * xc, axis=-1, keepdims=True)
    return xc * jax.lax.rsqrt(var + EPS) * g + b


def _const_spec(arr):
    zeros = (0,) * arr.ndim
    return pl.BlockSpec(arr.shape, lambda b, _z=zeros: _z)


# ---------------- single fused forward kernel ----------------
def _wavlm_kernel(patches_ref, keep_ref, bias_ref,
                  w0_ref, gn_w_ref, gn_b_ref, w1_ref, fln_w_ref, fln_b_ref,
                  proj_w_ref, proj_b_ref, pos_w_ref, pos_b_ref,
                  eln_w_ref, eln_b_ref,
                  wq_ref, wk_ref, wv_ref, wo_ref,
                  bq_ref, bk_ref, bv_ref, bo_ref,
                  ln1_w_ref, ln1_b_ref, fc1_w_ref, fc1_b_ref,
                  fc2_w_ref, fc2_b_ref, ln2_w_ref, ln2_b_ref,
                  o_ref, y0_scr, hpad_scr):
    f32 = jnp.float32
    bf16 = jnp.bfloat16
    Tf = o_ref.shape[1]
    Dd = o_ref.shape[2]

    # ---- conv0 (stride 5, no bias) as a single matmul over im2col patches ----
    p0 = patches_ref[0]                                                       # [T0, K0]
    y0 = jnp.dot(p0.astype(bf16), w0_ref[...], preferred_element_type=f32)    # [T0, C0]

    # GroupNorm(num_groups == channels): per-channel stats over time, affine, GELU
    mu = jnp.mean(y0, axis=0, keepdims=True)
    yc = y0 - mu
    var = jnp.mean(yc * yc, axis=0, keepdims=True)
    y0 = yc * jax.lax.rsqrt(var + EPS) * gn_w_ref[...] + gn_b_ref[...]
    y0 = _gelu_exact(y0)

    # ---- conv1 (k=3, stride=2, no bias): strided sublane reads from a VMEM scratch ----
    y0_scr[...] = y0
    c1_out = w1_ref.shape[2]
    y1 = jnp.zeros((Tf, c1_out), f32)
    for j in range(w1_ref.shape[0]):
        tap = y0_scr[pl.ds(j, Tf, stride=CONV1_S), :]                         # rows 2t+j
        y1 = y1 + jnp.dot(tap.astype(bf16), w1_ref[j], preferred_element_type=f32)
    feats = _gelu_exact(y1)                                                   # [Tf, C1]

    # ---- feature LayerNorm + post-extract projection ----
    feats = _layernorm(feats, fln_w_ref[...], fln_b_ref[...])
    h = jnp.dot(feats.astype(bf16), proj_w_ref[...],
                preferred_element_type=f32) + proj_b_ref[...]                 # [Tf, D]

    # zero padded frames before the encoder
    h = h * keep_ref[0]                                                       # [Tf,D]*[Tf,1]

    # ---- grouped conv pos embedding via zero-padded scratch (no shift matrices) ----
    hpad_scr[...] = jnp.zeros_like(hpad_scr)
    hpad_scr[pl.ds(POS_PAD, Tf), :] = h
    pos = jnp.zeros((Tf, Dd), f32)
    for j in range(pos_w_ref.shape[0]):
        tap = hpad_scr[pl.ds(j, Tf), :]                   # h[t + j - pad], zero outside
        pos = pos + jnp.dot(tap.astype(bf16), pos_w_ref[j], preferred_element_type=f32)
    h = h + _gelu_exact(pos + pos_b_ref[...])

    # encoder LayerNorm (layer_norm_first=False -> applied after pos-conv add)
    h = _layernorm(h, eln_w_ref[...], eln_b_ref[...])

    # ---- transformer layers (unrolled, post-norm) ----
    nlayers = wq_ref.shape[0]
    nheads = wq_ref.shape[1]
    hd = wq_ref.shape[3]
    scale = float(hd) ** -0.5
    bias_full = jnp.broadcast_to(bias_ref[0], (Tf, Tf))   # key-padding bias, built once

    for l in range(nlayers):
        x_bf = h.astype(bf16)
        attn = jnp.zeros((Tf, Dd), f32)
        for hh in range(nheads):
            # per-head projections: weights indexed on leading axes -> no lane slicing
            q = jnp.dot(x_bf, wq_ref[l, hh], preferred_element_type=f32) + bq_ref[l, hh]
            k = jnp.dot(x_bf, wk_ref[l, hh], preferred_element_type=f32) + bk_ref[l, hh]
            v = jnp.dot(x_bf, wv_ref[l, hh], preferred_element_type=f32) + bv_ref[l, hh]
            s = jax.lax.dot_general((q * scale).astype(bf16), k.astype(bf16),
                                    (((1,), (1,)), ((), ())),
                                    preferred_element_type=f32)               # [Tf, Tf]
            s = s + bias_full
            s = s - jnp.max(s, axis=-1, keepdims=True)
            p = jnp.exp(s)
            p = p * pl.reciprocal(jnp.sum(p, axis=-1, keepdims=True), approx=True)
            o_h = jnp.dot(p.astype(bf16), v.astype(bf16), preferred_element_type=f32)
            attn = attn + jnp.dot(o_h.astype(bf16), wo_ref[l, hh],
                                  preferred_element_type=f32)
        attn = attn + bo_ref[l]

        # residual + LN1 (post-norm)
        h = _layernorm(h + attn, ln1_w_ref[l], ln1_b_ref[l])

        # FFN (fc1 + GELU + fc2) + residual + LN2
        mid = jnp.dot(h.astype(bf16), fc1_w_ref[l], preferred_element_type=f32) + fc1_b_ref[l]
        mid = _gelu_exact(mid)
        y = jnp.dot(mid.astype(bf16), fc2_w_ref[l], preferred_element_type=f32) + fc2_b_ref[l]
        h = _layernorm(h + y, ln2_w_ref[l], ln2_b_ref[l])

    o_ref[0] = h.astype(o_ref.dtype)


def pallas_wavlm(patches0, keep, mask_bias, fe_w, layer_w):
    B, T0, K0 = patches0.shape
    Tf = keep.shape[1]
    per_batch_specs = [pl.BlockSpec((1, T0, K0), lambda b: (b, 0, 0)),
                       pl.BlockSpec((1, Tf, 1), lambda b: (b, 0, 0)),
                       pl.BlockSpec((1, 1, Tf), lambda b: (b, 0, 0))]
    weights = fe_w + layer_w
    return pl.pallas_call(
        _wavlm_kernel,
        out_shape=jax.ShapeDtypeStruct((B, Tf, D), jnp.float32),
        grid=(B,),
        in_specs=per_batch_specs + [_const_spec(w) for w in weights],
        out_specs=pl.BlockSpec((1, Tf, D), lambda b: (b, 0, 0)),
        scratch_shapes=[pltpu.VMEM((T0, C0), jnp.float32),
                        pltpu.VMEM((Tf + POS_K - 1, D), jnp.float32)],
        compiler_params=pltpu.CompilerParams(dimension_semantics=("parallel",)),
    )(patches0, keep, mask_bias, *weights)


# ---------------- WavLMEncoder.forward ----------------
def wavlm_encoder_forward(params, inp):
    # inp: [B, T_raw, 2] -- channel 0: non-zero = valid / 0 = padded, channel 1: waveform
    long_mask = (inp[:, :, 0] == 0)                    # True where padded
    wav = inp[:, :, 1]                                 # [B, T_raw]
    B, Traw = wav.shape

    T0 = (Traw - CONV0_K) // CONV0_S + 1
    Tf = (T0 - CONV1_K) // CONV1_S + 1

    # im2col patches for conv0 (Cin == 1), gathered once outside the kernel
    idx = jnp.arange(T0)[:, None] * CONV0_S + jnp.arange(CONV0_K)[None, :]
    patches0 = wav[:, idx]                             # [B, T0, K0]

    # padding-mask downsampling (WavLM style reshape + all)
    extra = Traw % Tf
    lm = long_mask[:, :Traw - extra] if extra > 0 else long_mask
    padding_mask = jnp.all(lm.reshape(B, Tf, -1), axis=-1)               # [B, Tf], True = pad
    keep = (1.0 - padding_mask.astype(jnp.float32))[:, :, None]          # [B, Tf, 1]
    mask_bias = jnp.where(padding_mask, NEG_INF, 0.0
                          ).astype(jnp.float32)[:, None, :]              # [B, 1, Tf]

    bf16 = jnp.bfloat16
    f32 = jnp.float32

    # ---- frontend weights (constant-folded under jit); matmul weights in bf16 ----
    w0 = jnp.transpose(params['conv0_w'][:, 0, :], (1, 0)).astype(bf16)  # [K0, C0]
    w1 = jnp.transpose(params['conv1_w'], (2, 1, 0)).astype(bf16)        # [K1, C0, C1]
    Dg = D // POS_G
    pos_w = jnp.zeros((POS_K, D, D), f32)                                # block-diag per-tap
    for g in range(POS_G):
        blk = jnp.transpose(params['pos_w'][g * Dg:(g + 1) * Dg], (2, 1, 0))  # [K, Dg_in, Dg_out]
        pos_w = pos_w.at[:, g * Dg:(g + 1) * Dg, g * Dg:(g + 1) * Dg].set(blk)
    fe_w = (w0,
            params['gn_w'].reshape(1, -1), params['gn_b'].reshape(1, -1),
            w1,
            params['featln_w'].reshape(1, -1), params['featln_b'].reshape(1, -1),
            params['proj_w'].astype(bf16), params['proj_b'].reshape(1, -1),
            pos_w.astype(bf16), params['pos_b'].reshape(1, -1),
            params['encln_w'].reshape(1, -1), params['encln_b'].reshape(1, -1))

    # ---- transformer weights stacked over layers, per-head leading axes ----
    hd = D // H
    lays = params['layers']

    def stack(fn, dtype=f32):
        return jnp.stack([fn(lp) for lp in lays]).astype(dtype)

    wq = stack(lambda lp: jnp.transpose(lp['q_w'].reshape(D, H, hd), (1, 0, 2)), bf16)  # [L,H,D,hd]
    wk = stack(lambda lp: jnp.transpose(lp['k_w'].reshape(D, H, hd), (1, 0, 2)), bf16)
    wv = stack(lambda lp: jnp.transpose(lp['v_w'].reshape(D, H, hd), (1, 0, 2)), bf16)
    wo = stack(lambda lp: lp['o_w'].reshape(H, hd, D), bf16)                            # [L,H,hd,D]
    bq = stack(lambda lp: lp['q_b'].reshape(H, 1, hd))
    bk = stack(lambda lp: lp['k_b'].reshape(H, 1, hd))
    bv = stack(lambda lp: lp['v_b'].reshape(H, 1, hd))
    bo = stack(lambda lp: lp['o_b'].reshape(1, D))
    ln1w = stack(lambda lp: lp['ln1_w'].reshape(1, D))
    ln1b = stack(lambda lp: lp['ln1_b'].reshape(1, D))
    fc1w = stack(lambda lp: lp['fc1_w'], bf16)                                          # [L,D,FFN]
    fc1b = stack(lambda lp: lp['fc1_b'].reshape(1, FFN))
    fc2w = stack(lambda lp: lp['fc2_w'], bf16)                                          # [L,FFN,D]
    fc2b = stack(lambda lp: lp['fc2_b'].reshape(1, D))
    ln2w = stack(lambda lp: lp['ln2_w'].reshape(1, D))
    ln2b = stack(lambda lp: lp['ln2_b'].reshape(1, D))
    layer_w = (wq, wk, wv, wo, bq, bk, bv, bo,
               ln1w, ln1b, fc1w, fc1b, fc2w, fc2b, ln2w, ln2b)

    # single fused kernel: frontend + pos-conv + all transformer layers
    h = pallas_wavlm(patches0, keep, mask_bias, fe_w, layer_w)            # [B, Tf, D]

    # tiny [B,Tf,D] -> time-major transpose kept outside the kernel (a (Tf,1,D) out block
    # would place a size-1, non-multiple-of-8 dim in the BlockSpec second-minor slot at B=2)
    context = jnp.transpose(h, (1, 0, 2))              # [T_feat, B, D]
    dec_attn_mask = padding_mask.astype(jnp.uint8)     # .byte()
    return {'source': wav,
            'context': context,
            'src_mask': dec_attn_mask,
            'src': dec_attn_mask,
            'pos_emb': None,
            'wav2vec_context': context,
            'wav2vec_padding_mask': dec_attn_mask}


# ---------------- deterministic parameter init ----------------
def init_params(key):
    ks = iter(jax.random.split(key, 40))

    def nrm(shape, scale=0.05):
        return scale * jax.random.normal(next(ks), shape, dtype=jnp.float32)

    p = {
        'conv0_w': nrm((C0, 1, CONV0_K)),
        'gn_w': jnp.ones((C0,), jnp.float32),
        'gn_b': jnp.zeros((C0,), jnp.float32),
        'conv1_w': nrm((C1, C0, CONV1_K)),
        'featln_w': jnp.ones((C1,), jnp.float32),
        'featln_b': jnp.zeros((C1,), jnp.float32),
        'proj_w': nrm((C1, D)), 'proj_b': nrm((D,), 0.01),
        'pos_w': nrm((D, D // POS_G, POS_K)), 'pos_b': nrm((D,), 0.01),
        'encln_w': jnp.ones((D,), jnp.float32),
        'encln_b': jnp.zeros((D,), jnp.float32),
        'layers': [],
    }
    for _ in range(NLAYERS):
        p['layers'].append({
            'q_w': nrm((D, D)), 'q_b': nrm((D,), 0.01),
            'k_w': nrm((D, D)), 'k_b': nrm((D,), 0.01),
            'v_w': nrm((D, D)), 'v_b': nrm((D,), 0.01),
            'o_w': nrm((D, D)), 'o_b': nrm((D,), 0.01),
            'ln1_w': jnp.ones((D,), jnp.float32), 'ln1_b': jnp.zeros((D,), jnp.float32),
            'fc1_w': nrm((D, FFN)), 'fc1_b': nrm((FFN,), 0.01),
            'fc2_w': nrm((FFN, D)), 'fc2_b': nrm((D,), 0.01),
            'ln2_w': jnp.ones((D,), jnp.float32), 'ln2_b': jnp.zeros((D,), jnp.float32),
        })
    return p


if __name__ == "__main__":
    key = jax.random.PRNGKey(0)
    pkey, wkey = jax.random.split(key)
    params = init_params(pkey)

    # example input: [batch=2, seq_len=200, 2]; batch 1 has its last 40 samples padded
    B, Traw = 2, 200
    wav = 0.1 * jax.random.normal(wkey, (B, Traw), dtype=jnp.float32)
    valid = jnp.ones((B, Traw), jnp.float32).at[1, 160:].set(0.0)
    wav = wav * valid
    inp = jnp.stack([valid, wav], axis=-1)             # [B, T_raw, 2]

    fwd = jax.jit(functools.partial(wavlm_encoder_forward, params))
    out = fwd(inp)
    jax.block_until_ready(out['context'])
    assert out['context'].shape == (19, B, D)
    assert out['src_mask'].shape == (B, 19)
    print("KERNEL_OK")
</pallas_src>

<mosaic_0001>
module attributes {stable_mosaic.version = 11 : i64} {
  func.func @_wavlm_kernel(%arg0: i32, %arg1: memref<1x39x10xf32, #tpu.memory_space<vmem>>, %arg2: memref<1x19x1xf32, #tpu.memory_space<vmem>>, %arg3: memref<1x1x19xf32, #tpu.memory_space<vmem>>, %arg4: memref<10x16xbf16, #tpu.memory_space<vmem>>, %arg5: memref<1x16xf32, #tpu.memory_space<vmem>>, %arg6: memref<1x16xf32, #tpu.memory_space<vmem>>, %arg7: memref<3x16x16xbf16, #tpu.memory_space<vmem>>, %arg8: memref<1x16xf32, #tpu.memory_space<vmem>>, %arg9: memref<1x16xf32, #tpu.memory_space<vmem>>, %arg10: memref<16x32xbf16, #tpu.memory_space<vmem>>, %arg11: memref<1x32xf32, #tpu.memory_space<vmem>>, %arg12: memref<5x32x32xbf16, #tpu.memory_space<vmem>>, %arg13: memref<1x32xf32, #tpu.memory_space<vmem>>, %arg14: memref<1x32xf32, #tpu.memory_space<vmem>>, %arg15: memref<1x32xf32, #tpu.memory_space<vmem>>, %arg16: memref<2x4x32x8xbf16, #tpu.memory_space<vmem>>, %arg17: memref<2x4x32x8xbf16, #tpu.memory_space<vmem>>, %arg18: memref<2x4x32x8xbf16, #tpu.memory_space<vmem>>, %arg19: memref<2x4x8x32xbf16, #tpu.memory_space<vmem>>, %arg20: memref<2x4x1x8xf32, #tpu.memory_space<vmem>>, %arg21: memref<2x4x1x8xf32, #tpu.memory_space<vmem>>, %arg22: memref<2x4x1x8xf32, #tpu.memory_space<vmem>>, %arg23: memref<2x1x32xf32, #tpu.memory_space<vmem>>, %arg24: memref<2x1x32xf32, #tpu.memory_space<vmem>>, %arg25: memref<2x1x32xf32, #tpu.memory_space<vmem>>, %arg26: memref<2x32x64xbf16, #tpu.memory_space<vmem>>, %arg27: memref<2x1x64xf32, #tpu.memory_space<vmem>>, %arg28: memref<2x64x32xbf16, #tpu.memory_space<vmem>>, %arg29: memref<2x1x32xf32, #tpu.memory_space<vmem>>, %arg30: memref<2x1x32xf32, #tpu.memory_space<vmem>>, %arg31: memref<2x1x32xf32, #tpu.memory_space<vmem>>, %arg32: memref<1x19x32xf32, #tpu.memory_space<vmem>>, %arg33: memref<39x16xf32, #tpu.memory_space<vmem>>, %arg34: memref<23x32xf32, #tpu.memory_space<vmem>>) attributes {dimension_semantics = [#tpu.dimension_semantics<parallel>], iteration_bounds = array<i64: 2>, scalar_prefetch = 0 : i64, scratch_operands = 2 : i64, tpu.core_type = #tpu.core_type<tc>, window_params = [{transform_indices = @transform_0, window_bounds = array<i64: 1, 39, 10>}, {transform_indices = @transform_1, window_bounds = array<i64: 1, 19, 1>}, {transform_indices = @transform_2, window_bounds = array<i64: 1, 1, 19>}, {pipeline_mode = #tpu.pipeline_mode<synchronous>, transform_indices = @transform_3, window_bounds = array<i64: 10, 16>}, {pipeline_mode = #tpu.pipeline_mode<synchronous>, transform_indices = @transform_4, window_bounds = array<i64: 1, 16>}, {pipeline_mode = #tpu.pipeline_mode<synchronous>, transform_indices = @transform_5, window_bounds = array<i64: 1, 16>}, {pipeline_mode = #tpu.pipeline_mode<synchronous>, transform_indices = @transform_6, window_bounds = array<i64: 3, 16, 16>}, {pipeline_mode = #tpu.pipeline_mode<synchronous>, transform_indices = @transform_7, window_bounds = array<i64: 1, 16>}, {pipeline_mode = #tpu.pipeline_mode<synchronous>, transform_indices = @transform_8, window_bounds = array<i64: 1, 16>}, {pipeline_mode = #tpu.pipeline_mode<synchronous>, transform_indices = @transform_9, window_bounds = array<i64: 16, 32>}, {pipeline_mode = #tpu.pipeline_mode<synchronous>, transform_indices = @transform_10, window_bounds = array<i64: 1, 32>}, {pipeline_mode = #tpu.pipeline_mode<synchronous>, transform_indices = @transform_11, window_bounds = array<i64: 5, 32, 32>}, {pipeline_mode = #tpu.pipeline_mode<synchronous>, transform_indices = @transform_12, window_bounds = array<i64: 1, 32>}, {pipeline_mode = #tpu.pipeline_mode<synchronous>, transform_indices = @transform_13, window_bounds = array<i64: 1, 32>}, {pipeline_mode = #tpu.pipeline_mode<synchronous>, transform_indices = @transform_14, window_bounds = array<i64: 1, 32>}, {pipeline_mode = #tpu.pipeline_mode<synchronous>, transform_indices = @transform_15, window_bounds = array<i64: 2, 4, 32, 8>}, {pipeline_mode = #tpu.pipeline_mode<synchronous>, transform_indices = @transform_16, window_bounds = array<i64: 2, 4, 32, 8>}, {pipeline_mode = #tpu.pipeline_mode<synchronous>, transform_indices = @transform_17, window_bounds = array<i64: 2, 4, 32, 8>}, {pipeline_mode = #tpu.pipeline_mode<synchronous>, transform_indices = @transform_18, window_bounds = array<i64: 2, 4, 8, 32>}, {pipeline_mode = #tpu.pipeline_mode<synchronous>, transform_indices = @transform_19, window_bounds = array<i64: 2, 4, 1, 8>}, {pipeline_mode = #tpu.pipeline_mode<synchronous>, transform_indices = @transform_20, window_bounds = array<i64: 2, 4, 1, 8>}, {pipeline_mode = #tpu.pipeline_mode<synchronous>, transform_indices = @transform_21, window_bounds = array<i64: 2, 4, 1, 8>}, {pipeline_mode = #tpu.pipeline_mode<synchronous>, transform_indices = @transform_22, window_bounds = array<i64: 2, 1, 32>}, {pipeline_mode = #tpu.pipeline_mode<synchronous>, transform_indices = @transform_23, window_bounds = array<i64: 2, 1, 32>}, {pipeline_mode = #tpu.pipeline_mode<synchronous>, transform_indices = @transform_24, window_bounds = array<i64: 2, 1, 32>}, {pipeline_mode = #tpu.pipeline_mode<synchronous>, transform_indices = @transform_25, window_bounds = array<i64: 2, 32, 64>}, {pipeline_mode = #tpu.pipeline_mode<synchronous>, transform_indices = @transform_26, window_bounds = array<i64: 2, 1, 64>}, {pipeline_mode = #tpu.pipeline_mode<synchronous>, transform_indices = @transform_27, window_bounds = array<i64: 2, 64, 32>}, {pipeline_mode = #tpu.pipeline_mode<synchronous>, transform_indices = @transform_28, window_bounds = array<i64: 2, 1, 32>}, {pipeline_mode = #tpu.pipeline_mode<synchronous>, transform_indices = @transform_29, window_bounds = array<i64: 2, 1, 32>}, {pipeline_mode = #tpu.pipeline_mode<synchronous>, transform_indices = @transform_30, window_bounds = array<i64: 2, 1, 32>}, {transform_indices = @transform_31, window_bounds = array<i64: 1, 19, 32>}]} {
    %c0 = arith.constant 0 : index
    %c0_0 = arith.constant 0 : index
    %c0_1 = arith.constant 0 : index
    %0 = vector.load %arg1[%c0, %c0_0, %c0_1] : memref<1x39x10xf32, #tpu.memory_space<vmem>>, vector<1x39x10xf32>
    %1 = vector.shape_cast %0 : vector<1x39x10xf32> to vector<39x10xf32>
    %2 = arith.truncf %1 : vector<39x10xf32> to vector<39x10xbf16>
    %c0_2 = arith.constant 0 : index
    %c0_3 = arith.constant 0 : index
    %3 = vector.load %arg4[%c0_2, %c0_3] : memref<10x16xbf16, #tpu.memory_space<vmem>>, vector<10x16xbf16>
    %cst = arith.constant dense<0.000000e+00> : vector<39x16xf32>
    %4 = tpu.matmul %2, %3, %cst {dimension_numbers = #tpu.dot_dimension_numbers<[1], [0], [0], [1], [0, 0, 1, 1], [], []>} : vector<39x10xbf16>, vector<10x16xbf16>, vector<39x16xf32> -> vector<39x16xf32>
    %cst_4 = arith.constant dense<0.000000e+00> : vector<16xf32>
    %5 = vector.multi_reduction <add>, %4, %cst_4 [0] : vector<39x16xf32> to vector<16xf32>
    %6 = vector.shape_cast %5 : vector<16xf32> to vector<1x16xf32>
    %cst_5 = arith.constant 3.900000e+01 : f32
    %7 = vector.broadcast %cst_5 : f32 to vector<1x16xf32>
    %8 = arith.divf %6, %7 : vector<1x16xf32>
    %9 = vector.broadcast %8 : vector<1x16xf32> to vector<39x16xf32>
    %10 = arith.subf %4, %9 : vector<39x16xf32>
    %11 = arith.mulf %10, %10 : vector<39x16xf32>
    %cst_6 = arith.constant dense<0.000000e+00> : vector<16xf32>
    %12 = vector.multi_reduction <add>, %11, %cst_6 [0] : vector<39x16xf32> to vector<16xf32>
    %13 = vector.shape_cast %12 : vector<16xf32> to vector<1x16xf32>
    %cst_7 = arith.constant 3.900000e+01 : f32
    %14 = vector.broadcast %cst_7 : f32 to vector<1x16xf32>
    %15 = arith.divf %13, %14 : vector<1x16xf32>
    %cst_8 = arith.constant 9.99999974E-6 : f32
    %16 = vector.broadcast %cst_8 : f32 to vector<1x16xf32>
    %17 = arith.addf %15, %16 : vector<1x16xf32>
    %18 = math.rsqrt %17 : vector<1x16xf32>
    %19 = vector.broadcast %18 : vector<1x16xf32> to vector<39x16xf32>
    %20 = arith.mulf %10, %19 : vector<39x16xf32>
    %c0_9 = arith.constant 0 : index
    %c0_10 = arith.constant 0 : index
    %21 = vector.load %arg5[%c0_9, %c0_10] : memref<1x16xf32, #tpu.memory_space<vmem>>, vector<1x16xf32>
    %22 = vector.broadcast %21 : vector<1x16xf32> to vector<39x16xf32>
    %23 = arith.mulf %20, %22 : vector<39x16xf32>
    %c0_11 = arith.constant 0 : index
    %c0_12 = arith.constant 0 : index
    %24 = vector.load %arg6[%c0_11, %c0_12] : memref<1x16xf32, #tpu.memory_space<vmem>>, vector<1x16xf32>
    %25 = vector.broadcast %24 : vector<1x16xf32> to vector<39x16xf32>
    %26 = arith.addf %23, %25 : vector<39x16xf32>
    %cst_13 = arith.constant 5.000000e-01 : f32
    %27 = vector.broadcast %cst_13 : f32 to vector<39x16xf32>
    %28 = arith.mulf %27, %26 : vector<39x16xf32>
    %cst_14 = arith.constant 0.707106769 : f32
    %29 = vector.broadcast %cst_14 : f32 to vector<39x16xf32>
    %30 = arith.mulf %26, %29 : vector<39x16xf32>
    %31 = math.erf %30 : vector<39x16xf32>
    %cst_15 = arith.constant 1.000000e+00 : f32
    %32 = vector.broadcast %cst_15 : f32 to vector<39x16xf32>
    %33 = arith.addf %32, %31 : vector<39x16xf32>
    %34 = arith.mulf %28, %33 : vector<39x16xf32>
    %c0_16 = arith.constant 0 : index
    %c0_17 = arith.constant 0 : index
    %35 = vector.load %arg33[%c0_16, %c0_17] : memref<39x16xf32, #tpu.memory_space<vmem>>, vector<39x16xf32>
    tpu.vector_store %arg33[%c0_16, %c0_17], %34 {strides = array<i32>} : memref<39x16xf32, #tpu.memory_space<vmem>>, vector<39x16xf32>,
    %cst_18 = arith.constant 0.000000e+00 : f32
    %36 = vector.broadcast %cst_18 : f32 to vector<19x16xf32>
    %c0_19 = arith.constant 0 : index
    %c0_20 = arith.constant 0 : index
    %37 = tpu.strided_load %arg33[%c0_19, %c0_20] {strides = array<i32: 2, 1>} : memref<39x16xf32, #tpu.memory_space<vmem>>, vector<19x16xf32>
    %38 = arith.truncf %37 : vector<19x16xf32> to vector<19x16xbf16>
    %c0_21 = arith.constant 0 : index
    %c0_22 = arith.constant 0 : index
    %c0_23 = arith.constant 0 : index
    %39 = vector.load %arg7[%c0_21, %c0_22, %c0_23] : memref<3x16x16xbf16, #tpu.memory_space<vmem>>, vector<1x16x16xbf16>
    %40 = vector.shape_cast %39 : vector<1x16x16xbf16> to vector<16x16xbf16>
    %cst_24 = arith.constant dense<0.000000e+00> : vector<19x16xf32>
    %41 = tpu.matmul %38, %40, %cst_24 {dimension_numbers = #tpu.dot_dimension_numbers<[1], [0], [0], [1], [0, 0, 1, 1], [], []>} : vector<19x16xbf16>, vector<16x16xbf16>, vector<19x16xf32> -> vector<19x16xf32>
    %42 = arith.addf %36, %41 : vector<19x16xf32>
    %c1 = arith.constant 1 : index
    %c0_25 = arith.constant 0 : index
    %43 = tpu.strided_load %arg33[%c1, %c0_25] {strides = array<i32: 2, 1>} : memref<39x16xf32, #tpu.memory_space<vmem>>, vector<19x16xf32>
    %44 = arith.truncf %43 : vector<19x16xf32> to vector<19x16xbf16>
    %c1_26 = arith.constant 1 : index
    %c0_27 = arith.constant 0 : index
    %c0_28 = arith.constant 0 : index
    %45 = vector.load %arg7[%c1_26, %c0_27, %c0_28] : memref<3x16x16xbf16, #tpu.memory_space<vmem>>, vector<1x16x16xbf16>
    %46 = vector.shape_cast %45 : vector<1x16x16xbf16> to vector<16x16xbf16>
    %cst_29 = arith.constant dense<0.000000e+00> : vector<19x16xf32>
    %47 = tpu.matmul %44, %46, %cst_29 {dimension_numbers = #tpu.dot_dimension_numbers<[1], [0], [0], [1], [0, 0, 1, 1], [], []>} : vector<19x16xbf16>, vector<16x16xbf16>, vector<19x16xf32> -> vector<19x16xf32>
    %48 = arith.addf %42, %47 : vector<19x16xf32>
    %c2 = arith.constant 2 : index
    %c0_30 = arith.constant 0 : index
    %49 = tpu.strided_load %arg33[%c2, %c0_30] {strides = array<i32: 2, 1>} : memref<39x16xf32, #tpu.memory_space<vmem>>, vector<19x16xf32>
    %50 = arith.truncf %49 : vector<19x16xf32> to vector<19x16xbf16>
    %c2_31 = arith.constant 2 : index
    %c0_32 = arith.constant 0 : index
    %c0_33 = arith.constant 0 : index
    %51 = vector.load %arg7[%c2_31, %c0_32, %c0_33] : memref<3x16x16xbf16, #tpu.memory_space<vmem>>, vector<1x16x16xbf16>
    %52 = vector.shape_cast %51 : vector<1x16x16xbf16> to vector<16x16xbf16>
    %cst_34 = arith.constant dense<0.000000e+00> : vector<19x16xf32>
    %53 = tpu.matmul %50, %52, %cst_34 {dimension_numbers = #tpu.dot_dimension_numbers<[1], [0], [0], [1], [0, 0, 1, 1], [], []>} : vector<19x16xbf16>, vector<16x16xbf16>, vector<19x16xf32> -> vector<19x16xf32>
    %54 = arith.addf %48, %53 : vector<19x16xf32>
    %cst_35 = arith.constant 5.000000e-01 : f32
    %55 = vector.broadcast %cst_35 : f32 to vector<19x16xf32>
    %56 = arith.mulf %55, %54 : vector<19x16xf32>
    %cst_36 = arith.constant 0.707106769 : f32
    %57 = vector.broadcast %cst_36 : f32 to vector<19x16xf32>
    %58 = arith.mulf %54, %57 : vector<19x16xf32>
    %59 = math.erf %58 : vector<19x16xf32>
    %cst_37 = arith.constant 1.000000e+00 : f32
    %60 = vector.broadcast %cst_37 : f32 to vector<19x16xf32>
    %61 = arith.addf %60, %59 : vector<19x16xf32>
    %62 = arith.mulf %56, %61 : vector<19x16xf32>
    %c0_38 = arith.constant 0 : index
    %c0_39 = arith.constant 0 : index
    %63 = vector.load %arg8[%c0_38, %c0_39] : memref<1x16xf32, #tpu.memory_space<vmem>>, vector<1x16xf32>
    %c0_40 = arith.constant 0 : index
    %c0_41 = arith.constant 0 : index
    %64 = vector.load %arg9[%c0_40, %c0_41] : memref<1x16xf32, #tpu.memory_space<vmem>>, vector<1x16xf32>
    %cst_42 = arith.constant dense<0.000000e+00> : vector<19xf32>
    %65 = vector.multi_reduction <add>, %62, %cst_42 [1] : vector<19x16xf32> to vector<19xf32>
    %66 = vector.shape_cast %65 : vector<19xf32> to vector<19x1xf32>
    %cst_43 = arith.constant 1.600000e+01 : f32
    %67 = vector.broadcast %cst_43 : f32 to vector<19x1xf32>
    %68 = arith.divf %66, %67 : vector<19x1xf32>
    %69 = vector.broadcast %68 : vector<19x1xf32> to vector<19x16xf32>
    %70 = arith.subf %62, %69 : vector<19x16xf32>
    %71 = arith.mulf %70, %70 : vector<19x16xf32>
    %cst_44 = arith.constant dense<0.000000e+00> : vector<19xf32>
    %72 = vector.multi_reduction <add>, %71, %cst_44 [1] : vector<19x16xf32> to vector<19xf32>
    %73 = vector.shape_cast %72 : vector<19xf32> to vector<19x1xf32>
    %cst_45 = arith.constant 1.600000e+01 : f32
    %74 = vector.broadcast %cst_45 : f32 to vector<19x1xf32>
    %75 = arith.divf %73, %74 : vector<19x1xf32>
    %cst_46 = arith.constant 9.99999974E-6 : f32
    %76 = vector.broadcast %cst_46 : f32 to vector<19x1xf32>
    %77 = arith.addf %75, %76 : vector<19x1xf32>
    %78 = math.rsqrt %77 : vector<19x1xf32>
    %79 = vector.broadcast %78 : vector<19x1xf32> to vector<19x16xf32>
    %80 = arith.mulf %70, %79 : vector<19x16xf32>
    %81 = vector.broadcast %63 : vector<1x16xf32> to vector<19x16xf32>
    %82 = arith.mulf %80, %81 : vector<19x16xf32>
    %83 = vector.broadcast %64 : vector<1x16xf32> to vector<19x16xf32>
    %84 = arith.addf %82, %83 : vector<19x16xf32>
    %85 = arith.truncf %84 : vector<19x16xf32> to vector<19x16xbf16>
    %c0_47 = arith.constant 0 : index
    %c0_48 = arith.constant 0 : index
    %86 = vector.load %arg10[%c0_47, %c0_48] : memref<16x32xbf16, #tpu.memory_space<vmem>>, vector<16x32xbf16>
    %cst_49 = arith.constant dense<0.000000e+00> : vector<19x32xf32>
    %87 = tpu.matmul %85, %86, %cst_49 {dimension_numbers = #tpu.dot_dimension_numbers<[1], [0], [0], [1], [0, 0, 1, 1], [], []>} : vector<19x16xbf16>, vector<16x32xbf16>, vector<19x32xf32> -> vector<19x32xf32>
    %c0_50 = arith.constant 0 : index
    %c0_51 = arith.constant 0 : index
    %88 = vector.load %arg11[%c0_50, %c0_51] : memref<1x32xf32, #tpu.memory_space<vmem>>, vector<1x32xf32>
    %89 = vector.broadcast %88 : vector<1x32xf32> to vector<19x32xf32>
    %90 = arith.addf %87, %89 : vector<19x32xf32>
    %c0_52 = arith.constant 0 : index
    %c0_53 = arith.constant 0 : index
    %c0_54 = arith.constant 0 : index
    %91 = vector.load %arg2[%c0_52, %c0_53, %c0_54] : memref<1x19x1xf32, #tpu.memory_space<vmem>>, vector<1x19x1xf32>
    %92 = vector.shape_cast %91 : vector<1x19x1xf32> to vector<19x1xf32>
    %93 = vector.broadcast %92 : vector<19x1xf32> to vector<19x32xf32>
    %94 = arith.mulf %90, %93 : vector<19x32xf32>
    %cst_55 = arith.constant 0.000000e+00 : f32
    %95 = vector.broadcast %cst_55 : f32 to vector<23x32xf32>
    %c0_56 = arith.constant 0 : index
    %c0_57 = arith.constant 0 : index
    %96 = vector.load %arg34[%c0_56, %c0_57] : memref<23x32xf32, #tpu.memory_space<vmem>>, vector<23x32xf32>
    tpu.vector_store %arg34[%c0_56, %c0_57], %95 {strides = array<i32>} : memref<23x32xf32, #tpu.memory_space<vmem>>, vector<23x32xf32>,
    %c2_58 = arith.constant 2 : index
    %c0_59 = arith.constant 0 : index
    %97 = vector.load %arg34[%c2_58, %c0_59] : memref<23x32xf32, #tpu.memory_space<vmem>>, vector<19x32xf32>
    tpu.vector_store %arg34[%c2_58, %c0_59], %94 {strides = array<i32>} : memref<23x32xf32, #tpu.memory_space<vmem>>, vector<19x32xf32>,
    %cst_60 = arith.constant 0.000000e+00 : f32
    %98 = vector.broadcast %cst_60 : f32 to vector<19x32xf32>
    %c0_61 = arith.constant 0 : index
    %c0_62 = arith.constant 0 : index
    %99 = vector.load %arg34[%c0_61, %c0_62] : memref<23x32xf32, #tpu.memory_space<vmem>>, vector<19x32xf32>
    %100 = arith.truncf %99 : vector<19x32xf32> to vector<19x32xbf16>
    %c0_63 = arith.constant 0 : index
    %c0_64 = arith.constant 0 : index
    %c0_65 = arith.constant 0 : index
    %101 = vector.load %arg12[%c0_63, %c0_64, %c0_65] : memref<5x32x32xbf16, #tpu.memory_space<vmem>>, vector<1x32x32xbf16>
    %102 = vector.shape_cast %101 : vector<1x32x32xbf16> to vector<32x32xbf16>
    %cst_66 = arith.constant dense<0.000000e+00> : vector<19x32xf32>
    %103 = tpu.matmul %100, %102, %cst_66 {dimension_numbers = #tpu.dot_dimension_numbers<[1], [0], [0], [1], [0, 0, 1, 1], [], []>} : vector<19x32xbf16>, vector<32x32xbf16>, vector<19x32xf32> -> vector<19x32xf32>
    %104 = arith.addf %98, %103 : vector<19x32xf32>
    %c1_67 = arith.constant 1 : index
    %c0_68 = arith.constant 0 : index
    %105 = vector.load %arg34[%c1_67, %c0_68] : memref<23x32xf32, #tpu.memory_space<vmem>>, vector<19x32xf32>
    %106 = arith.truncf %105 : vector<19x32xf32> to vector<19x32xbf16>
    %c1_69 = arith.constant 1 : index
    %c0_70 = arith.constant 0 : index
    %c0_71 = arith.constant 0 : index
    %107 = vector.load %arg12[%c1_69, %c0_70, %c0_71] : memref<5x32x32xbf16, #tpu.memory_space<vmem>>, vector<1x32x32xbf16>
    %108 = vector.shape_cast %107 : vector<1x32x32xbf16> to vector<32x32xbf16>
    %cst_72 = arith.constant dense<0.000000e+00> : vector<19x32xf32>
    %109 = tpu.matmul %106, %108, %cst_72 {dimension_numbers = #tpu.dot_dimension_numbers<[1], [0], [0], [1], [0, 0, 1, 1], [], []>} : vector<19x32xbf16>, vector<32x32xbf16>, vector<19x32xf32> -> vector<19x32xf32>
    %110 = arith.addf %104, %109 : vector<19x32xf32>
    %c2_73 = arith.constant 2 : index
    %c0_74 = arith.constant 0 : index
    %111 = vector.load %arg34[%c2_73, %c0_74] : memref<23x32xf32, #tpu.memory_space<vmem>>, vector<19x32xf32>
    %112 = arith.truncf %111 : vector<19x32xf32> to vector<19x32xbf16>
    %c2_75 = arith.constant 2 : index
    %c0_76 = arith.constant 0 : index
    %c0_77 = arith.constant 0 : index
    %113 = vector.load %arg12[%c2_75, %c0_76, %c0_77] : memref<5x32x32xbf16, #tpu.memory_space<vmem>>, vector<1x32x32xbf16>
    %114 = vector.shape_cast %113 : vector<1x32x32xbf16> to vector<32x32xbf16>
    %cst_78 = arith.constant dense<0.000000e+00> : vector<19x32xf32>
    %115 = tpu.matmul %112, %114, %cst_78 {dimension_numbers = #tpu.dot_dimension_numbers<[1], [0], [0], [1], [0, 0, 1, 1], [], []>} : vector<19x32xbf16>, vector<32x32xbf16>, vector<19x32xf32> -> vector<19x32xf32>
    %116 = arith.addf %110, %115 : vector<19x32xf32>
    %c3 = arith.constant 3 : index
    %c0_79 = arith.constant 0 : index
    %117 = vector.load %arg34[%c3, %c0_79] : memref<23x32xf32, #tpu.memory_space<vmem>>, vector<19x32xf32>
    %118 = arith.truncf %117 : vector<19x32xf32> to vector<19x32xbf16>
    %c3_80 = arith.constant 3 : index
    %c0_81 = arith.constant 0 : index
    %c0_82 = arith.constant 0 : index
    %119 = vector.load %arg12[%c3_80, %c0_81, %c0_82] : memref<5x32x32xbf16, #tpu.memory_space<vmem>>, vector<1x32x32xbf16>
    %120 = vector.shape_cast %119 : vector<1x32x32xbf16> to vector<32x32xbf16>
    %cst_83 = arith.constant dense<0.000000e+00> : vector<19x32xf32>
    %121 = tpu.matmul %118, %120, %cst_83 {dimension_numbers = #tpu.dot_dimension_numbers<[1], [0], [0], [1], [0, 0, 1, 1], [], []>} : vector<19x32xbf16>, vector<32x32xbf16>, vector<19x32xf32> -> vector<19x32xf32>
    %122 = arith.addf %116, %121 : vector<19x32xf32>
    %c4 = arith.constant 4 : index
    %c0_84 = arith.constant 0 : index
    %123 = vector.load %arg34[%c4, %c0_84] : memref<23x32xf32, #tpu.memory_space<vmem>>, vector<19x32xf32>
    %124 = arith.truncf %123 : vector<19x32xf32> to vector<19x32xbf16>
    %c4_85 = arith.constant 4 : index
    %c0_86 = arith.constant 0 : index
    %c0_87 = arith.constant 0 : index
    %125 = vector.load %arg12[%c4_85, %c0_86, %c0_87] : memref<5x32x32xbf16, #tpu.memory_space<vmem>>, vector<1x32x32xbf16>
    %126 = vector.shape_cast %125 : vector<1x32x32xbf16> to vector<32x32xbf16>
    %cst_88 = arith.constant dense<0.000000e+00> : vector<19x32xf32>
    %127 = tpu.matmul %124, %126, %cst_88 {dimension_numbers = #tpu.dot_dimension_numbers<[1], [0], [0], [1], [0, 0, 1, 1], [], []>} : vector<19x32xbf16>, vector<32x32xbf16>, vector<19x32xf32> -> vector<19x32xf32>
    %128 = arith.addf %122, %127 : vector<19x32xf32>
    %c0_89 = arith.constant 0 : index
    %c0_90 = arith.constant 0 : index
    %129 = vector.load %arg13[%c0_89, %c0_90] : memref<1x32xf32, #tpu.memory_space<vmem>>, vector<1x32xf32>
    %130 = vector.broadcast %129 : vector<1x32xf32> to vector<19x32xf32>
    %131 = arith.addf %128, %130 : vector<19x32xf32>
    %cst_91 = arith.constant 5.000000e-01 : f32
    %132 = vector.broadcast %cst_91 : f32 to vector<19x32xf32>
    %133 = arith.mulf %132, %131 : vector<19x32xf32>
    %cst_92 = arith.constant 0.707106769 : f32
    %134 = vector.broadcast %cst_92 : f32 to vector<19x32xf32>
    %135 = arith.mulf %131, %134 : vector<19x32xf32>
    %136 = math.erf %135 : vector<19x32xf32>
    %cst_93 = arith.constant 1.000000e+00 : f32
    %137 = vector.broadcast %cst_93 : f32 to vector<19x32xf32>
    %138 = arith.addf %137, %136 : vector<19x32xf32>
    %139 = arith.mulf %133, %138 : vector<19x32xf32>
    %140 = arith.addf %94, %139 : vector<19x32xf32>
    %c0_94 = arith.constant 0 : index
    %c0_95 = arith.constant 0 : index
    %141 = vector.load %arg14[%c0_94, %c0_95] : memref<1x32xf32, #tpu.memory_space<vmem>>, vector<1x32xf32>
    %c0_96 = arith.constant 0 : index
    %c0_97 = arith.constant 0 : index
    %142 = vector.load %arg15[%c0_96, %c0_97] : memref<1x32xf32, #tpu.memory_space<vmem>>, vector<1x32xf32>
    %cst_98 = arith.constant dense<0.000000e+00> : vector<19xf32>
    %143 = vector.multi_reduction <add>, %140, %cst_98 [1] : vector<19x32xf32> to vector<19xf32>
    %144 = vector.shape_cast %143 : vector<19xf32> to vector<19x1xf32>
    %cst_99 = arith.constant 3.200000e+01 : f32
    %145 = vector.broadcast %cst_99 : f32 to vector<19x1xf32>
    %146 = arith.divf %144, %145 : vector<19x1xf32>
    %147 = vector.broadcast %146 : vector<19x1xf32> to vector<19x32xf32>
    %148 = arith.subf %140, %147 : vector<19x32xf32>
    %149 = arith.mulf %148, %148 : vector<19x32xf32>
    %cst_100 = arith.constant dense<0.000000e+00> : vector<19xf32>
    %150 = vector.multi_reduction <add>, %149, %cst_100 [1] : vector<19x32xf32> to vector<19xf32>
    %151 = vector.shape_cast %150 : vector<19xf32> to vector<19x1xf32>
    %cst_101 = arith.constant 3.200000e+01 : f32
    %152 = vector.broadcast %cst_101 : f32 to vector<19x1xf32>
    %153 = arith.divf %151, %152 : vector<19x1xf32>
    %cst_102 = arith.constant 9.99999974E-6 : f32
    %154 = vector.broadcast %cst_102 : f32 to vector<19x1xf32>
    %155 = arith.addf %153, %154 : vector<19x1xf32>
    %156 = math.rsqrt %155 : vector<19x1xf32>
    %157 = vector.broadcast %156 : vector<19x1xf32> to vector<19x32xf32>
    %158 = arith.mulf %148, %157 : vector<19x32xf32>
    %159 = vector.broadcast %141 : vector<1x32xf32> to vector<19x32xf32>
    %160 = arith.mulf %158, %159 : vector<19x32xf32>
    %161 = vector.broadcast %142 : vector<1x32xf32> to vector<19x32xf32>
    %162 = arith.addf %160, %161 : vector<19x32xf32>
    %c0_103 = arith.constant 0 : index
    %c0_104 = arith.constant 0 : index
    %c0_105 = arith.constant 0 : index
    %163 = vector.load %arg3[%c0_103, %c0_104, %c0_105] : memref<1x1x19xf32, #tpu.memory_space<vmem>>, vector<1x1x19xf32>
    %164 = vector.shape_cast %163 : vector<1x1x19xf32> to vector<1x19xf32>
    %165 = vector.shape_cast %164 : vector<1x19xf32> to vector<1x19xf32>
    %166 = vector.broadcast %165 : vector<1x19xf32> to vector<19x19xf32>
    %167 = arith.truncf %162 : vector<19x32xf32> to vector<19x32xbf16>
    %cst_106 = arith.constant 0.000000e+00 : f32
    %168 = vector.broadcast %cst_106 : f32 to vector<19x32xf32>
    %c0_107 = arith.constant 0 : index
    %c0_108 = arith.constant 0 : index
    %c0_109 = arith.constant 0 : index
    %c0_110 = arith.constant 0 : index
    %169 = vector.load %arg16[%c0_107, %c0_108, %c0_109, %c0_110] : memref<2x4x32x8xbf16, #tpu.memory_space<vmem>>, vector<1x1x32x8xbf16>
    %170 = vector.shape_cast %169 : vector<1x1x32x8xbf16> to vector<32x8xbf16>
    %cst_111 = arith.constant dense<0.000000e+00> : vector<19x8xf32>
    %171 = tpu.matmul %167, %170, %cst_111 {dimension_numbers = #tpu.dot_dimension_numbers<[1], [0], [0], [1], [0, 0, 1, 1], [], []>} : vector<19x32xbf16>, vector<32x8xbf16>, vector<19x8xf32> -> vector<19x8xf32>
    %c0_112 = arith.constant 0 : index
    %c0_113 = arith.constant 0 : index
    %c0_114 = arith.constant 0 : index
    %c0_115 = arith.constant 0 : index
    %172 = vector.load %arg20[%c0_112, %c0_113, %c0_114, %c0_115] : memref<2x4x1x8xf32, #tpu.memory_space<vmem>>, vector<1x1x1x8xf32>
    %173 = vector.shape_cast %172 : vector<1x1x1x8xf32> to vector<1x8xf32>
    %174 = vector.broadcast %173 : vector<1x8xf32> to vector<19x8xf32>
    %175 = arith.addf %171, %174 : vector<19x8xf32>
    %c0_116 = arith.constant 0 : index
    %c0_117 = arith.constant 0 : index
    %c0_118 = arith.constant 0 : index
    %c0_119 = arith.constant 0 : index
    %176 = vector.load %arg17[%c0_116, %c0_117, %c0_118, %c0_119] : memref<2x4x32x8xbf16, #tpu.memory_space<vmem>>, vector<1x1x32x8xbf16>
    %177 = vector.shape_cast %176 : vector<1x1x32x8xbf16> to vector<32x8xbf16>
    %cst_120 = arith.constant dense<0.000000e+00> : vector<19x8xf32>
    %178 = tpu.matmul %167, %177, %cst_120 {dimension_numbers = #tpu.dot_dimension_numbers<[1], [0], [0], [1], [0, 0, 1, 1], [], []>} : vector<19x32xbf16>, vector<32x8xbf16>, vector<19x8xf32> -> vector<19x8xf32>
    %c0_121 = arith.constant 0 : index
    %c0_122 = arith.constant 0 : index
    %c0_123 = arith.constant 0 : index
    %c0_124 = arith.constant 0 : index
    %179 = vector.load %arg21[%c0_121, %c0_122, %c0_123, %c0_124] : memref<2x4x1x8xf32, #tpu.memory_space<vmem>>, vector<1x1x1x8xf32>
    %180 = vector.shape_cast %179 : vector<1x1x1x8xf32> to vector<1x8xf32>
    %181 = vector.broadcast %180 : vector<1x8xf32> to vector<19x8xf32>
    %182 = arith.addf %178, %181 : vector<19x8xf32>
    %c0_125 = arith.constant 0 : index
    %c0_126 = arith.constant 0 : index
    %c0_127 = arith.constant 0 : index
    %c0_128 = arith.constant 0 : index
    %183 = vector.load %arg18[%c0_125, %c0_126, %c0_127, %c0_128] : memref<2x4x32x8xbf16, #tpu.memory_space<vmem>>, vector<1x1x32x8xbf16>
    %184 = vector.shape_cast %183 : vector<1x1x32x8xbf16> to vector<32x8xbf16>
    %cst_129 = arith.constant dense<0.000000e+00> : vector<19x8xf32>
    %185 = tpu.matmul %167, %184, %cst_129 {dimension_numbers = #tpu.dot_dimension_numbers<[1], [0], [0], [1], [0, 0, 1, 1], [], []>} : vector<19x32xbf16>, vector<32x8xbf16>, vector<19x8xf32> -> vector<19x8xf32>
    %c0_130 = arith.constant 0 : index
    %c0_131 = arith.constant 0 : index
    %c0_132 = arith.constant 0 : index
    %c0_133 = arith.constant 0 : index
    %186 = vector.load %arg22[%c0_130, %c0_131, %c0_132, %c0_133] : memref<2x4x1x8xf32, #tpu.memory_space<vmem>>, vector<1x1x1x8xf32>
    %187 = vector.shape_cast %186 : vector<1x1x1x8xf32> to vector<1x8xf32>
    %188 = vector.broadcast %187 : vector<1x8xf32> to vector<19x8xf32>
    %189 = arith.addf %185, %188 : vector<19x8xf32>
    %cst_134 = arith.constant 0.353553385 : f32
    %190 = vector.broadcast %cst_134 : f32 to vector<19x8xf32>
    %191 = arith.mulf %175, %190 : vector<19x8xf32>
    %192 = arith.truncf %191 : vector<19x8xf32> to vector<19x8xbf16>
    %193 = arith.truncf %182 : vector<19x8xf32> to vector<19x8xbf16>
    %cst_135 = arith.constant dense<0.000000e+00> : vector<19x19xf32>
    %194 = tpu.matmul %192, %193, %cst_135 {dimension_numbers = #tpu.dot_dimension_numbers<[1], [1], [0], [0], [0, 0, 1, 0], [], []>} : vector<19x8xbf16>, vector<19x8xbf16>, vector<19x19xf32> -> vector<19x19xf32>
    %195 = arith.addf %194, %166 : vector<19x19xf32>
    %cst_136 = arith.constant dense<0xFF800000> : vector<19xf32>
    %196 = vector.multi_reduction <maximumf>, %195, %cst_136 [1] : vector<19x19xf32> to vector<19xf32>
    %197 = vector.shape_cast %196 : vector<19xf32> to vector<19x1xf32>
    %198 = vector.broadcast %197 : vector<19x1xf32> to vector<19x19xf32>
    %199 = arith.subf %195, %198 : vector<19x19xf32>
    %200 = math.exp %199 : vector<19x19xf32>
    %cst_137 = arith.constant dense<0.000000e+00> : vector<19xf32>
    %201 = vector.multi_reduction <add>, %200, %cst_137 [1] : vector<19x19xf32> to vector<19xf32>
    %202 = vector.shape_cast %201 : vector<19xf32> to vector<19x1xf32>
    %203 = tpu.reciprocal %202 {approx = true} : vector<19x1xf32> -> vector<19x1xf32>
    %204 = vector.broadcast %203 : vector<19x1xf32> to vector<19x19xf32>
    %205 = arith.mulf %200, %204 : vector<19x19xf32>
    %206 = arith.truncf %205 : vector<19x19xf32> to vector<19x19xbf16>
    %207 = arith.truncf %189 : vector<19x8xf32> to vector<19x8xbf16>
    %cst_138 = arith.constant dense<0.000000e+00> : vector<19x8xf32>
    %208 = tpu.matmul %206, %207, %cst_138 {dimension_numbers = #tpu.dot_dimension_numbers<[1], [0], [0], [1], [0, 0, 1, 1], [], []>} : vector<19x19xbf16>, vector<19x8xbf16>, vector<19x8xf32> -> vector<19x8xf32>
    %209 = arith.truncf %208 : vector<19x8xf32> to vector<19x8xbf16>
    %c0_139 = arith.constant 0 : index
    %c0_140 = arith.constant 0 : index
    %c0_141 = arith.constant 0 : index
    %c0_142 = arith.constant 0 : index
    %210 = vector.load %arg19[%c0_139, %c0_140, %c0_141, %c0_142] : memref<2x4x8x32xbf16, #tpu.memory_space<vmem>>, vector<1x1x8x32xbf16>
    %211 = vector.shape_cast %210 : vector<1x1x8x32xbf16> to vector<8x32xbf16>
    %cst_143 = arith.constant dense<0.000000e+00> : vector<19x32xf32>
    %212 = tpu.matmul %209, %211, %cst_143 {dimension_numbers = #tpu.dot_dimension_numbers<[1], [0], [0], [1], [0, 0, 1, 1], [], []>} : vector<19x8xbf16>, vector<8x32xbf16>, vector<19x32xf32> -> vector<19x32xf32>
    %213 = arith.addf %168, %212 : vector<19x32xf32>
    %c0_144 = arith.constant 0 : index
    %c1_145 = arith.constant 1 : index
    %c0_146 = arith.constant 0 : index
    %c0_147 = arith.constant 0 : index
    %214 = vector.load %arg16[%c0_144, %c1_145, %c0_146, %c0_147] : memref<2x4x32x8xbf16, #tpu.memory_space<vmem>>, vector<1x1x32x8xbf16>
    %215 = vector.shape_cast %214 : vector<1x1x32x8xbf16> to vector<32x8xbf16>
    %cst_148 = arith.constant dense<0.000000e+00> : vector<19x8xf32>
    %216 = tpu.matmul %167, %215, %cst_148 {dimension_numbers = #tpu.dot_dimension_numbers<[1], [0], [0], [1], [0, 0, 1, 1], [], []>} : vector<19x32xbf16>, vector<32x8xbf16>, vector<19x8xf32> -> vector<19x8xf32>
    %c0_149 = arith.constant 0 : index
    %c1_150 = arith.constant 1 : index
    %c0_151 = arith.constant 0 : index
    %c0_152 = arith.constant 0 : index
    %217 = vector.load %arg20[%c0_149, %c1_150, %c0_151, %c0_152] : memref<2x4x1x8xf32, #tpu.memory_space<vmem>>, vector<1x1x1x8xf32>
    %218 = vector.shape_cast %217 : vector<1x1x1x8xf32> to vector<1x8xf32>
    %219 = vector.broadcast %218 : vector<1x8xf32> to vector<19x8xf32>
    %220 = arith.addf %216, %219 : vector<19x8xf32>
    %c0_153 = arith.constant 0 : index
    %c1_154 = arith.constant 1 : index
    %c0_155 = arith.constant 0 : index
    %c0_156 = arith.constant 0 : index
    %221 = vector.load %arg17[%c0_153, %c1_154, %c0_155, %c0_156] : memref<2x4x32x8xbf16, #tpu.memory_space<vmem>>, vector<1x1x32x8xbf16>
    %222 = vector.shape_cast %221 : vector<1x1x32x8xbf16> to vector<32x8xbf16>
    %cst_157 = arith.constant dense<0.000000e+00> : vector<19x8xf32>
    %223 = tpu.matmul %167, %222, %cst_157 {dimension_numbers = #tpu.dot_dimension_numbers<[1], [0], [0], [1], [0, 0, 1, 1], [], []>} : vector<19x32xbf16>, vector<32x8xbf16>, vector<19x8xf32> -> vector<19x8xf32>
    %c0_158 = arith.constant 0 : index
    %c1_159 = arith.constant 1 : index
    %c0_160 = arith.constant 0 : index
    %c0_161 = arith.constant 0 : index
    %224 = vector.load %arg21[%c0_158, %c1_159, %c0_160, %c0_161] : memref<2x4x1x8xf32, #tpu.memory_space<vmem>>, vector<1x1x1x8xf32>
    %225 = vector.shape_cast %224 : vector<1x1x1x8xf32> to vector<1x8xf32>
    %226 = vector.broadcast %225 : vector<1x8xf32> to vector<19x8xf32>
    %227 = arith.addf %223, %226 : vector<19x8xf32>
    %c0_162 = arith.constant 0 : index
    %c1_163 = arith.constant 1 : index
    %c0_164 = arith.constant 0 : index
    %c0_165 = arith.constant 0 : index
    %228 = vector.load %arg18[%c0_162, %c1_163, %c0_164, %c0_165] : memref<2x4x32x8xbf16, #tpu.memory_space<vmem>>, vector<1x1x32x8xbf16>
    %229 = vector.shape_cast %228 : vector<1x1x32x8xbf16> to vector<32x8xbf16>
    %cst_166 = arith.constant dense<0.000000e+00> : vector<19x8xf32>
    %230 = tpu.matmul %167, %229, %cst_166 {dimension_numbers = #tpu.dot_dimension_numbers<[1], [0], [0], [1], [0, 0, 1, 1], [], []>} : vector<19x32xbf16>, vector<32x8xbf16>, vector<19x8xf32> -> vector<19x8xf32>
    %c0_167 = arith.constant 0 : index
    %c1_168 = arith.constant 1 : index
    %c0_169 = arith.constant 0 : index
    %c0_170 = arith.constant 0 : index
    %231 = vector.load %arg22[%c0_167, %c1_168, %c0_169, %c0_170] : memref<2x4x1x8xf32, #tpu.memory_space<vmem>>, vector<1x1x1x8xf32>
    %232 = vector.shape_cast %231 : vector<1x1x1x8xf32> to vector<1x8xf32>
    %233 = vector.broadcast %232 : vector<1x8xf32> to vector<19x8xf32>
    %234 = arith.addf %230, %233 : vector<19x8xf32>
    %cst_171 = arith.constant 0.353553385 : f32
    %235 = vector.broadcast %cst_171 : f32 to vector<19x8xf32>
    %236 = arith.mulf %220, %235 : vector<19x8xf32>
    %237 = arith.truncf %236 : vector<19x8xf32> to vector<19x8xbf16>
    %238 = arith.truncf %227 : vector<19x8xf32> to vector<19x8xbf16>
    %cst_172 = arith.constant dense<0.000000e+00> : vector<19x19xf32>
    %239 = tpu.matmul %237, %238, %cst_172 {dimension_numbers = #tpu.dot_dimension_numbers<[1], [1], [0], [0], [0, 0, 1, 0], [], []>} : vector<19x8xbf16>, vector<19x8xbf16>, vector<19x19xf32> -> vector<19x19xf32>
    %240 = arith.addf %239, %166 : vector<19x19xf32>
    %cst_173 = arith.constant dense<0xFF800000> : vector<19xf32>
    %241 = vector.multi_reduction <maximumf>, %240, %cst_173 [1] : vector<19x19xf32> to vector<19xf32>
    %242 = vector.shape_cast %241 : vector<19xf32> to vector<19x1xf32>
    %243 = vector.broadcast %242 : vector<19x1xf32> to vector<19x19xf32>
    %244 = arith.subf %240, %243 : vector<19x19xf32>
    %245 = math.exp %244 : vector<19x19xf32>
    %cst_174 = arith.constant dense<0.000000e+00> : vector<19xf32>
    %246 = vector.multi_reduction <add>, %245, %cst_174 [1] : vector<19x19xf32> to vector<19xf32>
    %247 = vector.shape_cast %246 : vector<19xf32> to vector<19x1xf32>
    %248 = tpu.reciprocal %247 {approx = true} : vector<19x1xf32> -> vector<19x1xf32>
    %249 = vector.broadcast %248 : vector<19x1xf32> to vector<19x19xf32>
    %250 = arith.mulf %245, %249 : vector<19x19xf32>
    %251 = arith.truncf %250 : vector<19x19xf32> to vector<19x19xbf16>
    %252 = arith.truncf %234 : vector<19x8xf32> to vector<19x8xbf16>
    %cst_175 = arith.constant dense<0.000000e+00> : vector<19x8xf32>
    %253 = tpu.matmul %251, %252, %cst_175 {dimension_numbers = #tpu.dot_dimension_numbers<[1], [0], [0], [1], [0, 0, 1, 1], [], []>} : vector<19x19xbf16>, vector<19x8xbf16>, vector<19x8xf32> -> vector<19x8xf32>
    %254 = arith.truncf %253 : vector<19x8xf32> to vector<19x8xbf16>
    %c0_176 = arith.constant 0 : index
    %c1_177 = arith.constant 1 : index
    %c0_178 = arith.constant 0 : index
    %c0_179 = arith.constant 0 : index
    %255 = vector.load %arg19[%c0_176, %c1_177, %c0_178, %c0_179] : memref<2x4x8x32xbf16, #tpu.memory_space<vmem>>, vector<1x1x8x32xbf16>
    %256 = vector.shape_cast %255 : vector<1x1x8x32xbf16> to vector<8x32xbf16>
    %cst_180 = arith.constant dense<0.000000e+00> : vector<19x32xf32>
    %257 = tpu.matmul %254, %256, %cst_180 {dimension_numbers = #tpu.dot_dimension_numbers<[1], [0], [0], [1], [0, 0, 1, 1], [], []>} : vector<19x8xbf16>, vector<8x32xbf16>, vector<19x32xf32> -> vector<19x32xf32>
    %258 = arith.addf %213, %257 : vector<19x32xf32>
    %c0_181 = arith.constant 0 : index
    %c2_182 = arith.constant 2 : index
    %c0_183 = arith.constant 0 : index
    %c0_184 = arith.constant 0 : index
    %259 = vector.load %arg16[%c0_181, %c2_182, %c0_183, %c0_184] : memref<2x4x32x8xbf16, #tpu.memory_space<vmem>>, vector<1x1x32x8xbf16>
    %260 = vector.shape_cast %259 : vector<1x1x32x8xbf16> to vector<32x8xbf16>
    %cst_185 = arith.constant dense<0.000000e+00> : vector<19x8xf32>
    %261 = tpu.matmul %167, %260, %cst_185 {dimension_numbers = #tpu.dot_dimension_numbers<[1], [0], [0], [1], [0, 0, 1, 1], [], []>} : vector<19x32xbf16>, vector<32x8xbf16>, vector<19x8xf32> -> vector<19x8xf32>
    %c0_186 = arith.constant 0 : index
    %c2_187 = arith.constant 2 : index
    %c0_188 = arith.constant 0 : index
    %c0_189 = arith.constant 0 : index
    %262 = vector.load %arg20[%c0_186, %c2_187, %c0_188, %c0_189] : memref<2x4x1x8xf32, #tpu.memory_space<vmem>>, vector<1x1x1x8xf32>
    %263 = vector.shape_cast %262 : vector<1x1x1x8xf32> to vector<1x8xf32>
    %264 = vector.broadcast %263 : vector<1x8xf32> to vector<19x8xf32>
    %265 = arith.addf %261, %264 : vector<19x8xf32>
    %c0_190 = arith.constant 0 : index
    %c2_191 = arith.constant 2 : index
    %c0_192 = arith.constant 0 : index
    %c0_193 = arith.constant 0 : index
    %266 = vector.load %arg17[%c0_190, %c2_191, %c0_192, %c0_193] : memref<2x4x32x8xbf16, #tpu.memory_space<vmem>>, vector<1x1x32x8xbf16>
    %267 = vector.shape_cast %266 : vector<1x1x32x8xbf16> to vector<32x8xbf16>
    %cst_194 = arith.constant dense<0.000000e+00> : vector<19x8xf32>
    %268 = tpu.matmul %167, %267, %cst_194 {dimension_numbers = #tpu.dot_dimension_numbers<[1], [0], [0], [1], [0, 0, 1, 1], [], []>} : vector<19x32xbf16>, vector<32x8xbf16>, vector<19x8xf32> -> vector<19x8xf32>
    %c0_195 = arith.constant 0 : index
    %c2_196 = arith.constant 2 : index
    %c0_197 = arith.constant 0 : index
    %c0_198 = arith.constant 0 : index
    %269 = vector.load %arg21[%c0_195, %c2_196, %c0_197, %c0_198] : memref<2x4x1x8xf32, #tpu.memory_space<vmem>>, vector<1x1x1x8xf32>
    %270 = vector.shape_cast %269 : vector<1x1x1x8xf32> to vector<1x8xf32>
    %271 = vector.broadcast %270 : vector<1x8xf32> to vector<19x8xf32>
    %272 = arith.addf %268, %271 : vector<19x8xf32>
    %c0_199 = arith.constant 0 : index
    %c2_200 = arith.constant 2 : index
    %c0_201 = arith.constant 0 : index
    %c0_202 = arith.constant 0 : index
    %273 = vector.load %arg18[%c0_199, %c2_200, %c0_201, %c0_202] : memref<2x4x32x8xbf16, #tpu.memory_space<vmem>>, vector<1x1x32x8xbf16>
    %274 = vector.shape_cast %273 : vector<1x1x32x8xbf16> to vector<32x8xbf16>
    %cst_203 = arith.constant dense<0.000000e+00> : vector<19x8xf32>
    %275 = tpu.matmul %167, %274, %cst_203 {dimension_numbers = #tpu.dot_dimension_numbers<[1], [0], [0], [1], [0, 0, 1, 1], [], []>} : vector<19x32xbf16>, vector<32x8xbf16>, vector<19x8xf32> -> vector<19x8xf32>
    %c0_204 = arith.constant 0 : index
    %c2_205 = arith.constant 2 : index
    %c0_206 = arith.constant 0 : index
    %c0_207 = arith.constant 0 : index
    %276 = vector.load %arg22[%c0_204, %c2_205, %c0_206, %c0_207] : memref<2x4x1x8xf32, #tpu.memory_space<vmem>>, vector<1x1x1x8xf32>
    %277 = vector.shape_cast %276 : vector<1x1x1x8xf32> to vector<1x8xf32>
    %278 = vector.broadcast %277 : vector<1x8xf32> to vector<19x8xf32>
    %279 = arith.addf %275, %278 : vector<19x8xf32>
    %cst_208 = arith.constant 0.353553385 : f32
    %280 = vector.broadcast %cst_208 : f32 to vector<19x8xf32>
    %281 = arith.mulf %265, %280 : vector<19x8xf32>
    %282 = arith.truncf %281 : vector<19x8xf32> to vector<19x8xbf16>
    %283 = arith.truncf %272 : vector<19x8xf32> to vector<19x8xbf16>
    %cst_209 = arith.constant dense<0.000000e+00> : vector<19x19xf32>
    %284 = tpu.matmul %282, %283, %cst_209 {dimension_numbers = #tpu.dot_dimension_numbers<[1], [1], [0], [0], [0, 0, 1, 0], [], []>} : vector<19x8xbf16>, vector<19x8xbf16>, vector<19x19xf32> -> vector<19x19xf32>
    %285 = arith.addf %284, %166 : vector<19x19xf32>
    %cst_210 = arith.constant dense<0xFF800000> : vector<19xf32>
    %286 = vector.multi_reduction <maximumf>, %285, %cst_210 [1] : vector<19x19xf32> to vector<19xf32>
    %287 = vector.shape_cast %286 : vector<19xf32> to vector<19x1xf32>
    %288 = vector.broadcast %287 : vector<19x1xf32> to vector<19x19xf32>
    %289 = arith.subf %285, %288 : vector<19x19xf32>
    %290 = math.exp %289 : vector<19x19xf32>
    %cst_211 = arith.constant dense<0.000000e+00> : vector<19xf32>
    %291 = vector.multi_reduction <add>, %290, %cst_211 [1] : vector<19x19xf32> to vector<19xf32>
    %292 = vector.shape_cast %291 : vector<19xf32> to vector<19x1xf32>
    %293 = tpu.reciprocal %292 {approx = true} : vector<19x1xf32> -> vector<19x1xf32>
    %294 = vector.broadcast %293 : vector<19x1xf32> to vector<19x19xf32>
    %295 = arith.mulf %290, %294 : vector<19x19xf32>
    %296 = arith.truncf %295 : vector<19x19xf32> to vector<19x19xbf16>
    %297 = arith.truncf %279 : vector<19x8xf32> to vector<19x8xbf16>
    %cst_212 = arith.constant dense<0.000000e+00> : vector<19x8xf32>
    %298 = tpu.matmul %296, %297, %cst_212 {dimension_numbers = #tpu.dot_dimension_numbers<[1], [0], [0], [1], [0, 0, 1, 1], [], []>} : vector<19x19xbf16>, vector<19x8xbf16>, vector<19x8xf32> -> vector<19x8xf32>
    %299 = arith.truncf %298 : vector<19x8xf32> to vector<19x8xbf16>
    %c0_213 = arith.constant 0 : index
    %c2_214 = arith.constant 2 : index
    %c0_215 = arith.constant 0 : index
    %c0_216 = arith.constant 0 : index
    %300 = vector.load %arg19[%c0_213, %c2_214, %c0_215, %c0_216] : memref<2x4x8x32xbf16, #tpu.memory_space<vmem>>, vector<1x1x8x32xbf16>
    %301 = vector.shape_cast %300 : vector<1x1x8x32xbf16> to vector<8x32xbf16>
    %cst_217 = arith.constant dense<0.000000e+00> : vector<19x32xf32>
    %302 = tpu.matmul %299, %301, %cst_217 {dimension_numbers = #tpu.dot_dimension_numbers<[1], [0], [0], [1], [0, 0, 1, 1], [], []>} : vector<19x8xbf16>, vector<8x32xbf16>, vector<19x32xf32> -> vector<19x32xf32>
    %303 = arith.addf %258, %302 : vector<19x32xf32>
    %c0_218 = arith.constant 0 : index
    %c3_219 = arith.constant 3 : index
    %c0_220 = arith.constant 0 : index
    %c0_221 = arith.constant 0 : index
    %304 = vector.load %arg16[%c0_218, %c3_219, %c0_220, %c0_221] : memref<2x4x32x8xbf16, #tpu.memory_space<vmem>>, vector<1x1x32x8xbf16>
    %305 = vector.shape_cast %304 : vector<1x1x32x8xbf16> to vector<32x8xbf16>
    %cst_222 = arith.constant dense<0.000000e+00> : vector<19x8xf32>
    %306 = tpu.matmul %167, %305, %cst_222 {dimension_numbers = #tpu.dot_dimension_numbers<[1], [0], [0], [1], [0, 0, 1, 1], [], []>} : vector<19x32xbf16>, vector<32x8xbf16>, vector<19x8xf32> -> vector<19x8xf32>
    %c0_223 = arith.constant 0 : index
    %c3_224 = arith.constant 3 : index
    %c0_225 = arith.constant 0 : index
    %c0_226 = arith.constant 0 : index
    %307 = vector.load %arg20[%c0_223, %c3_224, %c0_225, %c0_226] : memref<2x4x1x8xf32, #tpu.memory_space<vmem>>, vector<1x1x1x8xf32>
    %308 = vector.shape_cast %307 : vector<1x1x1x8xf32> to vector<1x8xf32>
    %309 = vector.broadcast %308 : vector<1x8xf32> to vector<19x8xf32>
    %310 = arith.addf %306, %309 : vector<19x8xf32>
    %c0_227 = arith.constant 0 : index
    %c3_228 = arith.constant 3 : index
    %c0_229 = arith.constant 0 : index
    %c0_230 = arith.constant 0 : index
    %311 = vector.load %arg17[%c0_227, %c3_228, %c0_229, %c0_230] : memref<2x4x32x8xbf16, #tpu.memory_space<vmem>>, vector<1x1x32x8xbf16>
    %312 = vector.shape_cast %311 : vector<1x1x32x8xbf16> to vector<32x8xbf16>
    %cst_231 = arith.constant dense<0.000000e+00> : vector<19x8xf32>
    %313 = tpu.matmul %167, %312, %cst_231 {dimension_numbers = #tpu.dot_dimension_numbers<[1], [0], [0], [1], [0, 0, 1, 1], [], []>} : vector<19x32xbf16>, vector<32x8xbf16>, vector<19x8xf32> -> vector<19x8xf32>
    %c0_232 = arith.constant 0 : index
    %c3_233 = arith.constant 3 : index
    %c0_234 = arith.constant 0 : index
    %c0_235 = arith.constant 0 : index
    %314 = vector.load %arg21[%c0_232, %c3_233, %c0_234, %c0_235] : memref<2x4x1x8xf32, #tpu.memory_space<vmem>>, vector<1x1x1x8xf32>
    %315 = vector.shape_cast %314 : vector<1x1x1x8xf32> to vector<1x8xf32>
    %316 = vector.broadcast %315 : vector<1x8xf32> to vector<19x8xf32>
    %317 = arith.addf %313, %316 : vector<19x8xf32>
    %c0_236 = arith.constant 0 : index
    %c3_237 = arith.constant 3 : index
    %c0_238 = arith.constant 0 : index
    %c0_239 = arith.constant 0 : index
    %318 = vector.load %arg18[%c0_236, %c3_237, %c0_238, %c0_239] : memref<2x4x32x8xbf16, #tpu.memory_space<vmem>>, vector<1x1x32x8xbf16>
    %319 = vector.shape_cast %318 : vector<1x1x32x8xbf16> to vector<32x8xbf16>
    %cst_240 = arith.constant dense<0.000000e+00> : vector<19x8xf32>
    %320 = tpu.matmul %167, %319, %cst_240 {dimension_numbers = #tpu.dot_dimension_numbers<[1], [0], [0], [1], [0, 0, 1, 1], [], []>} : vector<19x32xbf16>, vector<32x8xbf16>, vector<19x8xf32> -> vector<19x8xf32>
    %c0_241 = arith.constant 0 : index
    %c3_242 = arith.constant 3 : index
    %c0_243 = arith.constant 0 : index
    %c0_244 = arith.constant 0 : index
    %321 = vector.load %arg22[%c0_241, %c3_242, %c0_243, %c0_244] : memref<2x4x1x8xf32, #tpu.memory_space<vmem>>, vector<1x1x1x8xf32>
    %322 = vector.shape_cast %321 : vector<1x1x1x8xf32> to vector<1x8xf32>
    %323 = vector.broadcast %322 : vector<1x8xf32> to vector<19x8xf32>
    %324 = arith.addf %320, %323 : vector<19x8xf32>
    %cst_245 = arith.constant 0.353553385 : f32
    %325 = vector.broadcast %cst_245 : f32 to vector<19x8xf32>
    %326 = arith.mulf %310, %325 : vector<19x8xf32>
    %327 = arith.truncf %326 : vector<19x8xf32> to vector<19x8xbf16>
    %328 = arith.truncf %317 : vector<19x8xf32> to vector<19x8xbf16>
    %cst_246 = arith.constant dense<0.000000e+00> : vector<19x19xf32>
    %329 = tpu.matmul %327, %328, %cst_246 {dimension_numbers = #tpu.dot_dimension_numbers<[1], [1], [0], [0], [0, 0, 1, 0], [], []>} : vector<19x8xbf16>, vector<19x8xbf16>, vector<19x19xf32> -> vector<19x19xf32>
    %330 = arith.addf %329, %166 : vector<19x19xf32>
    %cst_247 = arith.constant dense<0xFF800000> : vector<19xf32>
    %331 = vector.multi_reduction <maximumf>, %330, %cst_247 [1] : vector<19x19xf32> to vector<19xf32>
    %332 = vector.shape_cast %331 : vector<19xf32> to vector<19x1xf32>
    %333 = vector.broadcast %332 : vector<19x1xf32> to vector<19x19xf32>
    %334 = arith.subf %330, %333 : vector<19x19xf32>
    %335 = math.exp %334 : vector<19x19xf32>
    %cst_248 = arith.constant dense<0.000000e+00> : vector<19xf32>
    %336 = vector.multi_reduction <add>, %335, %cst_248 [1] : vector<19x19xf32> to vector<19xf32>
    %337 = vector.shape_cast %336 : vector<19xf32> to vector<19x1xf32>
    %338 = tpu.reciprocal %337 {approx = true} : vector<19x1xf32> -> vector<19x1xf32>
    %339 = vector.broadcast %338 : vector<19x1xf32> to vector<19x19xf32>
    %340 = arith.mulf %335, %339 : vector<19x19xf32>
    %341 = arith.truncf %340 : vector<19x19xf32> to vector<19x19xbf16>
    %342 = arith.truncf %324 : vector<19x8xf32> to vector<19x8xbf16>
    %cst_249 = arith.constant dense<0.000000e+00> : vector<19x8xf32>
    %343 = tpu.matmul %341, %342, %cst_249 {dimension_numbers = #tpu.dot_dimension_numbers<[1], [0], [0], [1], [0, 0, 1, 1], [], []>} : vector<19x19xbf16>, vector<19x8xbf16>, vector<19x8xf32> -> vector<19x8xf32>
    %344 = arith.truncf %343 : vector<19x8xf32> to vector<19x8xbf16>
    %c0_250 = arith.constant 0 : index
    %c3_251 = arith.constant 3 : index
    %c0_252 = arith.constant 0 : index
    %c0_253 = arith.constant 0 : index
    %345 = vector.load %arg19[%c0_250, %c3_251, %c0_252, %c0_253] : memref<2x4x8x32xbf16, #tpu.memory_space<vmem>>, vector<1x1x8x32xbf16>
    %346 = vector.shape_cast %345 : vector<1x1x8x32xbf16> to vector<8x32xbf16>
    %cst_254 = arith.constant dense<0.000000e+00> : vector<19x32xf32>
    %347 = tpu.matmul %344, %346, %cst_254 {dimension_numbers = #tpu.dot_dimension_numbers<[1], [0], [0], [1], [0, 0, 1, 1], [], []>} : vector<19x8xbf16>, vector<8x32xbf16>, vector<19x32xf32> -> vector<19x32xf32>
    %348 = arith.addf %303, %347 : vector<19x32xf32>
    %c0_255 = arith.constant 0 : index
    %c0_256 = arith.constant 0 : index
    %c0_257 = arith.constant 0 : index
    %349 = vector.load %arg23[%c0_255, %c0_256, %c0_257] : memref<2x1x32xf32, #tpu.memory_space<vmem>>, vector<1x1x32xf32>
    %350 = vector.shape_cast %349 : vector<1x1x32xf32> to vector<1x32xf32>
    %351 = vector.broadcast %350 : vector<1x32xf32> to vector<19x32xf32>
    %352 = arith.addf %348, %351 : vector<19x32xf32>
    %353 = arith.addf %162, %352 : vector<19x32xf32>
    %c0_258 = arith.constant 0 : index
    %c0_259 = arith.constant 0 : index
    %c0_260 = arith.constant 0 : index
    %354 = vector.load %arg24[%c0_258, %c0_259, %c0_260] : memref<2x1x32xf32, #tpu.memory_space<vmem>>, vector<1x1x32xf32>
    %355 = vector.shape_cast %354 : vector<1x1x32xf32> to vector<1x32xf32>
    %c0_261 = arith.constant 0 : index
    %c0_262 = arith.constant 0 : index
    %c0_263 = arith.constant 0 : index
    %356 = vector.load %arg25[%c0_261, %c0_262, %c0_263] : memref<2x1x32xf32, #tpu.memory_space<vmem>>, vector<1x1x32xf32>
    %357 = vector.shape_cast %356 : vector<1x1x32xf32> to vector<1x32xf32>
    %cst_264 = arith.constant dense<0.000000e+00> : vector<19xf32>
    %358 = vector.multi_reduction <add>, %353, %cst_264 [1] : vector<19x32xf32> to vector<19xf32>
    %359 = vector.shape_cast %358 : vector<19xf32> to vector<19x1xf32>
    %cst_265 = arith.constant 3.200000e+01 : f32
    %360 = vector.broadcast %cst_265 : f32 to vector<19x1xf32>
    %361 = arith.divf %359, %360 : vector<19x1xf32>
    %362 = vector.broadcast %361 : vector<19x1xf32> to vector<19x32xf32>
    %363 = arith.subf %353, %362 : vector<19x32xf32>
    %364 = arith.mulf %363, %363 : vector<19x32xf32>
    %cst_266 = arith.constant dense<0.000000e+00> : vector<19xf32>
    %365 = vector.multi_reduction <add>, %364, %cst_266 [1] : vector<19x32xf32> to vector<19xf32>
    %366 = vector.shape_cast %365 : vector<19xf32> to vector<19x1xf32>
    %cst_267 = arith.constant 3.200000e+01 : f32
    %367 = vector.broadcast %cst_267 : f32 to vector<19x1xf32>
    %368 = arith.divf %366, %367 : vector<19x1xf32>
    %cst_268 = arith.constant 9.99999974E-6 : f32
    %369 = vector.broadcast %cst_268 : f32 to vector<19x1xf32>
    %370 = arith.addf %368, %369 : vector<19x1xf32>
    %371 = math.rsqrt %370 : vector<19x1xf32>
    %372 = vector.broadcast %371 : vector<19x1xf32> to vector<19x32xf32>
    %373 = arith.mulf %363, %372 : vector<19x32xf32>
    %374 = vector.broadcast %355 : vector<1x32xf32> to vector<19x32xf32>
    %375 = arith.mulf %373, %374 : vector<19x32xf32>
    %376 = vector.broadcast %357 : vector<1x32xf32> to vector<19x32xf32>
    %377 = arith.addf %375, %376 : vector<19x32xf32>
    %378 = arith.truncf %377 : vector<19x32xf32> to vector<19x32xbf16>
    %c0_269 = arith.constant 0 : index
    %c0_270 = arith.constant 0 : index
    %c0_271 = arith.constant 0 : index
    %379 = vector.load %arg26[%c0_269, %c0_270, %c0_271] : memref<2x32x64xbf16, #tpu.memory_space<vmem>>, vector<1x32x64xbf16>
    %380 = vector.shape_cast %379 : vector<1x32x64xbf16> to vector<32x64xbf16>
    %cst_272 = arith.constant dense<0.000000e+00> : vector<19x64xf32>
    %381 = tpu.matmul %378, %380, %cst_272 {dimension_numbers = #tpu.dot_dimension_numbers<[1], [0], [0], [1], [0, 0, 1, 1], [], []>} : vector<19x32xbf16>, vector<32x64xbf16>, vector<19x64xf32> -> vector<19x64xf32>
    %c0_273 = arith.constant 0 : index
    %c0_274 = arith.constant 0 : index
    %c0_275 = arith.constant 0 : index
    %382 = vector.load %arg27[%c0_273, %c0_274, %c0_275] : memref<2x1x64xf32, #tpu.memory_space<vmem>>, vector<1x1x64xf32>
    %383 = vector.shape_cast %382 : vector<1x1x64xf32> to vector<1x64xf32>
    %384 = vector.broadcast %383 : vector<1x64xf32> to vector<19x64xf32>
    %385 = arith.addf %381, %384 : vector<19x64xf32>
    %cst_276 = arith.constant 5.000000e-01 : f32
    %386 = vector.broadcast %cst_276 : f32 to vector<19x64xf32>
    %387 = arith.mulf %386, %385 : vector<19x64xf32>
    %cst_277 = arith.constant 0.707106769 : f32
    %388 = vector.broadcast %cst_277 : f32 to vector<19x64xf32>
    %389 = arith.mulf %385, %388 : vector<19x64xf32>
    %390 = math.erf %389 : vector<19x64xf32>
    %cst_278 = arith.constant 1.000000e+00 : f32
    %391 = vector.broadcast %cst_278 : f32 to vector<19x64xf32>
    %392 = arith.addf %391, %390 : vector<19x64xf32>
    %393 = arith.mulf %387, %392 : vector<19x64xf32>
    %394 = arith.truncf %393 : vector<19x64xf32> to vector<19x64xbf16>
    %c0_279 = arith.constant 0 : index
    %c0_280 = arith.constant 0 : index
    %c0_281 = arith.constant 0 : index
    %395 = vector.load %arg28[%c0_279, %c0_280, %c0_281] : memref<2x64x32xbf16, #tpu.memory_space<vmem>>, vector<1x64x32xbf16>
    %396 = vector.shape_cast %395 : vector<1x64x32xbf16> to vector<64x32xbf16>
    %cst_282 = arith.constant dense<0.000000e+00> : vector<19x32xf32>
    %397 = tpu.matmul %394, %396, %cst_282 {dimension_numbers = #tpu.dot_dimension_numbers<[1], [0], [0], [1], [0, 0, 1, 1], [], []>} : vector<19x64xbf16>, vector<64x32xbf16>, vector<19x32xf32> -> vector<19x32xf32>
    %c0_283 = arith.constant 0 : index
    %c0_284 = arith.constant 0 : index
    %c0_285 = arith.constant 0 : index
    %398 = vector.load %arg29[%c0_283, %c0_284, %c0_285] : memref<2x1x32xf32, #tpu.memory_space<vmem>>, vector<1x1x32xf32>
    %399 = vector.shape_cast %398 : vector<1x1x32xf32> to vector<1x32xf32>
    %400 = vector.broadcast %399 : vector<1x32xf32> to vector<19x32xf32>
    %401 = arith.addf %397, %400 : vector<19x32xf32>
    %402 = arith.addf %377, %401 : vector<19x32xf32>
    %c0_286 = arith.constant 0 : index
    %c0_287 = arith.constant 0 : index
    %c0_288 = arith.constant 0 : index
    %403 = vector.load %arg30[%c0_286, %c0_287, %c0_288] : memref<2x1x32xf32, #tpu.memory_space<vmem>>, vector<1x1x32xf32>
    %404 = vector.shape_cast %403 : vector<1x1x32xf32> to vector<1x32xf32>
    %c0_289 = arith.constant 0 : index
    %c0_290 = arith.constant 0 : index
    %c0_291 = arith.constant 0 : index
    %405 = vector.load %arg31[%c0_289, %c0_290, %c0_291] : memref<2x1x32xf32, #tpu.memory_space<vmem>>, vector<1x1x32xf32>
    %406 = vector.shape_cast %405 : vector<1x1x32xf32> to vector<1x32xf32>
    %cst_292 = arith.constant dense<0.000000e+00> : vector<19xf32>
    %407 = vector.multi_reduction <add>, %402, %cst_292 [1] : vector<19x32xf32> to vector<19xf32>
    %408 = vector.shape_cast %407 : vector<19xf32> to vector<19x1xf32>
    %cst_293 = arith.constant 3.200000e+01 : f32
    %409 = vector.broadcast %cst_293 : f32 to vector<19x1xf32>
    %410 = arith.divf %408, %409 : vector<19x1xf32>
    %411 = vector.broadcast %410 : vector<19x1xf32> to vector<19x32xf32>
    %412 = arith.subf %402, %411 : vector<19x32xf32>
    %413 = arith.mulf %412, %412 : vector<19x32xf32>
    %cst_294 = arith.constant dense<0.000000e+00> : vector<19xf32>
    %414 = vector.multi_reduction <add>, %413, %cst_294 [1] : vector<19x32xf32> to vector<19xf32>
    %415 = vector.shape_cast %414 : vector<19xf32> to vector<19x1xf32>
    %cst_295 = arith.constant 3.200000e+01 : f32
    %416 = vector.broadcast %cst_295 : f32 to vector<19x1xf32>
    %417 = arith.divf %415, %416 : vector<19x1xf32>
    %cst_296 = arith.constant 9.99999974E-6 : f32
    %418 = vector.broadcast %cst_296 : f32 to vector<19x1xf32>
    %419 = arith.addf %417, %418 : vector<19x1xf32>
    %420 = math.rsqrt %419 : vector<19x1xf32>
    %421 = vector.broadcast %420 : vector<19x1xf32> to vector<19x32xf32>
    %422 = arith.mulf %412, %421 : vector<19x32xf32>
    %423 = vector.broadcast %404 : vector<1x32xf32> to vector<19x32xf32>
    %424 = arith.mulf %422, %423 : vector<19x32xf32>
    %425 = vector.broadcast %406 : vector<1x32xf32> to vector<19x32xf32>
    %426 = arith.addf %424, %425 : vector<19x32xf32>
    %427 = arith.truncf %426 : vector<19x32xf32> to vector<19x32xbf16>
    %cst_297 = arith.constant 0.000000e+00 : f32
    %428 = vector.broadcast %cst_297 : f32 to vector<19x32xf32>
    %c1_298 = arith.constant 1 : index
    %c0_299 = arith.constant 0 : index
    %c0_300 = arith.constant 0 : index
    %c0_301 = arith.constant 0 : index
    %429 = vector.load %arg16[%c1_298, %c0_299, %c0_300, %c0_301] : memref<2x4x32x8xbf16, #tpu.memory_space<vmem>>, vector<1x1x32x8xbf16>
    %430 = vector.shape_cast %429 : vector<1x1x32x8xbf16> to vector<32x8xbf16>
    %cst_302 = arith.constant dense<0.000000e+00> : vector<19x8xf32>
    %431 = tpu.matmul %427, %430, %cst_302 {dimension_numbers = #tpu.dot_dimension_numbers<[1], [0], [0], [1], [0, 0, 1, 1], [], []>} : vector<19x32xbf16>, vector<32x8xbf16>, vector<19x8xf32> -> vector<19x8xf32>
    %c1_303 = arith.constant 1 : index
    %c0_304 = arith.constant 0 : index
    %c0_305 = arith.constant 0 : index
    %c0_306 = arith.constant 0 : index
    %432 = vector.load %arg20[%c1_303, %c0_304, %c0_305, %c0_306] : memref<2x4x1x8xf32, #tpu.memory_space<vmem>>, vector<1x1x1x8xf32>
    %433 = vector.shape_cast %432 : vector<1x1x1x8xf32> to vector<1x8xf32>
    %434 = vector.broadcast %433 : vector<1x8xf32> to vector<19x8xf32>
    %435 = arith.addf %431, %434 : vector<19x8xf32>
    %c1_307 = arith.constant 1 : index
    %c0_308 = arith.constant 0 : index
    %c0_309 = arith.constant 0 : index
    %c0_310 = arith.constant 0 : index
    %436 = vector.load %arg17[%c1_307, %c0_308, %c0_309, %c0_310] : memref<2x4x32x8xbf16, #tpu.memory_space<vmem>>, vector<1x1x32x8xbf16>
    %437 = vector.shape_cast %436 : vector<1x1x32x8xbf16> to vector<32x8xbf16>
    %cst_311 = arith.constant dense<0.000000e+00> : vector<19x8xf32>
    %438 = tpu.matmul %427, %437, %cst_311 {dimension_numbers = #tpu.dot_dimension_numbers<[1], [0], [0], [1], [0, 0, 1, 1], [], []>} : vector<19x32xbf16>, vector<32x8xbf16>, vector<19x8xf32> -> vector<19x8xf32>
    %c1_312 = arith.constant 1 : index
    %c0_313 = arith.constant 0 : index
    %c0_314 = arith.constant 0 : index
    %c0_315 = arith.constant 0 : index
    %439 = vector.load %arg21[%c1_312, %c0_313, %c0_314, %c0_315] : memref<2x4x1x8xf32, #tpu.memory_space<vmem>>, vector<1x1x1x8xf32>
    %440 = vector.shape_cast %439 : vector<1x1x1x8xf32> to vector<1x8xf32>
    %441 = vector.broadcast %440 : vector<1x8xf32> to vector<19x8xf32>
    %442 = arith.addf %438, %441 : vector<19x8xf32>
    %c1_316 = arith.constant 1 : index
    %c0_317 = arith.constant 0 : index
    %c0_318 = arith.constant 0 : index
    %c0_319 = arith.constant 0 : index
    %443 = vector.load %arg18[%c1_316, %c0_317, %c0_318, %c0_319] : memref<2x4x32x8xbf16, #tpu.memory_space<vmem>>, vector<1x1x32x8xbf16>
    %444 = vector.shape_cast %443 : vector<1x1x32x8xbf16> to vector<32x8xbf16>
    %cst_320 = arith.constant dense<0.000000e+00> : vector<19x8xf32>
    %445 = tpu.matmul %427, %444, %cst_320 {dimension_numbers = #tpu.dot_dimension_numbers<[1], [0], [0], [1], [0, 0, 1, 1], [], []>} : vector<19x32xbf16>, vector<32x8xbf16>, vector<19x8xf32> -> vector<19x8xf32>
    %c1_321 = arith.constant 1 : index
    %c0_322 = arith.constant 0 : index
    %c0_323 = arith.constant 0 : index
    %c0_324 = arith.constant 0 : index
    %446 = vector.load %arg22[%c1_321, %c0_322, %c0_323, %c0_324] : memref<2x4x1x8xf32, #tpu.memory_space<vmem>>, vector<1x1x1x8xf32>
    %447 = vector.shape_cast %446 : vector<1x1x1x8xf32> to vector<1x8xf32>
    %448 = vector.broadcast %447 : vector<1x8xf32> to vector<19x8xf32>
    %449 = arith.addf %445, %448 : vector<19x8xf32>
    %cst_325 = arith.constant 0.353553385 : f32
    %450 = vector.broadcast %cst_325 : f32 to vector<19x8xf32>
    %451 = arith.mulf %435, %450 : vector<19x8xf32>
    %452 = arith.truncf %451 : vector<19x8xf32> to vector<19x8xbf16>
    %453 = arith.truncf %442 : vector<19x8xf32> to vector<19x8xbf16>
    %cst_326 = arith.constant dense<0.000000e+00> : vector<19x19xf32>
    %454 = tpu.matmul %452, %453, %cst_326 {dimension_numbers = #tpu.dot_dimension_numbers<[1], [1], [0], [0], [0, 0, 1, 0], [], []>} : vector<19x8xbf16>, vector<19x8xbf16>, vector<19x19xf32> -> vector<19x19xf32>
    %455 = arith.addf %454, %166 : vector<19x19xf32>
    %cst_327 = arith.constant dense<0xFF800000> : vector<19xf32>
    %456 = vector.multi_reduction <maximumf>, %455, %cst_327 [1] : vector<19x19xf32> to vector<19xf32>
    %457 = vector.shape_cast %456 : vector<19xf32> to vector<19x1xf32>
    %458 = vector.broadcast %457 : vector<19x1xf32> to vector<19x19xf32>
    %459 = arith.subf %455, %458 : vector<19x19xf32>
    %460 = math.exp %459 : vector<19x19xf32>
    %cst_328 = arith.constant dense<0.000000e+00> : vector<19xf32>
    %461 = vector.multi_reduction <add>, %460, %cst_328 [1] : vector<19x19xf32> to vector<19xf32>
    %462 = vector.shape_cast %461 : vector<19xf32> to vector<19x1xf32>
    %463 = tpu.reciprocal %462 {approx = true} : vector<19x1xf32> -> vector<19x1xf32>
    %464 = vector.broadcast %463 : vector<19x1xf32> to vector<19x19xf32>
    %465 = arith.mulf %460, %464 : vector<19x19xf32>
    %466 = arith.truncf %465 : vector<19x19xf32> to vector<19x19xbf16>
    %467 = arith.truncf %449 : vector<19x8xf32> to vector<19x8xbf16>
    %cst_329 = arith.constant dense<0.000000e+00> : vector<19x8xf32>
    %468 = tpu.matmul %466, %467, %cst_329 {dimension_numbers = #tpu.dot_dimension_numbers<[1], [0], [0], [1], [0, 0, 1, 1], [], []>} : vector<19x19xbf16>, vector<19x8xbf16>, vector<19x8xf32> -> vector<19x8xf32>
    %469 = arith.truncf %468 : vector<19x8xf32> to vector<19x8xbf16>
    %c1_330 = arith.constant 1 : index
    %c0_331 = arith.constant 0 : index
    %c0_332 = arith.constant 0 : index
    %c0_333 = arith.constant 0 : index
    %470 = vector.load %arg19[%c1_330, %c0_331, %c0_332, %c0_333] : memref<2x4x8x32xbf16, #tpu.memory_space<vmem>>, vector<1x1x8x32xbf16>
    %471 = vector.shape_cast %470 : vector<1x1x8x32xbf16> to vector<8x32xbf16>
    %cst_334 = arith.constant dense<0.000000e+00> : vector<19x32xf32>
    %472 = tpu.matmul %469, %471, %cst_334 {dimension_numbers = #tpu.dot_dimension_numbers<[1], [0], [0], [1], [0, 0, 1, 1], [], []>} : vector<19x8xbf16>, vector<8x32xbf16>, vector<19x32xf32> -> vector<19x32xf32>
    %473 = arith.addf %428, %472 : vector<19x32xf32>
    %c1_335 = arith.constant 1 : index
    %c1_336 = arith.constant 1 : index
    %c0_337 = arith.constant 0 : index
    %c0_338 = arith.constant 0 : index
    %474 = vector.load %arg16[%c1_335, %c1_336, %c0_337, %c0_338] : memref<2x4x32x8xbf16, #tpu.memory_space<vmem>>, vector<1x1x32x8xbf16>
    %475 = vector.shape_cast %474 : vector<1x1x32x8xbf16> to vector<32x8xbf16>
    %cst_339 = arith.constant dense<0.000000e+00> : vector<19x8xf32>
    %476 = tpu.matmul %427, %475, %cst_339 {dimension_numbers = #tpu.dot_dimension_numbers<[1], [0], [0], [1], [0, 0, 1, 1], [], []>} : vector<19x32xbf16>, vector<32x8xbf16>, vector<19x8xf32> -> vector<19x8xf32>
    %c1_340 = arith.constant 1 : index
    %c1_341 = arith.constant 1 : index
    %c0_342 = arith.constant 0 : index
    %c0_343 = arith.constant 0 : index
    %477 = vector.load %arg20[%c1_340, %c1_341, %c0_342, %c0_343] : memref<2x4x1x8xf32, #tpu.memory_space<vmem>>, vector<1x1x1x8xf32>
    %478 = vector.shape_cast %477 : vector<1x1x1x8xf32> to vector<1x8xf32>
    %479 = vector.broadcast %478 : vector<1x8xf32> to vector<19x8xf32>
    %480 = arith.addf %476, %479 : vector<19x8xf32>
    %c1_344 = arith.constant 1 : index
    %c1_345 = arith.constant 1 : index
    %c0_346 = arith.constant 0 : index
    %c0_347 = arith.constant 0 : index
    %481 = vector.load %arg17[%c1_344, %c1_345, %c0_346, %c0_347] : memref<2x4x32x8xbf16, #tpu.memory_space<vmem>>, vector<1x1x32x8xbf16>
    %482 = vector.shape_cast %481 : vector<1x1x32x8xbf16> to vector<32x8xbf16>
    %cst_348 = arith.constant dense<0.000000e+00> : vector<19x8xf32>
    %483 = tpu.matmul %427, %482, %cst_348 {dimension_numbers = #tpu.dot_dimension_numbers<[1], [0], [0], [1], [0, 0, 1, 1], [], []>} : vector<19x32xbf16>, vector<32x8xbf16>, vector<19x8xf32> -> vector<19x8xf32>
    %c1_349 = arith.constant 1 : index
    %c1_350 = arith.constant 1 : index
    %c0_351 = arith.constant 0 : index
    %c0_352 = arith.constant 0 : index
    %484 = vector.load %arg21[%c1_349, %c1_350, %c0_351, %c0_352] : memref<2x4x1x8xf32, #tpu.memory_space<vmem>>, vector<1x1x1x8xf32>
    %485 = vector.shape_cast %484 : vector<1x1x1x8xf32> to vector<1x8xf32>
    %486 = vector.broadcast %485 : vector<1x8xf32> to vector<19x8xf32>
    %487 = arith.addf %483, %486 : vector<19x8xf32>
    %c1_353 = arith.constant 1 : index
    %c1_354 = arith.constant 1 : index
    %c0_355 = arith.constant 0 : index
    %c0_356 = arith.constant 0 : index
    %488 = vector.load %arg18[%c1_353, %c1_354, %c0_355, %c0_356] : memref<2x4x32x8xbf16, #tpu.memory_space<vmem>>, vector<1x1x32x8xbf16>
    %489 = vector.shape_cast %488 : vector<1x1x32x8xbf16> to vector<32x8xbf16>
    %cst_357 = arith.constant dense<0.000000e+00> : vector<19x8xf32>
    %490 = tpu.matmul %427, %489, %cst_357 {dimension_numbers = #tpu.dot_dimension_numbers<[1], [0], [0], [1], [0, 0, 1, 1], [], []>} : vector<19x32xbf16>, vector<32x8xbf16>, vector<19x8xf32> -> vector<19x8xf32>
    %c1_358 = arith.constant 1 : index
    %c1_359 = arith.constant 1 : index
    %c0_360 = arith.constant 0 : index
    %c0_361 = arith.constant 0 : index
    %491 = vector.load %arg22[%c1_358, %c1_359, %c0_360, %c0_361] : memref<2x4x1x8xf32, #tpu.memory_space<vmem>>, vector<1x1x1x8xf32>
    %492 = vector.shape_cast %491 : vector<1x1x1x8xf32> to vector<1x8xf32>
    %493 = vector.broadcast %492 : vector<1x8xf32> to vector<19x8xf32>
    %494 = arith.addf %490, %493 : vector<19x8xf32>
    %cst_362 = arith.constant 0.353553385 : f32
    %495 = vector.broadcast %cst_362 : f32 to vector<19x8xf32>
    %496 = arith.mulf %480, %495 : vector<19x8xf32>
    %497 = arith.truncf %496 : vector<19x8xf32> to vector<19x8xbf16>
    %498 = arith.truncf %487 : vector<19x8xf32> to vector<19x8xbf16>
    %cst_363 = arith.constant dense<0.000000e+00> : vector<19x19xf32>
    %499 = tpu.matmul %497, %498, %cst_363 {dimension_numbers = #tpu.dot_dimension_numbers<[1], [1], [0], [0], [0, 0, 1, 0], [], []>} : vector<19x8xbf16>, vector<19x8xbf16>, vector<19x19xf32> -> vector<19x19xf32>
    %500 = arith.addf %499, %166 : vector<19x19xf32>
    %cst_364 = arith.constant dense<0xFF800000> : vector<19xf32>
    %501 = vector.multi_reduction <maximumf>, %500, %cst_364 [1] : vector<19x19xf32> to vector<19xf32>
    %502 = vector.shape_cast %501 : vector<19xf32> to vector<19x1xf32>
    %503 = vector.broadcast %502 : vector<19x1xf32> to vector<19x19xf32>
    %504 = arith.subf %500, %503 : vector<19x19xf32>
    %505 = math.exp %504 : vector<19x19xf32>
    %cst_365 = arith.constant dense<0.000000e+00> : vector<19xf32>
    %506 = vector.multi_reduction <add>, %505, %cst_365 [1] : vector<19x19xf32> to vector<19xf32>
    %507 = vector.shape_cast %506 : vector<19xf32> to vector<19x1xf32>
    %508 = tpu.reciprocal %507 {approx = true} : vector<19x1xf32> -> vector<19x1xf32>
    %509 = vector.broadcast %508 : vector<19x1xf32> to vector<19x19xf32>
    %510 = arith.mulf %505, %509 : vector<19x19xf32>
    %511 = arith.truncf %510 : vector<19x19xf32> to vector<19x19xbf16>
    %512 = arith.truncf %494 : vector<19x8xf32> to vector<19x8xbf16>
    %cst_366 = arith.constant dense<0.000000e+00> : vector<19x8xf32>
    %513 = tpu.matmul %511, %512, %cst_366 {dimension_numbers = #tpu.dot_dimension_numbers<[1], [0], [0], [1], [0, 0, 1, 1], [], []>} : vector<19x19xbf16>, vector<19x8xbf16>, vector<19x8xf32> -> vector<19x8xf32>
    %514 = arith.truncf %513 : vector<19x8xf32> to vector<19x8xbf16>
    %c1_367 = arith.constant 1 : index
    %c1_368 = arith.constant 1 : index
    %c0_369 = arith.constant 0 : index
    %c0_370 = arith.constant 0 : index
    %515 = vector.load %arg19[%c1_367, %c1_368, %c0_369, %c0_370] : memref<2x4x8x32xbf16, #tpu.memory_space<vmem>>, vector<1x1x8x32xbf16>
    %516 = vector.shape_cast %515 : vector<1x1x8x32xbf16> to vector<8x32xbf16>
    %cst_371 = arith.constant dense<0.000000e+00> : vector<19x32xf32>
    %517 = tpu.matmul %514, %516, %cst_371 {dimension_numbers = #tpu.dot_dimension_numbers<[1], [0], [0], [1], [0, 0, 1, 1], [], []>} : vector<19x8xbf16>, vector<8x32xbf16>, vector<19x32xf32> -> vector<19x32xf32>
    %518 = arith.addf %473, %517 : vector<19x32xf32>
    %c1_372 = arith.constant 1 : index
    %c2_373 = arith.constant 2 : index
    %c0_374 = arith.constant 0 : index
    %c0_375 = arith.constant 0 : index
    %519 = vector.load %arg16[%c1_372, %c2_373, %c0_374, %c0_375] : memref<2x4x32x8xbf16, #tpu.memory_space<vmem>>, vector<1x1x32x8xbf16>
    %520 = vector.shape_cast %519 : vector<1x1x32x8xbf16> to vector<32x8xbf16>
    %cst_376 = arith.constant dense<0.000000e+00> : vector<19x8xf32>
    %521 = tpu.matmul %427, %520, %cst_376 {dimension_numbers = #tpu.dot_dimension_numbers<[1], [0], [0], [1], [0, 0, 1, 1], [], []>} : vector<19x32xbf16>, vector<32x8xbf16>, vector<19x8xf32> -> vector<19x8xf32>
    %c1_377 = arith.constant 1 : index
    %c2_378 = arith.constant 2 : index
    %c0_379 = arith.constant 0 : index
    %c0_380 = arith.constant 0 : index
    %522 = vector.load %arg20[%c1_377, %c2_378, %c0_379, %c0_380] : memref<2x4x1x8xf32, #tpu.memory_space<vmem>>, vector<1x1x1x8xf32>
    %523 = vector.shape_cast %522 : vector<1x1x1x8xf32> to vector<1x8xf32>
    %524 = vector.broadcast %523 : vector<1x8xf32> to vector<19x8xf32>
    %525 = arith.addf %521, %524 : vector<19x8xf32>
    %c1_381 = arith.constant 1 : index
    %c2_382 = arith.constant 2 : index
    %c0_383 = arith.constant 0 : index
    %c0_384 = arith.constant 0 : index
    %526 = vector.load %arg17[%c1_381, %c2_382, %c0_383, %c0_384] : memref<2x4x32x8xbf16, #tpu.memory_space<vmem>>, vector<1x1x32x8xbf16>
    %527 = vector.shape_cast %526 : vector<1x1x32x8xbf16> to vector<32x8xbf16>
    %cst_385 = arith.constant dense<0.000000e+00> : vector<19x8xf32>
    %528 = tpu.matmul %427, %527, %cst_385 {dimension_numbers = #tpu.dot_dimension_numbers<[1], [0], [0], [1], [0, 0, 1, 1], [], []>} : vector<19x32xbf16>, vector<32x8xbf16>, vector<19x8xf32> -> vector<19x8xf32>
    %c1_386 = arith.constant 1 : index
    %c2_387 = arith.constant 2 : index
    %c0_388 = arith.constant 0 : index
    %c0_389 = arith.constant 0 : index
    %529 = vector.load %arg21[%c1_386, %c2_387, %c0_388, %c0_389] : memref<2x4x1x8xf32, #tpu.memory_space<vmem>>, vector<1x1x1x8xf32>
    %530 = vector.shape_cast %529 : vector<1x1x1x8xf32> to vector<1x8xf32>
    %531 = vector.broadcast %530 : vector<1x8xf32> to vector<19x8xf32>
    %532 = arith.addf %528, %531 : vector<19x8xf32>
    %c1_390 = arith.constant 1 : index
    %c2_391 = arith.constant 2 : index
    %c0_392 = arith.constant 0 : index
    %c0_393 = arith.constant 0 : index
    %533 = vector.load %arg18[%c1_390, %c2_391, %c0_392, %c0_393] : memref<2x4x32x8xbf16, #tpu.memory_space<vmem>>, vector<1x1x32x8xbf16>
    %534 = vector.shape_cast %533 : vector<1x1x32x8xbf16> to vector<32x8xbf16>
    %cst_394 = arith.constant dense<0.000000e+00> : vector<19x8xf32>
    %535 = tpu.matmul %427, %534, %cst_394 {dimension_numbers = #tpu.dot_dimension_numbers<[1], [0], [0], [1], [0, 0, 1, 1], [], []>} : vector<19x32xbf16>, vector<32x8xbf16>, vector<19x8xf32> -> vector<19x8xf32>
    %c1_395 = arith.constant 1 : index
    %c2_396 = arith.constant 2 : index
    %c0_397 = arith.constant 0 : index
    %c0_398 = arith.constant 0 : index
    %536 = vector.load %arg22[%c1_395, %c2_396, %c0_397, %c0_398] : memref<2x4x1x8xf32, #tpu.memory_space<vmem>>, vector<1x1x1x8xf32>
    %537 = vector.shape_cast %536 : vector<1x1x1x8xf32> to vector<1x8xf32>
    %538 = vector.broadcast %537 : vector<1x8xf32> to vector<19x8xf32>
    %539 = arith.addf %535, %538 : vector<19x8xf32>
    %cst_399 = arith.constant 0.353553385 : f32
    %540 = vector.broadcast %cst_399 : f32 to vector<19x8xf32>
    %541 = arith.mulf %525, %540 : vector<19x8xf32>
    %542 = arith.truncf %541 : vector<19x8xf32> to vector<19x8xbf16>
    %543 = arith.truncf %532 : vector<19x8xf32> to vector<19x8xbf16>
    %cst_400 = arith.constant dense<0.000000e+00> : vector<19x19xf32>
    %544 = tpu.matmul %542, %543, %cst_400 {dimension_numbers = #tpu.dot_dimension_numbers<[1], [1], [0], [0], [0, 0, 1, 0], [], []>} : vector<19x8xbf16>, vector<19x8xbf16>, vector<19x19xf32> -> vector<19x19xf32>
    %545 = arith.addf %544, %166 : vector<19x19xf32>
    %cst_401 = arith.constant dense<0xFF800000> : vector<19xf32>
    %546 = vector.multi_reduction <maximumf>, %545, %cst_401 [1] : vector<19x19xf32> to vector<19xf32>
    %547 = vector.shape_cast %546 : vector<19xf32> to vector<19x1xf32>
    %548 = vector.broadcast %547 : vector<19x1xf32> to vector<19x19xf32>
    %549 = arith.subf %545, %548 : vector<19x19xf32>
    %550 = math.exp %549 : vector<19x19xf32>
    %cst_402 = arith.constant dense<0.000000e+00> : vector<19xf32>
    %551 = vector.multi_reduction <add>, %550, %cst_402 [1] : vector<19x19xf32> to vector<19xf32>
    %552 = vector.shape_cast %551 : vector<19xf32> to vector<19x1xf32>
    %553 = tpu.reciprocal %552 {approx = true} : vector<19x1xf32> -> vector<19x1xf32>
    %554 = vector.broadcast %553 : vector<19x1xf32> to vector<19x19xf32>
    %555 = arith.mulf %550, %554 : vector<19x19xf32>
    %556 = arith.truncf %555 : vector<19x19xf32> to vector<19x19xbf16>
    %557 = arith.truncf %539 : vector<19x8xf32> to vector<19x8xbf16>
    %cst_403 = arith.constant dense<0.000000e+00> : vector<19x8xf32>
    %558 = tpu.matmul %556, %557, %cst_403 {dimension_numbers = #tpu.dot_dimension_numbers<[1], [0], [0], [1], [0, 0, 1, 1], [], []>} : vector<19x19xbf16>, vector<19x8xbf16>, vector<19x8xf32> -> vector<19x8xf32>
    %559 = arith.truncf %558 : vector<19x8xf32> to vector<19x8xbf16>
    %c1_404 = arith.constant 1 : index
    %c2_405 = arith.constant 2 : index
    %c0_406 = arith.constant 0 : index
    %c0_407 = arith.constant 0 : index
    %560 = vector.load %arg19[%c1_404, %c2_405, %c0_406, %c0_407] : memref<2x4x8x32xbf16, #tpu.memory_space<vmem>>, vector<1x1x8x32xbf16>
    %561 = vector.shape_cast %560 : vector<1x1x8x32xbf16> to vector<8x32xbf16>
    %cst_408 = arith.constant dense<0.000000e+00> : vector<19x32xf32>
    %562 = tpu.matmul %559, %561, %cst_408 {dimension_numbers = #tpu.dot_dimension_numbers<[1], [0], [0], [1], [0, 0, 1, 1], [], []>} : vector<19x8xbf16>, vector<8x32xbf16>, vector<19x32xf32> -> vector<19x32xf32>
    %563 = arith.addf %518, %562 : vector<19x32xf32>
    %c1_409 = arith.constant 1 : index
    %c3_410 = arith.constant 3 : index
    %c0_411 = arith.constant 0 : index
    %c0_412 = arith.constant 0 : index
    %564 = vector.load %arg16[%c1_409, %c3_410, %c0_411, %c0_412] : memref<2x4x32x8xbf16, #tpu.memory_space<vmem>>, vector<1x1x32x8xbf16>
    %565 = vector.shape_cast %564 : vector<1x1x32x8xbf16> to vector<32x8xbf16>
    %cst_413 = arith.constant dense<0.000000e+00> : vector<19x8xf32>
    %566 = tpu.matmul %427, %565, %cst_413 {dimension_numbers = #tpu.dot_dimension_numbers<[1], [0], [0], [1], [0, 0, 1, 1], [], []>} : vector<19x32xbf16>, vector<32x8xbf16>, vector<19x8xf32> -> vector<19x8xf32>
    %c1_414 = arith.constant 1 : index
    %c3_415 = arith.constant 3 : index
    %c0_416 = arith.constant 0 : index
    %c0_417 = arith.constant 0 : index
    %567 = vector.load %arg20[%c1_414, %c3_415, %c0_416, %c0_417] : memref<2x4x1x8xf32, #tpu.memory_space<vmem>>, vector<1x1x1x8xf32>
    %568 = vector.shape_cast %567 : vector<1x1x1x8xf32> to vector<1x8xf32>
    %569 = vector.broadcast %568 : vector<1x8xf32> to vector<19x8xf32>
    %570 = arith.addf %566, %569 : vector<19x8xf32>
    %c1_418 = arith.constant 1 : index
    %c3_419 = arith.constant 3 : index
    %c0_420 = arith.constant 0 : index
    %c0_421 = arith.constant 0 : index
    %571 = vector.load %arg17[%c1_418, %c3_419, %c0_420, %c0_421] : memref<2x4x32x8xbf16, #tpu.memory_space<vmem>>, vector<1x1x32x8xbf16>
    %572 = vector.shape_cast %571 : vector<1x1x32x8xbf16> to vector<32x8xbf16>
    %cst_422 = arith.constant dense<0.000000e+00> : vector<19x8xf32>
    %573 = tpu.matmul %427, %572, %cst_422 {dimension_numbers = #tpu.dot_dimension_numbers<[1], [0], [0], [1], [0, 0, 1, 1], [], []>} : vector<19x32xbf16>, vector<32x8xbf16>, vector<19x8xf32> -> vector<19x8xf32>
    %c1_423 = arith.constant 1 : index
    %c3_424 = arith.constant 3 : index
    %c0_425 = arith.constant 0 : index
    %c0_426 = arith.constant 0 : index
    %574 = vector.load %arg21[%c1_423, %c3_424, %c0_425, %c0_426] : memref<2x4x1x8xf32, #tpu.memory_space<vmem>>, vector<1x1x1x8xf32>
    %575 = vector.shape_cast %574 : vector<1x1x1x8xf32> to vector<1x8xf32>
    %576 = vector.broadcast %575 : vector<1x8xf32> to vector<19x8xf32>
    %577 = arith.addf %573, %576 : vector<19x8xf32>
    %c1_427 = arith.constant 1 : index
    %c3_428 = arith.constant 3 : index
    %c0_429 = arith.constant 0 : index
    %c0_430 = arith.constant 0 : index
    %578 = vector.load %arg18[%c1_427, %c3_428, %c0_429, %c0_430] : memref<2x4x32x8xbf16, #tpu.memory_space<vmem>>, vector<1x1x32x8xbf16>
    %579 = vector.shape_cast %578 : vector<1x1x32x8xbf16> to vector<32x8xbf16>
    %cst_431 = arith.constant dense<0.000000e+00> : vector<19x8xf32>
    %580 = tpu.matmul %427, %579, %cst_431 {dimension_numbers = #tpu.dot_dimension_numbers<[1], [0], [0], [1], [0, 0, 1, 1], [], []>} : vector<19x32xbf16>, vector<32x8xbf16>, vector<19x8xf32> -> vector<19x8xf32>
    %c1_432 = arith.constant 1 : index
    %c3_433 = arith.constant 3 : index
    %c0_434 = arith.constant 0 : index
    %c0_435 = arith.constant 0 : index
    %581 = vector.load %arg22[%c1_432, %c3_433, %c0_434, %c0_435] : memref<2x4x1x8xf32, #tpu.memory_space<vmem>>, vector<1x1x1x8xf32>
    %582 = vector.shape_cast %581 : vector<1x1x1x8xf32> to vector<1x8xf32>
    %583 = vector.broadcast %582 : vector<1x8xf32> to vector<19x8xf32>
    %584 = arith.addf %580, %583 : vector<19x8xf32>
    %cst_436 = arith.constant 0.353553385 : f32
    %585 = vector.broadcast %cst_436 : f32 to vector<19x8xf32>
    %586 = arith.mulf %570, %585 : vector<19x8xf32>
    %587 = arith.truncf %586 : vector<19x8xf32> to vector<19x8xbf16>
    %588 = arith.truncf %577 : vector<19x8xf32> to vector<19x8xbf16>
    %cst_437 = arith.constant dense<0.000000e+00> : vector<19x19xf32>
    %589 = tpu.matmul %587, %588, %cst_437 {dimension_numbers = #tpu.dot_dimension_numbers<[1], [1], [0], [0], [0, 0, 1, 0], [], []>} : vector<19x8xbf16>, vector<19x8xbf16>, vector<19x19xf32> -> vector<19x19xf32>
    %590 = arith.addf %589, %166 : vector<19x19xf32>
    %cst_438 = arith.constant dense<0xFF800000> : vector<19xf32>
    %591 = vector.multi_reduction <maximumf>, %590, %cst_438 [1] : vector<19x19xf32> to vector<19xf32>
    %592 = vector.shape_cast %591 : vector<19xf32> to vector<19x1xf32>
    %593 = vector.broadcast %592 : vector<19x1xf32> to vector<19x19xf32>
    %594 = arith.subf %590, %593 : vector<19x19xf32>
    %595 = math.exp %594 : vector<19x19xf32>
    %cst_439 = arith.constant dense<0.000000e+00> : vector<19xf32>
    %596 = vector.multi_reduction <add>, %595, %cst_439 [1] : vector<19x19xf32> to vector<19xf32>
    %597 = vector.shape_cast %596 : vector<19xf32> to vector<19x1xf32>
    %598 = tpu.reciprocal %597 {approx = true} : vector<19x1xf32> -> vector<19x1xf32>
    %599 = vector.broadcast %598 : vector<19x1xf32> to vector<19x19xf32>
    %600 = arith.mulf %595, %599 : vector<19x19xf32>
    %601 = arith.truncf %600 : vector<19x19xf32> to vector<19x19xbf16>
    %602 = arith.truncf %584 : vector<19x8xf32> to vector<19x8xbf16>
    %cst_440 = arith.constant dense<0.000000e+00> : vector<19x8xf32>
    %603 = tpu.matmul %601, %602, %cst_440 {dimension_numbers = #tpu.dot_dimension_numbers<[1], [0], [0], [1], [0, 0, 1, 1], [], []>} : vector<19x19xbf16>, vector<19x8xbf16>, vector<19x8xf32> -> vector<19x8xf32>
    %604 = arith.truncf %603 : vector<19x8xf32> to vector<19x8xbf16>
    %c1_441 = arith.constant 1 : index
    %c3_442 = arith.constant 3 : index
    %c0_443 = arith.constant 0 : index
    %c0_444 = arith.constant 0 : index
    %605 = vector.load %arg19[%c1_441, %c3_442, %c0_443, %c0_444] : memref<2x4x8x32xbf16, #tpu.memory_space<vmem>>, vector<1x1x8x32xbf16>
    %606 = vector.shape_cast %605 : vector<1x1x8x32xbf16> to vector<8x32xbf16>
    %cst_445 = arith.constant dense<0.000000e+00> : vector<19x32xf32>
    %607 = tpu.matmul %604, %606, %cst_445 {dimension_numbers = #tpu.dot_dimension_numbers<[1], [0], [0], [1], [0, 0, 1, 1], [], []>} : vector<19x8xbf16>, vector<8x32xbf16>, vector<19x32xf32> -> vector<19x32xf32>
    %608 = arith.addf %563, %607 : vector<19x32xf32>
    %c1_446 = arith.constant 1 : index
    %c0_447 = arith.constant 0 : index
    %c0_448 = arith.constant 0 : index
    %609 = vector.load %arg23[%c1_446, %c0_447, %c0_448] : memref<2x1x32xf32, #tpu.memory_space<vmem>>, vector<1x1x32xf32>
    %610 = vector.shape_cast %609 : vector<1x1x32xf32> to vector<1x32xf32>
    %611 = vector.broadcast %610 : vector<1x32xf32> to vector<19x32xf32>
    %612 = arith.addf %608, %611 : vector<19x32xf32>
    %613 = arith.addf %426, %612 : vector<19x32xf32>
    %c1_449 = arith.constant 1 : index
    %c0_450 = arith.constant 0 : index
    %c0_451 = arith.constant 0 : index
    %614 = vector.load %arg24[%c1_449, %c0_450, %c0_451] : memref<2x1x32xf32, #tpu.memory_space<vmem>>, vector<1x1x32xf32>
    %615 = vector.shape_cast %614 : vector<1x1x32xf32> to vector<1x32xf32>
    %c1_452 = arith.constant 1 : index
    %c0_453 = arith.constant 0 : index
    %c0_454 = arith.constant 0 : index
    %616 = vector.load %arg25[%c1_452, %c0_453, %c0_454] : memref<2x1x32xf32, #tpu.memory_space<vmem>>, vector<1x1x32xf32>
    %617 = vector.shape_cast %616 : vector<1x1x32xf32> to vector<1x32xf32>
    %cst_455 = arith.constant dense<0.000000e+00> : vector<19xf32>
    %618 = vector.multi_reduction <add>, %613, %cst_455 [1] : vector<19x32xf32> to vector<19xf32>
    %619 = vector.shape_cast %618 : vector<19xf32> to vector<19x1xf32>
    %cst_456 = arith.constant 3.200000e+01 : f32
    %620 = vector.broadcast %cst_456 : f32 to vector<19x1xf32>
    %621 = arith.divf %619, %620 : vector<19x1xf32>
    %622 = vector.broadcast %621 : vector<19x1xf32> to vector<19x32xf32>
    %623 = arith.subf %613, %622 : vector<19x32xf32>
    %624 = arith.mulf %623, %623 : vector<19x32xf32>
    %cst_457 = arith.constant dense<0.000000e+00> : vector<19xf32>
    %625 = vector.multi_reduction <add>, %624, %cst_457 [1] : vector<19x32xf32> to vector<19xf32>
    %626 = vector.shape_cast %625 : vector<19xf32> to vector<19x1xf32>
    %cst_458 = arith.constant 3.200000e+01 : f32
    %627 = vector.broadcast %cst_458 : f32 to vector<19x1xf32>
    %628 = arith.divf %626, %627 : vector<19x1xf32>
    %cst_459 = arith.constant 9.99999974E-6 : f32
    %629 = vector.broadcast %cst_459 : f32 to vector<19x1xf32>
    %630 = arith.addf %628, %629 : vector<19x1xf32>
    %631 = math.rsqrt %630 : vector<19x1xf32>
    %632 = vector.broadcast %631 : vector<19x1xf32> to vector<19x32xf32>
    %633 = arith.mulf %623, %632 : vector<19x32xf32>
    %634 = vector.broadcast %615 : vector<1x32xf32> to vector<19x32xf32>
    %635 = arith.mulf %633, %634 : vector<19x32xf32>
    %636 = vector.broadcast %617 : vector<1x32xf32> to vector<19x32xf32>
    %637 = arith.addf %635, %636 : vector<19x32xf32>
    %638 = arith.truncf %637 : vector<19x32xf32> to vector<19x32xbf16>
    %c1_460 = arith.constant 1 : index
    %c0_461 = arith.constant 0 : index
    %c0_462 = arith.constant 0 : index
    %639 = vector.load %arg26[%c1_460, %c0_461, %c0_462] : memref<2x32x64xbf16, #tpu.memory_space<vmem>>, vector<1x32x64xbf16>
    %640 = vector.shape_cast %639 : vector<1x32x64xbf16> to vector<32x64xbf16>
    %cst_463 = arith.constant dense<0.000000e+00> : vector<19x64xf32>
    %641 = tpu.matmul %638, %640, %cst_463 {dimension_numbers = #tpu.dot_dimension_numbers<[1], [0], [0], [1], [0, 0, 1, 1], [], []>} : vector<19x32xbf16>, vector<32x64xbf16>, vector<19x64xf32> -> vector<19x64xf32>
    %c1_464 = arith.constant 1 : index
    %c0_465 = arith.constant 0 : index
    %c0_466 = arith.constant 0 : index
    %642 = vector.load %arg27[%c1_464, %c0_465, %c0_466] : memref<2x1x64xf32, #tpu.memory_space<vmem>>, vector<1x1x64xf32>
    %643 = vector.shape_cast %642 : vector<1x1x64xf32> to vector<1x64xf32>
    %644 = vector.broadcast %643 : vector<1x64xf32> to vector<19x64xf32>
    %645 = arith.addf %641, %644 : vector<19x64xf32>
    %cst_467 = arith.constant 5.000000e-01 : f32
    %646 = vector.broadcast %cst_467 : f32 to vector<19x64xf32>
    %647 = arith.mulf %646, %645 : vector<19x64xf32>
    %cst_468 = arith.constant 0.707106769 : f32
    %648 = vector.broadcast %cst_468 : f32 to vector<19x64xf32>
    %649 = arith.mulf %645, %648 : vector<19x64xf32>
    %650 = math.erf %649 : vector<19x64xf32>
    %cst_469 = arith.constant 1.000000e+00 : f32
    %651 = vector.broadcast %cst_469 : f32 to vector<19x64xf32>
    %652 = arith.addf %651, %650 : vector<19x64xf32>
    %653 = arith.mulf %647, %652 : vector<19x64xf32>
    %654 = arith.truncf %653 : vector<19x64xf32> to vector<19x64xbf16>
    %c1_470 = arith.constant 1 : index
    %c0_471 = arith.constant 0 : index
    %c0_472 = arith.constant 0 : index
    %655 = vector.load %arg28[%c1_470, %c0_471, %c0_472] : memref<2x64x32xbf16, #tpu.memory_space<vmem>>, vector<1x64x32xbf16>
    %656 = vector.shape_cast %655 : vector<1x64x32xbf16> to vector<64x32xbf16>
    %cst_473 = arith.constant dense<0.000000e+00> : vector<19x32xf32>
    %657 = tpu.matmul %654, %656, %cst_473 {dimension_numbers = #tpu.dot_dimension_numbers<[1], [0], [0], [1], [0, 0, 1, 1], [], []>} : vector<19x64xbf16>, vector<64x32xbf16>, vector<19x32xf32> -> vector<19x32xf32>
    %c1_474 = arith.constant 1 : index
    %c0_475 = arith.constant 0 : index
    %c0_476 = arith.constant 0 : index
    %658 = vector.load %arg29[%c1_474, %c0_475, %c0_476] : memref<2x1x32xf32, #tpu.memory_space<vmem>>, vector<1x1x32xf32>
    %659 = vector.shape_cast %658 : vector<1x1x32xf32> to vector<1x32xf32>
    %660 = vector.broadcast %659 : vector<1x32xf32> to vector<19x32xf32>
    %661 = arith.addf %657, %660 : vector<19x32xf32>
    %662 = arith.addf %637, %661 : vector<19x32xf32>
    %c1_477 = arith.constant 1 : index
    %c0_478 = arith.constant 0 : index
    %c0_479 = arith.constant 0 : index
    %663 = vector.load %arg30[%c1_477, %c0_478, %c0_479] : memref<2x1x32xf32, #tpu.memory_space<vmem>>, vector<1x1x32xf32>
    %664 = vector.shape_cast %663 : vector<1x1x32xf32> to vector<1x32xf32>
    %c1_480 = arith.constant 1 : index
    %c0_481 = arith.constant 0 : index
    %c0_482 = arith.constant 0 : index
    %665 = vector.load %arg31[%c1_480, %c0_481, %c0_482] : memref<2x1x32xf32, #tpu.memory_space<vmem>>, vector<1x1x32xf32>
    %666 = vector.shape_cast %665 : vector<1x1x32xf32> to vector<1x32xf32>
    %cst_483 = arith.constant dense<0.000000e+00> : vector<19xf32>
    %667 = vector.multi_reduction <add>, %662, %cst_483 [1] : vector<19x32xf32> to vector<19xf32>
    %668 = vector.shape_cast %667 : vector<19xf32> to vector<19x1xf32>
    %cst_484 = arith.constant 3.200000e+01 : f32
    %669 = vector.broadcast %cst_484 : f32 to vector<19x1xf32>
    %670 = arith.divf %668, %669 : vector<19x1xf32>
    %671 = vector.broadcast %670 : vector<19x1xf32> to vector<19x32xf32>
    %672 = arith.subf %662, %671 : vector<19x32xf32>
    %673 = arith.mulf %672, %672 : vector<19x32xf32>
    %cst_485 = arith.constant dense<0.000000e+00> : vector<19xf32>
    %674 = vector.multi_reduction <add>, %673, %cst_485 [1] : vector<19x32xf32> to vector<19xf32>
    %675 = vector.shape_cast %674 : vector<19xf32> to vector<19x1xf32>
    %cst_486 = arith.constant 3.200000e+01 : f32
    %676 = vector.broadcast %cst_486 : f32 to vector<19x1xf32>
    %677 = arith.divf %675, %676 : vector<19x1xf32>
    %cst_487 = arith.constant 9.99999974E-6 : f32
    %678 = vector.broadcast %cst_487 : f32 to vector<19x1xf32>
    %679 = arith.addf %677, %678 : vector<19x1xf32>
    %680 = math.rsqrt %679 : vector<19x1xf32>
    %681 = vector.broadcast %680 : vector<19x1xf32> to vector<19x32xf32>
    %682 = arith.mulf %672, %681 : vector<19x32xf32>
    %683 = vector.broadcast %664 : vector<1x32xf32> to vector<19x32xf32>
    %684 = arith.mulf %682, %683 : vector<19x32xf32>
    %685 = vector.broadcast %666 : vector<1x32xf32> to vector<19x32xf32>
    %686 = arith.addf %684, %685 : vector<19x32xf32>
    %c0_488 = arith.constant 0 : index
    %c0_489 = arith.constant 0 : index
    %c0_490 = arith.constant 0 : index
    %687 = vector.load %arg32[%c0_488, %c0_489, %c0_490] : memref<1x19x32xf32, #tpu.memory_space<vmem>>, vector<1x19x32xf32>
    %688 = vector.shape_cast %687 : vector<1x19x32xf32> to vector<19x32xf32>
    %689 = vector.shape_cast %686 : vector<19x32xf32> to vector<1x19x32xf32>
    tpu.vector_store %arg32[%c0_488, %c0_489, %c0_490], %689 {strides = array<i32>} : memref<1x19x32xf32, #tpu.memory_space<vmem>>, vector<1x19x32xf32>,
    return
  }
  func.func @transform_0(%arg0: i32) -> (i32, i32, i32) {
    %c0_i32 = arith.constant 0 : i32
    %c0_i32_0 = arith.constant 0 : i32
    %c0_i32_1 = arith.constant 0 : i32
    return %arg0, %c0_i32, %c0_i32_0 : i32, i32, i32
  }
  func.func @transform_1(%arg0: i32) -> (i32, i32, i32) {
    %c0_i32 = arith.constant 0 : i32
    %c0_i32_0 = arith.constant 0 : i32
    %c0_i32_1 = arith.constant 0 : i32
    return %arg0, %c0_i32, %c0_i32_0 : i32, i32, i32
  }
  func.func @transform_2(%arg0: i32) -> (i32, i32, i32) {
    %c0_i32 = arith.constant 0 : i32
    %c0_i32_0 = arith.constant 0 : i32
    %c0_i32_1 = arith.constant 0 : i32
    return %arg0, %c0_i32, %c0_i32_0 : i32, i32, i32
  }
  func.func @transform_3(%arg0: i32) -> (i32, i32) {
    %c0_i32 = arith.constant 0 : i32
    %c0_i32_0 = arith.constant 0 : i32
    %c0_i32_1 = arith.constant 0 : i32
    return %c0_i32, %c0_i32_0 : i32, i32
  }
  func.func @transform_4(%arg0: i32) -> (i32, i32) {
    %c0_i32 = arith.constant 0 : i32
    %c0_i32_0 = arith.constant 0 : i32
    %c0_i32_1 = arith.constant 0 : i32
    return %c0_i32, %c0_i32_0 : i32, i32
  }
  func.func @transform_5(%arg0: i32) -> (i32, i32) {
    %c0_i32 = arith.constant 0 : i32
    %c0_i32_0 = arith.constant 0 : i32
    %c0_i32_1 = arith.constant 0 : i32
    return %c0_i32, %c0_i32_0 : i32, i32
  }
  func.func @transform_6(%arg0: i32) -> (i32, i32, i32) {
    %c0_i32 = arith.constant 0 : i32
    %c0_i32_0 = arith.constant 0 : i32
    %c0_i32_1 = arith.constant 0 : i32
    %c0_i32_2 = arith.constant 0 : i32
    return %c0_i32, %c0_i32_0, %c0_i32_1 : i32, i32, i32
  }
  func.func @transform_7(%arg0: i32) -> (i32, i32) {
    %c0_i32 = arith.constant 0 : i32
    %c0_i32_0 = arith.constant 0 : i32
    %c0_i32_1 = arith.constant 0 : i32
    return %c0_i32, %c0_i32_0 : i32, i32
  }
  func.func @transform_8(%arg0: i32) -> (i32, i32) {
    %c0_i32 = arith.constant 0 : i32
    %c0_i32_0 = arith.constant 0 : i32
    %c0_i32_1 = arith.constant 0 : i32
    return %c0_i32, %c0_i32_0 : i32, i32
  }
  func.func @transform_9(%arg0: i32) -> (i32, i32) {
    %c0_i32 = arith.constant 0 : i32
    %c0_i32_0 = arith.constant 0 : i32
    %c0_i32_1 = arith.constant 0 : i32
    return %c0_i32, %c0_i32_0 : i32, i32
  }
  func.func @transform_10(%arg0: i32) -> (i32, i32) {
    %c0_i32 = arith.constant 0 : i32
    %c0_i32_0 = arith.constant 0 : i32
    %c0_i32_1 = arith.constant 0 : i32
    return %c0_i32, %c0_i32_0 : i32, i32
  }
  func.func @transform_11(%arg0: i32) -> (i32, i32, i32) {
    %c0_i32 = arith.constant 0 : i32
    %c0_i32_0 = arith.constant 0 : i32
    %c0_i32_1 = arith.constant 0 : i32
    %c0_i32_2 = arith.constant 0 : i32
    return %c0_i32, %c0_i32_0, %c0_i32_1 : i32, i32, i32
  }
  func.func @transform_12(%arg0: i32) -> (i32, i32) {
    %c0_i32 = arith.constant 0 : i32
    %c0_i32_0 = arith.constant 0 : i32
    %c0_i32_1 = arith.constant 0 : i32
    return %c0_i32, %c0_i32_0 : i32, i32
  }
  func.func @transform_13(%arg0: i32) -> (i32, i32) {
    %c0_i32 = arith.constant 0 : i32
    %c0_i32_0 = arith.constant 0 : i32
    %c0_i32_1 = arith.constant 0 : i32
    return %c0_i32, %c0_i32_0 : i32, i32
  }
  func.func @transform_14(%arg0: i32) -> (i32, i32) {
    %c0_i32 = arith.constant 0 : i32
    %c0_i32_0 = arith.constant 0 : i32
    %c0_i32_1 = arith.constant 0 : i32
    return %c0_i32, %c0_i32_0 : i32, i32
  }
  func.func @transform_15(%arg0: i32) -> (i32, i32, i32, i32) {
    %c0_i32 = arith.constant 0 : i32
    %c0_i32_0 = arith.constant 0 : i32
    %c0_i32_1 = arith.constant 0 : i32
    %c0_i32_2 = arith.constant 0 : i32
    %c0_i32_3 = arith.constant 0 : i32
    return %c0_i32, %c0_i32_0, %c0_i32_1, %c0_i32_2 : i32, i32, i32, i32
  }
  func.func @transform_16(%arg0: i32) -> (i32, i32, i32, i32) {
    %c0_i32 = arith.constant 0 : i32
    %c0_i32_0 = arith.constant 0 : i32
    %c0_i32_1 = arith.constant 0 : i32
    %c0_i32_2 = arith.constant 0 : i32
    %c0_i32_3 = arith.constant 0 : i32
    return %c0_i32, %c0_i32_0, %c0_i32_1, %c0_i32_2 : i32, i32, i32, i32
  }
  func.func @transform_17(%arg0: i32) -> (i32, i32, i32, i32) {
    %c0_i32 = arith.constant 0 : i32
    %c0_i32_0 = arith.constant 0 : i32
    %c0_i32_1 = arith.constant 0 : i32
    %c0_i32_2 = arith.constant 0 : i32
    %c0_i32_3 = arith.constant 0 : i32
    return %c0_i32, %c0_i32_0, %c0_i32_1, %c0_i32_2 : i32, i32, i32, i32
  }
  func.func @transform_18(%arg0: i32) -> (i32, i32, i32, i32) {
    %c0_i32 = arith.constant 0 : i32
    %c0_i32_0 = arith.constant 0 : i32
    %c0_i32_1 = arith.constant 0 : i32
    %c0_i32_2 = arith.constant 0 : i32
    %c0_i32_3 = arith.constant 0 : i32
    return %c0_i32, %c0_i32_0, %c0_i32_1, %c0_i32_2 : i32, i32, i32, i32
  }
  func.func @transform_19(%arg0: i32) -> (i32, i32, i32, i32) {
    %c0_i32 = arith.constant 0 : i32
    %c0_i32_0 = arith.constant 0 : i32
    %c0_i32_1 = arith.constant 0 : i32
    %c0_i32_2 = arith.constant 0 : i32
    %c0_i32_3 = arith.constant 0 : i32
    return %c0_i32, %c0_i32_0, %c0_i32_1, %c0_i32_2 : i32, i32, i32, i32
  }
  func.func @transform_20(%arg0: i32) -> (i32, i32, i32, i32) {
    %c0_i32 = arith.constant 0 : i32
    %c0_i32_0 = arith.constant 0 : i32
    %c0_i32_1 = arith.constant 0 : i32
    %c0_i32_2 = arith.constant 0 : i32
    %c0_i32_3 = arith.constant 0 : i32
    return %c0_i32, %c0_i32_0, %c0_i32_1, %c0_i32_2 : i32, i32, i32, i32
  }
  func.func @transform_21(%arg0: i32) -> (i32, i32, i32, i32) {
    %c0_i32 = arith.constant 0 : i32
    %c0_i32_0 = arith.constant 0 : i32
    %c0_i32_1 = arith.constant 0 : i32
    %c0_i32_2 = arith.constant 0 : i32
    %c0_i32_3 = arith.constant 0 : i32
    return %c0_i32, %c0_i32_0, %c0_i32_1, %c0_i32_2 : i32, i32, i32, i32
  }
  func.func @transform_22(%arg0: i32) -> (i32, i32, i32) {
    %c0_i32 = arith.constant 0 : i32
    %c0_i32_0 = arith.constant 0 : i32
    %c0_i32_1 = arith.constant 0 : i32
    %c0_i32_2 = arith.constant 0 : i32
    return %c0_i32, %c0_i32_0, %c0_i32_1 : i32, i32, i32
  }
  func.func @transform_23(%arg0: i32) -> (i32, i32, i32) {
    %c0_i32 = arith.constant 0 : i32
    %c0_i32_0 = arith.constant 0 : i32
    %c0_i32_1 = arith.constant 0 : i32
    %c0_i32_2 = arith.constant 0 : i32
    return %c0_i32, %c0_i32_0, %c0_i32_1 : i32, i32, i32
  }
  func.func @transform_24(%arg0: i32) -> (i32, i32, i32) {
    %c0_i32 = arith.constant 0 : i32
    %c0_i32_0 = arith.constant 0 : i32
    %c0_i32_1 = arith.constant 0 : i32
    %c0_i32_2 = arith.constant 0 : i32
    return %c0_i32, %c0_i32_0, %c0_i32_1 : i32, i32, i32
  }
  func.func @transform_25(%arg0: i32) -> (i32, i32, i32) {
    %c0_i32 = arith.constant 0 : i32
    %c0_i32_0 = arith.constant 0 : i32
    %c0_i32_1 = arith.constant 0 : i32
    %c0_i32_2 = arith.constant 0 : i32
    return %c0_i32, %c0_i32_0, %c0_i32_1 : i32, i32, i32
  }
  func.func @transform_26(%arg0: i32) -> (i32, i32, i32) {
    %c0_i32 = arith.constant 0 : i32
    %c0_i32_0 = arith.constant 0 : i32
    %c0_i32_1 = arith.constant 0 : i32
    %c0_i32_2 = arith.constant 0 : i32
    return %c0_i32, %c0_i32_0, %c0_i32_1 : i32, i32, i32
  }
  func.func @transform_27(%arg0: i32) -> (i32, i32, i32) {
    %c0_i32 = arith.constant 0 : i32
    %c0_i32_0 = arith.constant 0 : i32
    %c0_i32_1 = arith.constant 0 : i32
    %c0_i32_2 = arith.constant 0 : i32
    return %c0_i32, %c0_i32_0, %c0_i32_1 : i32, i32, i32
  }
  func.func @transform_28(%arg0: i32) -> (i32, i32, i32) {
    %c0_i32 = arith.constant 0 : i32
    %c0_i32_0 = arith.constant 0 : i32
    %c0_i32_1 = arith.constant 0 : i32
    %c0_i32_2 = arith.constant 0 : i32
    return %c0_i32, %c0_i32_0, %c0_i32_1 : i32, i32, i32
  }
  func.func @transform_29(%arg0: i32) -> (i32, i32, i32) {
    %c0_i32 = arith.constant 0 : i32
    %c0_i32_0 = arith.constant 0 : i32
    %c0_i32_1 = arith.constant 0 : i32
    %c0_i32_2 = arith.constant 0 : i32
    return %c0_i32, %c0_i32_0, %c0_i32_1 : i32, i32, i32
  }
  func.func @transform_30(%arg0: i32) -> (i32, i32, i32) {
    %c0_i32 = arith.constant 0 : i32
    %c0_i32_0 = arith.constant 0 : i32
    %c0_i32_1 = arith.constant 0 : i32
    %c0_i32_2 = arith.constant 0 : i32
    return %c0_i32, %c0_i32_0, %c0_i32_1 : i32, i32, i32
  }
  func.func @transform_31(%arg0: i32) -> (i32, i32, i32) {
    %c0_i32 = arith.constant 0 : i32
    %c0_i32_0 = arith.constant 0 : i32
    %c0_i32_1 = arith.constant 0 : i32
    return %arg0, %c0_i32, %c0_i32_0 : i32, i32, i32
  }
}

</mosaic_0001>

<bundles_post_ra>
// kernel: wavlm_encoder_forward.1
= control target key start
LH: loop header
LB: loop body
LE: loop exit
PB: predicated region body
PF: predicated region fallthrough
CT: control target
= control target key end

     0   :  { %s7841_s6 = smov 1   ;;  %s7842_s10 = smov 2   ;;  %s8700_s0 = inlined_call_operand.smem [shape: u32[32], index: -1, kind: input, shape index: {}] }
   0x1   :  { %s7884_s5 = sld [smem:[%s8700_s0]]   ;;  %s7843_s14 = smov 3  }
   0x2   :  { %s7889_s9 = sld [smem:[%s8700_s0 + %s7841_s6]]   ;;  %s7844_s18 = smov 4  }
   0x3   :  { %s7894_s13 = sld [smem:[%s8700_s0 + %s7842_s10]]   ;;  %s7845_s22 = smov 5  }
   0x4   :  { %s7899_s17 = sld [smem:[%s8700_s0 + %s7843_s14]]   ;;  %s7846_s26 = smov 6  }
   0x5   :  { %s7904_s21 = sld [smem:[%s8700_s0 + %s7844_s18]]   ;;  %s7847_s30 = smov 7  }
   0x6   :  { %s7909_s25 = sld [smem:[%s8700_s0 + %s7845_s22]]   ;;  %s7848_s4 = smov 8  }
   0x7   :  { %s7914_s29 = sld [smem:[%s8700_s0 + %s7846_s26]]   ;;  %s7849_s10 = smov 9  }
   0x8   :  { %s7919_s3 = sld [smem:[%s8700_s0 + %s7847_s30]]   ;;  %s7850_s15 = smov 10  }
   0x9   :  { %8714 = sst [smem:[#allocation4_spill]] %s7894_s13  ;;  %s7851_s20 = smov 11  }
   0xa   :  { %s7924_s8 = sld [smem:[%s8700_s0 + %s7848_s4]]   ;;  %s7852_s26 = smov 12  }
   0xb   :  { %s7929_s14 = sld [smem:[%s8700_s0 + %s7849_s10]]   ;;  %s7853_s1 = smov 13  }
   0xc   :  { %s7934_s19 = sld [smem:[%s8700_s0 + %s7850_s15]]   ;;  %s7854_s7 = smov 14  }
   0xd   :  { %s7939_s24 = sld [smem:[%s8700_s0 + %s7851_s20]]   ;;  %s7855_s15 = smov 15  }
   0xe   :  { %8715 = sst [smem:[#allocation5_spill]] %s7919_s3  ;;  %s7856_s22 = smov 16  }
   0xf   :  { %s7944_s30 = sld [smem:[%s8700_s0 + %s7852_s26]]   ;;  %s7857_s28 = smov 17  }
  0x10   :  { %s7949_s6 = sld [smem:[%s8700_s0 + %s7853_s1]]  }
  0x11   :  { %s7954_s12 = sld [smem:[%s8700_s0 + %s7854_s7]]   ;;  %s7858_s7 = smov 18  }
  0x12   :  { %s7959_s20 = sld [smem:[%s8700_s0 + %s7855_s15]]   ;;  %s7859_s15 = smov 19  }
  0x13   :  { %s7964_s27 = sld [smem:[%s8700_s0 + %s7856_s22]]   ;;  %s7860_s22 = smov 20  }
  0x14   :  { %s7969_s4 = sld [smem:[%s8700_s0 + %s7857_s28]]   ;;  %s7861_s28 = smov 21  }
  0x15   :  { %s7974_s13 = sld [smem:[%s8700_s0 + %s7858_s7]]   ;;  %s7862_s7 = smov 22  }
  0x16   :  { %8716 = sst [smem:[#allocation6_spill]] %s7949_s6 }
  0x17   :  { %8717 = sst [smem:[#allocation7_spill]] %s7954_s12 }
  0x18   :  { %s7979_s12 = sld [smem:[%s8700_s0 + %s7859_s15]]   ;;  %s7863_s15 = smov 23  }
  0x19   :  { %s7984_s6 = sld [smem:[%s8700_s0 + %s7860_s22]]   ;;  %s7864_s22 = smov 24  }
  0x1a   :  { %8718 = sst [smem:[#allocation8_spill]] %s7969_s4 }
  0x1b   :  { %8719 = sst [smem:[#allocation9_spill]] %s7974_s13 }
  0x1c   :  { %s7989_s4 = sld [smem:[%s8700_s0 + %s7861_s28]]   ;;  %s7865_s28 = smov 25  }
  0x1d   :  { %s7994_s13 = sld [smem:[%s8700_s0 + %s7862_s7]]   ;;  %s7866_s7 = smov 26  }
  0x1e   :  { %8720 = sst [smem:[#allocation10_spill]] %s7979_s12 }
  0x1f   :  { %8721 = sst [smem:[#allocation11_spill]] %s7984_s6 }
  0x20   :  { %s7999_s12 = sld [smem:[%s8700_s0 + %s7863_s15]]   ;;  %s7867_s15 = smov 27  }
  0x21   :  { %s8004_s6 = sld [smem:[%s8700_s0 + %s7864_s22]]   ;;  %s7868_s22 = smov 28  }
  0x22   :  { %8722 = sst [smem:[#allocation12_spill]] %s7989_s4 }
  0x23   :  { %8723 = sst [smem:[#allocation13_spill]] %s7994_s13 }
  0x24   :  { %s8009_s4 = sld [smem:[%s8700_s0 + %s7865_s28]]   ;;  %s7869_s28 = smov 29  }
  0x25   :  { %s8014_s13 = sld [smem:[%s8700_s0 + %s7866_s7]]   ;;  %s7870_s7 = smov 30  }
  0x26   :  { %8724 = sst [smem:[#allocation14_spill]] %s7999_s12 }
  0x27   :  { %8725 = sst [smem:[#allocation15_spill]] %s8004_s6 }
  0x28   :  { %s8019_s12 = sld [smem:[%s8700_s0 + %s7867_s15]]   ;;  %s7871_s15 = smov 31  }
  0x29   :  { %s8024_s6 = sld [smem:[%s8700_s0 + %s7868_s22]]   ;;  %s8041_s22 = smov 0  }
  0x2a   :  { %8726 = sst [smem:[#allocation16_spill]] %s8009_s4 }
  0x2b   :  { %8727 = sst [smem:[#allocation17_spill]] %s8014_s13 }
  0x2c   :  { %s8029_s4 = sld [smem:[%s8700_s0 + %s7869_s28]]  }
  0x2d   :  { %s8034_s13 = sld [smem:[%s8700_s0 + %s7870_s7]]  }
  0x2e   :  { %8728 = sst [smem:[#allocation18_spill]] %s8019_s12 }
  0x2f   :  { %s8039_s12 = sld [smem:[%s8700_s0 + %s7871_s15]]  }
  0x30 LB: > { %s6382_s23 = sadd.s32 4294967295, %s7839_s22   ;;  %p6386_p0 = scmp.ge.s32.totalorder %s7839_s22, 1  ;;  %s7839_s22 = sphi %s8041_s22, %s73_s22  }
  0x31   : > { %p887_p1 = scmp.lt.s32.totalorder %s7839_s22, 3 }
  0x33   : > { %p888_p2 = pnand %p6386_p0, %p887_p1 }
  0x34   : > { %p975_p3 = scmp.lt.s32.totalorder (!%p888_p2), %s6382_s23, 1  ;;  %s8729_s3 = sld [smem:[#allocation5_spill]] (!%p888_p2) }
  0x35   : > { %891 = sbr.rel (%p888_p2) target bundleno = 11272 (0x2c08), region = 144  ;;  %s8730_s2 = sld [smem:[#allocation8_spill]] (!%p888_p2) }
  0x36   : > { %s8731_s7 = sld [smem:[#allocation6_spill]] (!%p888_p2) }
  0x37   : > { %s8732_s10 = sld [smem:[#allocation7_spill]] (!%p888_p2) }
  0x38   : > { %s8733_s11 = sld [smem:[#allocation11_spill]] (!%p888_p2) }
  0x39   : > { %s8734_s15 = sld [smem:[#allocation10_spill]] (!%p888_p2) }
  0x3a   : > { %vm1019_vm0 = vcmask 1044480   ;;  %v7872_v0 = vmov 0.0   ;;  %v7589_v1 = vld [vmem:[%s7899_s17] sm:$0x1f]   ;;  %vm7873_vm1 = vmmov 0   ;;  %s8746_s23 = smov (!%p975_p3, %s6382_s23), 1 }
  0x3b   : > { %7030 = vmatprep.subr.bf16.mxu0 %v7872_v0  ;;  %7516 = vmatprep.subr.bf16.mxu1 %v7872_v0  ;;  %v1021_v2 = vsel %vm1019_vm0, %v7589_v1, 0  ;;  %s7542_s0 = smul.u32 40, %s8746_s23  ;;  %vm1009_vm2 = vcmask 80896   ;;  %v7590_v11 = vld [vmem:[%s7914_s29 + $0x8] sm:$0xff]   ;;  %v8064_v12 = vld [vmem:[%s7914_s29] sm:$0xff]   ;;  %vm1079_vm3 = vcmask 130048  }
  0x3c   : > { %7032 = vmatprep.mubr.msk.bf16.mxu0 %vm7873_vm1, %v7872_v0  ;;  %7040 = vmatprep.mubr.msk.bf16.mxu1 %vm7873_vm1, %v7872_v0  ;;  %vm1087_vm4 = vcmask 129024   ;;  %vm1422_vm5 = vcmask 124928   ;;  %s8712_s28 = smul.u32 24, %s8746_s23  ;;  %vm1570_vm6 = vcmask 260096   ;;  %vm1567_vm7 = vcmask 261120   ;;  %s8735_s16 = sld [smem:[#allocation12_spill]] }
  0x3d   : > { %7031 = vmatpush3.bf16.msra.mxu0 %v1021_v2  ;;  %7517 = vmatpush3.bf16.msra.mxu1 %v1021_v2  ;;  %s979_s26 = scalar_lea.vmem %s7884_s5, %s7542_s0  ;;  %1571 = vst.msk [vmem:[#allocation3 + $0x10] sm:$0x7f] %vm1570_vm6, %v7872_v0  ;;  %vm1574_vm8 = vcmask 256000   ;;  %vm2287_vm9 = vcmask 64512   ;;  %vm2393_vm10 = vcmask 1040384   ;;  %vm2394_vm11 = vcmask 1041408  }
  0x3e   : > { %v994_v3 = vld [vmem:[%s979_s26] sm:$0xff]  ;;  %v995_v4 = vld [vmem:[%s979_s26 + $0x8] sm:$0xff]  ;;  %v996_v7 = vld [vmem:[%s979_s26 + $0x10] sm:$0xff]  ;;  %7044 = vmatprep.subr.bf16.mxu1 %v7590_v11  ;;  %s984_s1 = scalar_lea.vmem %s7889_s9, %s8712_s28  ;;  %1568 = vst.msk [vmem:[#allocation3] sm:$0xff] %vm1567_vm7, %v7872_v0  ;;  %s8736_s18 = sld [smem:[#allocation4_spill]]  ;;  %vm2348_vm12 = vcmask 154624  }
  0x3f   : > { %v999_v5 = vpack.c.bf16 %v995_v4, %v994_v3  ;;  %v998_v6 = vld [vmem:[%s979_s26 + $0x20] sm:$0x7f]  ;;  %v997_v8 = vld [vmem:[%s979_s26 + $0x18] sm:$0xff]  ;;  %1569 = vst.msk [vmem:[#allocation3 + $0x8] sm:$0xff] %vm1567_vm7, %v7872_v0  ;;  %vm2355_vm13 = vcmask 149504   ;;  %s8737_s26 = sld [smem:[#allocation9_spill]] }
  0x40   : > { %v1001_v9 = vpack.c.bf16 %v998_v6, %v998_v6  ;;  %v1000_v10 = vpack.c.bf16 %v997_v8, %v996_v7  ;;  %v6394_v6 = vld [vmem:[%s7904_s21] ss:$0 sm:$0xff]  ;;  %vm2841_vm14 = vcmask 1043456   ;;  %s8742_s28 = sld [smem:[#allocation18_spill]]  ;;  %vm4045_vm15 = vcmask 523264  }
  0x41   : > { %7033 = vmatmul.mubr.msk.bf16.vlgmr.msra.gmra.mxu0 %vm1009_vm2, %v999_v5 }
  0x42   : > { %7036 = vmatprep.mubr.msk.bf16.mxu0 %vm7873_vm1, %v7872_v0  ;;  %7041 = vmatmul.mubr.msk.bf16.vlgmr.msra.gmra.mxu1 %vm1009_vm2, %v1001_v9 }
  0x43   : > { %7045 = vmatpush3.bf16.msra.mxu1 %v7590_v11 }
  0x44   : > { %7050 = vmatprep.subr.bf16.mxu1 %v8064_v12  ;;  %s8209_s0 = scalar_lea.vmem %s8736_s18, %s8746_s23  ;;  %s8741_s18 = sld [smem:[#allocation15_spill]] }
  0x49   : > { %7037 = vmatmul.mubr.msk.bf16.gmra.mxu0 %vm1009_vm2, %v1000_v10 }
 0x101   : > { %v1057_v13 = vpop.f32.mrf.mxu0 }
 0x102   : > { %v1073_v14 = vpop.f32.mrf.mxu1  ;;  %v1080_v23 = vsel %vm1079_vm3, %v1057_v13, 0.0 }
 0x103   : > { %v7034_v15 = vpop.f32.mrf.mxu0  ;;  %v1088_v29 = vsel %vm1087_vm4, %v1073_v14, 0.0 }
 0x104   : > { %v7042_v16 = vpop.f32.mrf.mxu1 }
 0x105   : > { %v1060_v17 = vpop.f32.mrf.mxu0 }
 0x106   : > { %v1076_v18 = vpop.f32.mrf.mxu1  ;;  %v1081_v20 = vsel %vm1079_vm3, %v1060_v17, 0.0 }
 0x107   : > { %v7035_v19 = vpop.f32.mrf.mxu0  ;;  %v1082_v25 = vadd.f32 %v1081_v20, %v1080_v23 }
 0x108   : > { %v7043_v21 = vpop.f32.mrf.mxu1 }
 0x109   : > { %v1065_v22 = vpop.f32.mrf.mxu0 }
 0x10a   : > { %v1083_v24 = vsel %vm1079_vm3, %v1065_v22, 0.0 }
 0x10b   : > { %v7038_v26 = vpop.f32.mrf.mxu0  ;;  %v1084_v27 = vadd.f32 %v1083_v24, %v1082_v25 }
 0x10d   : > { %v1068_v28 = vpop.f32.mrf.mxu0 }
 0x10e   : > { %v1085_v30 = vsel %vm1079_vm3, %v1068_v28, 0.0 }
 0x10f   : > { %v1086_v31 = vadd.f32 %v1085_v30, %v1084_v27  ;;  %v7039_v32 = vpop.f32.mrf.mxu0 }
 0x111   : > { %v1089_v33 = vadd.f32 %v1088_v29, %v1086_v31 }
 0x113   : > { %v1090_v34 = vrot.slane %v1089_v33, 4 }
 0x115   : > { %v1091_v35 = vadd.f32 %v1090_v34, %v1089_v33 }
 0x117   : > { %v1092_v36 = vrot.slane %v1091_v35, 2 }
 0x119   : > { %v1093_v37 = vadd.f32 %v1092_v36, %v1091_v35 }
 0x11b   : > { %v1094_v38 = vrot.slane %v1093_v37, 1 }
 0x11d   : > { %v1095_v39 = vadd.f32 %v1094_v38, %v1093_v37 }
 0x11f   : > { %v1097_v40 = vmul.f32 0.025641026, %v1095_v39 }
 0x121   : > { %v1098_v41 = vsub.f32 %v1057_v13, %v1097_v40  ;;  %v1099_v42 = vsub.f32 %v1060_v17, %v1097_v40  ;;  %v1100_v43 = vsub.f32 %v1065_v22, %v1097_v40  ;;  %v1101_v44 = vsub.f32 %v1068_v28, %v1097_v40  ;;  %v6395_v13 = vld [vmem:[%s7909_s25] ss:$0 sm:$0xff] }
 0x122   : > { %v1102_v45 = vsub.f32 %v1073_v14, %v1097_v40 }
 0x123   : > { %v1103_v46 = vmul.f32 %v1098_v41, %v1098_v41  ;;  %v1104_v47 = vmul.f32 %v1099_v42, %v1099_v42  ;;  %v1105_v48 = vmul.f32 %v1100_v43, %v1100_v43  ;;  %v1106_v49 = vmul.f32 %v1101_v44, %v1101_v44 }
 0x124   : > { %v1107_v53 = vmul.f32 %v1102_v45, %v1102_v45 }
 0x125   : > { %v1108_v50 = vsel %vm1079_vm3, %v1103_v46, 0.0  ;;  %v1109_v51 = vsel %vm1079_vm3, %v1104_v47, 0.0  ;;  %v1111_v54 = vsel %vm1079_vm3, %v1105_v48, 0.0  ;;  %v1113_v56 = vsel %vm1079_vm3, %v1106_v49, 0.0 }
 0x126   : > { %v1110_v52 = vadd.f32 %v1109_v51, %v1108_v50  ;;  %v1115_v58 = vsel %vm1087_vm4, %v1107_v53, 0.0 }
 0x128   : > { %v1112_v55 = vadd.f32 %v1111_v54, %v1110_v52 }
 0x12a   : > { %v1114_v57 = vadd.f32 %v1113_v56, %v1112_v55  ;;  %v7592_v56 = vld [vmem:[%s7914_s29 + $0x10] sm:$0xff]  }
 0x12c   : > { %v1116_v59 = vadd.f32 %v1115_v58, %v1114_v57 }
 0x12e   : > { %v1117_v60 = vrot.slane %v1116_v59, 4 }
 0x130   : > { %v1118_v61 = vadd.f32 %v1117_v60, %v1116_v59 }
 0x132   : > { %v1119_v62 = vrot.slane %v1118_v61, 2 }
 0x134   : > { %v1120_v63 = vadd.f32 %v1119_v62, %v1118_v61 }
 0x136   : > { %v1121_v1 = vrot.slane %v1120_v63, 1 }
 0x138   : > { %v1122_v2 = vadd.f32 %v1121_v1, %v1120_v63 }
 0x13a   : > { %v1123_v3 = vmul.f32 0.025641026, %v1122_v2 }
 0x13c   : > { %v1124_v4 = vadd.f32 1e-05, %v1123_v3 }
 0x13e   : > { %7664 = vrsqrt.f32 %v1124_v4 }
 0x14b   : > { %v7665_v5 = vpop.eup %7664 }
 0x14c   : > { %v1126_v7 = vmul.f32 %v7665_v5, %v1098_v41  ;;  %v1127_v8 = vmul.f32 %v7665_v5, %v1099_v42  ;;  %v1128_v9 = vmul.f32 %v7665_v5, %v1100_v43  ;;  %v1129_v10 = vmul.f32 %v7665_v5, %v1101_v44 }
 0x14d   : > { %v1130_v11 = vmul.f32 %v7665_v5, %v1102_v45 }
 0x14e   : > { %v1138_v14 = vmul.f32 %v6394_v6, %v1126_v7  ;;  %v1139_v15 = vmul.f32 %v6394_v6, %v1127_v8  ;;  %v1140_v16 = vmul.f32 %v6394_v6, %v1128_v9  ;;  %v1141_v17 = vmul.f32 %v6394_v6, %v1129_v10 }
 0x14f   : > { %v1142_v18 = vmul.f32 %v6394_v6, %v1130_v11 }
 0x150   : > { %v1150_v19 = vadd.f32 %v6395_v13, %v1138_v14  ;;  %v1151_v20 = vadd.f32 %v6395_v13, %v1139_v15  ;;  %v1152_v21 = vadd.f32 %v6395_v13, %v1140_v16  ;;  %v1153_v22 = vadd.f32 %v6395_v13, %v1141_v17 }
 0x151   : > { %v1154_v23 = vadd.f32 %v6395_v13, %v1142_v18 }
 0x152   : > { %v1160_v24 = vmul.f32 0.70710677, %v1150_v19  ;;  %v1161_v25 = vmul.f32 0.70710677, %v1151_v20  ;;  %v1162_v26 = vmul.f32 0.70710677, %v1152_v21 }
 0x153   : > { %v1163_v27 = vmul.f32 0.70710677, %v1153_v22  ;;  %v1164_v28 = vmul.f32 0.70710677, %v1154_v23  ;;  %v1155_v31 = vmul.f32 0.5, %v1150_v19  ;;  %v1156_v34 = vmul.f32 0.5, %v1151_v20 }
 0x154   : > { %7666 = verf.f32 %v1160_v24  ;;  %v1157_v37 = vmul.f32 0.5, %v1152_v21  ;;  %v1158_v41 = vmul.f32 0.5, %v1153_v22  ;;  %v1159_v44 = vmul.f32 0.5, %v1154_v23 }
 0x155   : > { %7668 = verf.f32 %v1161_v25 }
 0x156   : > { %7670 = verf.f32 %v1162_v26 }
 0x157   : > { %7672 = verf.f32 %v1163_v27 }
 0x158   : > { %7674 = verf.f32 %v1164_v28 }
 0x161   : > { %v7667_v29 = vpop.eup %7666 }
 0x162   : > { %v7669_v30 = vpop.eup %7668  ;;  %v1170_v32 = vadd.f32 1.0, %v7667_v29 }
 0x163   : > { %v7671_v33 = vpop.eup %7670  ;;  %v1171_v35 = vadd.f32 1.0, %v7669_v30 }
 0x164   : > { %v7673_v36 = vpop.eup %7672  ;;  %v1172_v38 = vadd.f32 1.0, %v7671_v33  ;;  %v1175_v39 = vmul.f32 %v1170_v32, %v1155_v31 }
 0x165   : > { %v7675_v40 = vpop.eup %7674  ;;  %v1173_v42 = vadd.f32 1.0, %v7673_v36  ;;  %v1176_v43 = vmul.f32 %v1171_v35, %v1156_v34 }
 0x166   : > { %v1174_v45 = vadd.f32 1.0, %v7675_v40  ;;  %v1177_v46 = vmul.f32 %v1172_v38, %v1157_v37  ;;  %1180 = vst.msk [vmem:[#allocation2] sm:$0xff] %vm1079_vm3, %v1175_v39 }
 0x167   : > { %v1178_v47 = vmul.f32 %v1173_v42, %v1158_v41  ;;  %1181 = vst.msk [vmem:[#allocation2 + $0x8] sm:$0xff] %vm1079_vm3, %v1176_v43 }
 0x168   : > { %v1179_v48 = vmul.f32 %v1174_v45, %v1159_v44  ;;  %1182 = vst.msk [vmem:[#allocation2 + $0x10] sm:$0xff] %vm1079_vm3, %v1177_v46 }
 0x169   : > { %1183 = vst.msk [vmem:[#allocation2 + $0x18] sm:$0xff] %vm1079_vm3, %v1178_v47 }
 0x16a   : > { %1184 = vst.msk [vmem:[#allocation2 + $0x20] sm:$0x7f] %vm1087_vm4, %v1179_v48 }
 0x16e   : > { %v1195_v49 = vld [vmem:[#allocation2 + $0x1] ss:$2 sm:$0xff]  ;;  %v1185_v51 = vld [vmem:[#allocation2] ss:$2 sm:$0xff] }
 0x16f   : > { %v1326_v59 = vld [vmem:[#allocation2 + $0x2] ss:$2 sm:$0xff] }
 0x170   : > { %v1197_v50 = vld [vmem:[#allocation2 + $0x11] ss:$2 sm:$0xff]  ;;  %v1187_v52 = vld [vmem:[#allocation2 + $0x10] ss:$2 sm:$0xff] }
 0x171   : > { %v1200_v53 = vpack.c.bf16 %v1197_v50, %v1195_v49  ;;  %v1199_v54 = vld [vmem:[#allocation2 + $0x21] ss:$2 sm:$0x7]  ;;  %v1190_v57 = vpack.c.bf16 %v1187_v52, %v1185_v51  ;;  %v1189_v58 = vld [vmem:[#allocation2 + $0x20] ss:$2 sm:$0x7] }
 0x172   : > { %v1201_v55 = vpack.c.bf16 %v1199_v54, %v1199_v54  ;;  %v1328_v60 = vld [vmem:[#allocation2 + $0x12] ss:$2 sm:$0xff]  ;;  %v1191_v61 = vpack.c.bf16 %v1189_v58, %v1189_v58  ;;  %v1330_v63 = vld [vmem:[#allocation2 + $0x22] ss:$2 sm:$0x7]  ;;  %v7874_v54 = vmov 0  }
 0x173   : > { %7046 = vmatprep.mubr.msk.bf16.mxu1 %vm1079_vm3, %v1200_v53  ;;  %v1331_v62 = vpack.c.bf16 %v1328_v60, %v1326_v59  ;;  %v1332_v1 = vpack.c.bf16 %v1330_v63, %v1330_v63  ;;  %v7593_v53 = vld [vmem:[%s7929_s14] sm:$0xff]   ;;  %7588 = vset.pattern.permute.xlu1 %v7874_v54 }
 0x174   : > { %7047 = vmatmul.mubr.msk.bf16.vlgmr.msra.gmra.mxu1 %vm1079_vm3, %v1201_v55  ;;  %7062 = vmatprep.subr.bf16.mxu0 %v7593_v53  ;;  %v1547_v55 = vld [vmem:[%s984_s1 + $0x8] sm:$0xff] }
 0x175   : > { %7051 = vmatpush3.bf16.msra.mxu1 %v8064_v12  ;;  %7052 = vmatprep.mubr.msk.bf16.mxu1 %vm1079_vm3, %v1190_v57  ;;  %v1548_v57 = vld [vmem:[%s984_s1 + $0x10] sm:$0x7] }
 0x176   : > { %7056 = vmatprep.subr.bf16.mxu1 %v7592_v56  ;;  %7063 = vmatpush3.bf16.msra.mxu0 %v7593_v53 }
 0x177   : > { %7587 = vset.pattern.permute.xlu0 %v7874_v54  ;;  %v7600_v54 = vld [vmem:[%s7939_s24 + $0x20] sm:$0xff]  }
 0x17c   : > { %7053 = vmatmul.mubr.msk.bf16.vlgmr.msra.gmra.mxu1 %vm1079_vm3, %v1191_v61 }
 0x17d   : > { %7057 = vmatpush3.bf16.msra.mxu1 %v7592_v56  ;;  %7058 = vmatprep.mubr.msk.bf16.mxu1 %vm1079_vm3, %v1331_v62  ;;  %v1546_v56 = vld [vmem:[%s984_s1] sm:$0xff]  ;;  %s8738_s1 = sld [smem:[#allocation13_spill]] }
 0x184   : > { %7059 = vmatmul.mubr.msk.bf16.vlgmr.msra.gmra.mxu1 %vm1079_vm3, %v1332_v1 }
 0x234   : > { %v7048_v2 = vpop.f32.mrf.mxu1 }
 0x236   : > { %v1251_v3 = vpop.f32.mrf.mxu1 }
 0x238   : > { %v7049_v12 = vpop.f32.mrf.mxu1 }
 0x23a   : > { %v1254_v4 = vpop.f32.mrf.mxu1 }
 0x23c   : > { %v7054_v5 = vpop.f32.mrf.mxu1 }
 0x23d   : > { %v1320_v9 = vadd.f32 %v7054_v5, %v7048_v2  ;;  %v6409_v5 = vld [vmem:[%s8729_s3] ss:$0 sm:$0xff]  ;;  %s8743_s3 = sld [smem:[#allocation17_spill]] }
 0x23e   : > { %v1311_v6 = vpop.f32.mrf.mxu1 }
 0x23f   : > { %v1312_v11 = vadd.f32 %v1311_v6, %v1251_v3 }
 0x240   : > { %v7055_v7 = vpop.f32.mrf.mxu1 }
 0x242   : > { %v1314_v8 = vpop.f32.mrf.mxu1 }
 0x243   : > { %v1315_v18 = vadd.f32 %v1314_v8, %v1254_v4 }
 0x244   : > { %v7060_v10 = vpop.f32.mrf.mxu1 }
 0x245   : > { %v1398_v13 = vadd.f32 %v7060_v10, %v1320_v9 }
 0x246   : > { %v1382_v14 = vpop.f32.mrf.mxu1 }
 0x247   : > { %v1404_v15 = vmul.f32 0.70710677, %v1398_v13  ;;  %v1396_v16 = vadd.f32 %v1382_v14, %v1312_v11  ;;  %v1401_v24 = vmul.f32 0.5, %v1398_v13  ;;  %v6410_v11 = vld [vmem:[%s7924_s8] ss:$0 sm:$0xff] }
 0x248   : > { %v7061_v17 = vpop.f32.mrf.mxu1 }
 0x249   : > { %7676 = verf.f32 %v1404_v15  ;;  %v1402_v19 = vmul.f32 0.70710677, %v1396_v16  ;;  %v1399_v27 = vmul.f32 0.5, %v1396_v16 }
 0x24a   : > { %v1385_v20 = vpop.f32.mrf.mxu1 }
 0x24b   : > { %7678 = verf.f32 %v1402_v19  ;;  %v1397_v21 = vadd.f32 %v1385_v20, %v1315_v18  ;;  %v7594_v20 = vld [vmem:[%s7939_s24 + $0x18] sm:$0xff]  }
 0x24c   : > { %7068 = vmatprep.subr.bf16.mxu1 %v7594_v20 }
 0x24d   : > { %v1403_v22 = vmul.f32 0.70710677, %v1397_v21  ;;  %v1400_v33 = vmul.f32 0.5, %v1397_v21  ;;  %v7595_v21 = vld [vmem:[%s7939_s24 + $0x8] sm:$0xff]   ;;  %7069 = vmatpush3.bf16.msra.mxu1 %v7594_v20 }
 0x24e   : > { %7076 = vmatprep.subr.bf16.mxu0 %v7595_v21 }
 0x24f   : > { %7680 = verf.f32 %v1403_v22  ;;  %v7596_v22 = vld [vmem:[%s7939_s24 + $0x10] sm:$0xff]  }
 0x250   : > { %7070 = vmatprep.subr.bf16.mxu1 %v7596_v22 }
 0x251   : > { %7071 = vmatpush3.bf16.msra.mxu1 %v7596_v22 }
 0x256   : > { %v7677_v23 = vpop.eup %7676 }
 0x257   : > { %v1410_v25 = vadd.f32 1.0, %v7677_v23  ;;  %v7597_v23 = vld [vmem:[%s7939_s24] sm:$0xff]  }
 0x258   : > { %v7679_v26 = vpop.eup %7678 }
 0x259   : > { %v1413_v28 = vmul.f32 %v1410_v25, %v1401_v24  ;;  %v1408_v29 = vadd.f32 1.0, %v7679_v26  ;;  %v7598_v24 = vld [vmem:[%s7939_s24 + $0x28] sm:$0xff]   ;;  %v7599_v25 = vld [vmem:[%s7939_s24 + $0x38] sm:$0xff]  }
 0x25a   : > { %7084 = vmatprep.subr.bf16.mxu1 %v7598_v24 }
 0x25b   : > { %v1423_v30 = vsel %vm1422_vm5, %v1413_v28, 0.0  ;;  %v1411_v31 = vmul.f32 %v1408_v29, %v1399_v27  ;;  %v6411_v27 = vld [vmem:[%s7934_s19] ss:$0 sm:$0xff] }
 0x25c   : > { %v7681_v32 = vpop.eup %7680  ;;  %1424 = vadd.xlane.f32.xlu1 %v1423_v30 }
 0x25d   : > { %v1416_v34 = vsel %vm1079_vm3, %v1411_v31, 0.0  ;;  %v1409_v35 = vadd.f32 1.0, %v7681_v32 }
 0x25e   : > { %1417 = vadd.xlane.f32.xlu0 %v1416_v34 }
 0x25f   : > { %v1412_v36 = vmul.f32 %v1409_v35, %v1400_v33 }
 0x261   : > { %v1419_v37 = vsel %vm1079_vm3, %v1412_v36, 0.0 }
 0x262   : > { %1420 = vadd.xlane.f32.xlu0 %v1419_v37 }
 0x2e5   : > { %v1425_v38 = vpop.xlane.xlu1 %1424 }
 0x2e6   : > { %v1429_v39 = vmul.f32 0.0625, %v1425_v38 }
 0x2e7   : > { %v1418_v40 = vpop.xlane.xlu0 %1417 }
 0x2e8   : > { %v1427_v41 = vmul.f32 0.0625, %v1418_v40  ;;  %v1432_v42 = vsub.f32 %v1413_v28, %v1429_v39 }
 0x2ea   : > { %v1430_v43 = vsub.f32 %v1411_v31, %v1427_v41  ;;  %v1435_v49 = vmul.f32 %v1432_v42, %v1432_v42 }
 0x2eb   : > { %v1421_v44 = vpop.xlane.xlu0 %1420 }
 0x2ec   : > { %v1428_v45 = vmul.f32 0.0625, %v1421_v44  ;;  %v1433_v46 = vmul.f32 %v1430_v43, %v1430_v43  ;;  %v1442_v51 = vsel %vm1422_vm5, %v1435_v49, 0.0 }
 0x2ee   : > { %v1431_v47 = vsub.f32 %v1412_v36, %v1428_v45  ;;  %v1436_v48 = vsel %vm1079_vm3, %v1433_v46, 0.0 }
 0x2ef   : > { %1437 = vadd.xlane.f32.xlu1 %v1436_v48 }
 0x2f0   : > { %v1434_v50 = vmul.f32 %v1431_v47, %v1431_v47 }
 0x2f2   : > { %v1439_v52 = vsel %vm1079_vm3, %v1434_v50, 0.0 }
 0x2f3   : > { %1443 = vadd.xlane.f32.xlu1 %v1442_v51  ;;  %1440 = vadd.xlane.f32.xlu0 %v1439_v52 }
 0x304   : > { %1556 = vperm.xlu1 %7588, %v1547_v55   ;;  %v7601_v55 = vld [vmem:[%s7939_s24 + $0x30] sm:$0xff]  }
 0x308   : > { %1561 = vperm.xlu1 %7588, %v1548_v57   ;;  %v7602_v57 = vld [vmem:[%s7939_s24 + $0x48] sm:$0xff]  }
 0x309   : > { %1551 = vperm.xlu0 %7587, %v1546_v56  }
 0x378   : > { %v1438_v58 = vpop.xlane.xlu1 %1437 }
 0x379   : > { %v1445_v59 = vmul.f32 0.0625, %v1438_v58 }
 0x37b   : > { %v1448_v60 = vadd.f32 1e-05, %v1445_v59 }
 0x37c   : > { %v1444_v61 = vpop.xlane.xlu1 %1443  ;;  %v1441_v62 = vpop.xlane.xlu0 %1440 }
 0x37d   : > { %7682 = vrsqrt.f32 %v1448_v60  ;;  %v1447_v63 = vmul.f32 0.0625, %v1444_v61  ;;  %v1446_v1 = vmul.f32 0.0625, %v1441_v62 }
 0x37f   : > { %v1450_v2 = vadd.f32 1e-05, %v1447_v63  ;;  %v1449_v3 = vadd.f32 1e-05, %v1446_v1  ;;  %v7603_v63 = vld [vmem:[%s7939_s24 + $0x40] sm:$0xff]  }
 0x380   : > { %v1557_v26 = vpop.permute.xlu1 %1556 }
 0x381   : > { %7684 = vrsqrt.f32 %v1450_v2 }
 0x382   : > { %7686 = vrsqrt.f32 %v1449_v3 }
 0x384   : > { %v1562_v28 = vpop.permute.xlu1 %1561  ;;  %v1552_v31 = vpop.permute.xlu0 %1551 }
 0x38a   : > { %v7683_v12 = vpop.eup %7682 }
 0x38b   : > { %v1454_v4 = vmul.f32 %v7683_v12, %v1430_v43 }
 0x38d   : > { %v1463_v10 = vmul.f32 %v6409_v5, %v1454_v4 }
 0x38e   : > { %v7685_v6 = vpop.eup %7684 }
 0x38f   : > { %v7687_v7 = vpop.eup %7686  ;;  %v1456_v8 = vmul.f32 %v7685_v6, %v1432_v42  ;;  %v1472_v16 = vadd.f32 %v6410_v11, %v1463_v10 }
 0x390   : > { %v1455_v9 = vmul.f32 %v7687_v7, %v1431_v47 }
 0x391   : > { %v1465_v13 = vmul.f32 %v6409_v5, %v1456_v8 }
 0x392   : > { %v1464_v14 = vmul.f32 %v6409_v5, %v1455_v9 }
 0x393   : > { %v1474_v15 = vadd.f32 %v6410_v11, %v1465_v13 }
 0x394   : > { %v1473_v17 = vadd.f32 %v6410_v11, %v1464_v14 }
 0x395   : > { %v1476_v18 = vpack.c.bf16 %v1474_v15, %v1474_v15 }
 0x396   : > { %v1475_v19 = vpack.c.bf16 %v1473_v17, %v1472_v16 }
 0x398   : > { %7064 = vmatprep.mubr.msk.bf16.mxu0 %vm1079_vm3, %v1475_v19 }
 0x399   : > { %7065 = vmatmul.mubr.msk.bf16.vlgmr.msra.gmra.mxu0 %vm1079_vm3, %v1476_v18 }
 0x39a   : > { %7077 = vmatpush3.bf16.msra.mxu0 %v7595_v21 }
 0x39b   : > { %7078 = vmatprep.subr.bf16.mxu0 %v7597_v23 }
 0x39e   : > { %7079 = vmatpush3.bf16.msra.mxu0 %v7597_v23 }
 0x39f   : > { %7092 = vmatprep.subr.bf16.mxu0 %v7599_v25 }
 0x459   : > { %v7066_v0 = vpop.f32.mrf.mxu0 }
 0x45a   : > { %v1541_v29 = vadd.f32 %v7066_v0, %v6411_v27 }
 0x45b   : > { %v1532_v30 = vpop.f32.mrf.mxu0 }
 0x45c   : > { %v8119_v32 = vmul.f32 %v1562_v28, %v1541_v29  ;;  %v1533_v33 = vadd.f32 %v6411_v27, %v1532_v30 }
 0x45d   : > { %v7067_v34 = vpop.f32.mrf.mxu0 }
 0x45e   : > { %1575 = vst.msk [vmem:[#allocation3 + $0x12] sm:$0x7] %vm1574_vm8, %v8119_v32  ;;  %v8123_v35 = vmul.f32 %v1552_v31, %v1533_v33 }
 0x45f   : > { %v1535_v36 = vpop.f32.mrf.mxu0 }
 0x460   : > { %1572 = vst.msk [vmem:[#allocation3 + $0x2] sm:$0xff] %vm1567_vm7, %v8123_v35  ;;  %v1536_v37 = vadd.f32 %v6411_v27, %v1535_v36  ;;  %v6451_v27 = vld [vmem:[%s7944_s30] ss:$0 sm:$0xff] }
 0x462   : > { %v8127_v38 = vmul.f32 %v1557_v26, %v1536_v37 }
 0x464   : > { %1573 = vst.msk [vmem:[#allocation3 + $0xa] sm:$0xff] %vm1567_vm7, %v8127_v38 }
 0x465   : > { %v1729_v58 = vld [vmem:[#allocation3 + $0x12] sm:$0x7] }
 0x466   : > { %v1808_v59 = vld [vmem:[#allocation3 + $0x13] sm:$0x7]  ;;  %v1731_v62 = vpack.c.bf16 %v1729_v58, %v1729_v58 }
 0x467   : > { %v1585_v39 = vld [vmem:[#allocation3 + $0x1] sm:$0xff]  ;;  %v1810_v1 = vpack.c.bf16 %v1808_v59, %v1808_v59  ;;  %v1887_v3 = vld [vmem:[#allocation3 + $0x14] sm:$0x7] }
 0x468   : > { %v1576_v40 = vld [vmem:[#allocation3] sm:$0xff]  ;;  %v1889_v12 = vpack.c.bf16 %v1887_v3, %v1887_v3 }
 0x469   : > { %v1727_v51 = vld [vmem:[#allocation3 + $0x2] sm:$0xff] }
 0x46b   : > { %v1586_v41 = vld [vmem:[#allocation3 + $0x9] sm:$0xff]  ;;  %v1587_v43 = vld [vmem:[#allocation3 + $0x11] sm:$0x7] }
 0x46c   : > { %v1577_v42 = vld [vmem:[#allocation3 + $0x8] sm:$0xff]  ;;  %v1588_v44 = vpack.c.bf16 %v1586_v41, %v1585_v39  ;;  %v1589_v46 = vpack.c.bf16 %v1587_v43, %v1587_v43  ;;  %v1578_v47 = vld [vmem:[#allocation3 + $0x10] sm:$0x7] }
 0x46d   : > { %v1579_v45 = vpack.c.bf16 %v1577_v42, %v1576_v40  ;;  %v1728_v48 = vld [vmem:[#allocation3 + $0xa] sm:$0xff]  ;;  %v1580_v50 = vpack.c.bf16 %v1578_v47, %v1578_v47 }
 0x46e   : > { %v1806_v49 = vld [vmem:[#allocation3 + $0x3] sm:$0xff]  ;;  %v1807_v52 = vld [vmem:[#allocation3 + $0xb] sm:$0xff]  ;;  %7072 = vmatprep.mubr.msk.bf16.mxu1 %vm1567_vm7, %v1588_v44  ;;  %v1730_v53 = vpack.c.bf16 %v1728_v48, %v1727_v51 }
 0x46f   : > { %7080 = vmatprep.mubr.msk.bf16.mxu0 %vm1567_vm7, %v1579_v45  ;;  %7073 = vmatmul.mubr.msk.bf16.vlgmr.msra.gmra.mxu1 %vm1567_vm7, %v1589_v46  ;;  %v1809_v56 = vpack.c.bf16 %v1807_v52, %v1806_v49  ;;  %v1885_v60 = vld [vmem:[#allocation3 + $0x4] sm:$0xff]  ;;  %v1886_v61 = vld [vmem:[#allocation3 + $0xc] sm:$0xff] }
 0x470   : > { %7081 = vmatmul.mubr.msk.bf16.vlgmr.msra.gmra.mxu0 %vm1567_vm7, %v1580_v50  ;;  %7085 = vmatpush3.bf16.msra.mxu1 %v7598_v24  ;;  %v1888_v2 = vpack.c.bf16 %v1886_v61, %v1885_v60 }
 0x471   : > { %7088 = vmatprep.mubr.msk.bf16.mxu1 %vm1567_vm7, %v1730_v53  ;;  %7093 = vmatpush3.bf16.msra.mxu0 %v7599_v25 }
 0x472   : > { %7096 = vmatprep.mubr.msk.bf16.mxu0 %vm1567_vm7, %v1809_v56  ;;  %7086 = vmatprep.subr.bf16.mxu1 %v7600_v54 }
 0x473   : > { %7094 = vmatprep.subr.bf16.mxu0 %v7601_v55 }
 0x474   : > { %7087 = vmatpush3.bf16.msra.mxu1 %v7600_v54 }
 0x475   : > { %7095 = vmatpush3.bf16.msra.mxu0 %v7601_v55  ;;  %7100 = vmatprep.subr.bf16.mxu1 %v7602_v57 }
 0x477   : > { %7089 = vmatmul.mubr.msk.bf16.vlgmr.msra.gmra.mxu1 %vm1567_vm7, %v1731_v62 }
 0x478   : > { %7097 = vmatmul.mubr.msk.bf16.vlgmr.msra.gmra.mxu0 %vm1567_vm7, %v1810_v1  ;;  %7101 = vmatpush3.bf16.msra.mxu1 %v7602_v57 }
 0x479   : > { %7104 = vmatprep.mubr.msk.bf16.mxu1 %vm1567_vm7, %v1888_v2  ;;  %7102 = vmatprep.subr.bf16.mxu1 %v7603_v63 }
 0x47c   : > { %7103 = vmatpush3.bf16.msra.mxu1 %v7603_v63 }
 0x47f   : > { %7105 = vmatmul.mubr.msk.bf16.vlgmr.msra.gmra.mxu1 %vm1567_vm7, %v1889_v12 }
 0x52f   : > { %v7074_v4 = vpop.f32.mrf.mxu1 }
 0x530   : > { %v7082_v5 = vpop.f32.mrf.mxu0 }
 0x531   : > { %v1647_v6 = vpop.f32.mrf.mxu1  ;;  %v1722_v14 = vadd.f32 %v7082_v5, %v7074_v4 }
 0x532   : > { %v1713_v7 = vpop.f32.mrf.mxu0 }
 0x533   : > { %v7075_v8 = vpop.f32.mrf.mxu1  ;;  %v1714_v17 = vadd.f32 %v1713_v7, %v1647_v6 }
 0x534   : > { %v7083_v9 = vpop.f32.mrf.mxu0 }
 0x535   : > { %v1650_v10 = vpop.f32.mrf.mxu1 }
 0x536   : > { %v1716_v11 = vpop.f32.mrf.mxu0 }
 0x537   : > { %v7090_v13 = vpop.f32.mrf.mxu1  ;;  %v1717_v24 = vadd.f32 %v1716_v11, %v1650_v10 }
 0x538   : > { %v7098_v15 = vpop.f32.mrf.mxu0  ;;  %v1805_v18 = vadd.f32 %v7090_v13, %v1722_v14  ;;  %v7604_v13 = vld [vmem:[%s7964_s27 + $0x8] sm:$0xff]  }
 0x539   : > { %v1789_v16 = vpop.f32.mrf.mxu1  ;;  %v7605_v14 = vld [vmem:[%s7959_s20 + $0x8] sm:$0xff]   ;;  %7116 = vmatprep.subr.bf16.mxu1 %v7604_v13 }
 0x53a   : > { %v1868_v19 = vpop.f32.mrf.mxu0  ;;  %v1803_v21 = vadd.f32 %v1789_v16, %v1714_v17  ;;  %v1884_v25 = vadd.f32 %v7098_v15, %v1805_v18  ;;  %7108 = vmatprep.subr.bf16.mxu0 %v7605_v14  ;;  %7117 = vmatpush3.bf16.msra.mxu1 %v7604_v13  ;;  %v7606_v15 = vld [vmem:[%s7964_s27] sm:$0xff]   ;;  %v7608_v17 = vld [vmem:[%s8730_s2 + $0x8] sm:$0xff]  }
 0x53b   : > { %v7091_v20 = vpop.f32.mrf.mxu1  ;;  %7109 = vmatpush3.bf16.msra.mxu0 %v7605_v14  ;;  %v7607_v16 = vld [vmem:[%s7959_s20] sm:$0xff]   ;;  %7118 = vmatprep.subr.bf16.mxu1 %v7606_v15 }
 0x53c   : > { %v7099_v22 = vpop.f32.mrf.mxu0  ;;  %v1882_v0 = vadd.f32 %v1868_v19, %v1803_v21  ;;  %7110 = vmatprep.subr.bf16.mxu0 %v7607_v16 }
 0x53d   : > { %v1792_v23 = vpop.f32.mrf.mxu1 }
 0x53e   : > { %v1804_v28 = vadd.f32 %v1792_v23, %v1717_v24  ;;  %v1871_v34 = vpop.f32.mrf.mxu0  ;;  %7119 = vmatpush3.bf16.msra.mxu1 %v7606_v15 }
 0x53f   : > { %v7106_v26 = vpop.f32.mrf.mxu1  ;;  %7111 = vmatpush3.bf16.msra.mxu0 %v7607_v16 }
 0x540   : > { %v1963_v29 = vadd.f32 %v7106_v26, %v1884_v25  ;;  %v1883_v37 = vadd.f32 %v1871_v34, %v1804_v28  ;;  %7124 = vmatprep.subr.bf16.mxu0 %v7608_v17  ;;  %v6452_v28 = vld [vmem:[%s8731_s7] ss:$0 sm:$0xff]  ;;  %s8739_s7 = sld [smem:[#allocation16_spill]] }
 0x541   : > { %v1947_v30 = vpop.f32.mrf.mxu1 }
 0x542   : > { %v1973_v31 = vadd.f32 %v6451_v27, %v1963_v29  ;;  %v1961_v33 = vadd.f32 %v1947_v30, %v1882_v0 }
 0x543   : > { %v7107_v36 = vpop.f32.mrf.mxu1 }
 0x544   : > { %v1979_v39 = vmul.f32 0.70710677, %v1973_v31  ;;  %v1971_v40 = vadd.f32 %v6451_v27, %v1961_v33  ;;  %v1976_v49 = vmul.f32 0.5, %v1973_v31  ;;  %v6453_v33 = vld [vmem:[%s8732_s10] ss:$0 sm:$0xff]  ;;  %s8740_s10 = sld [smem:[#allocation14_spill]] }
 0x545   : > { %v1950_v41 = vpop.f32.mrf.mxu1 }
 0x546   : > { %7688 = verf.f32 %v1979_v39  ;;  %v1977_v42 = vmul.f32 0.70710677, %v1971_v40  ;;  %v1962_v43 = vadd.f32 %v1950_v41, %v1883_v37  ;;  %v1974_v50 = vmul.f32 0.5, %v1971_v40 }
 0x548   : > { %7690 = verf.f32 %v1977_v42  ;;  %v1972_v44 = vadd.f32 %v6451_v27, %v1962_v43 }
 0x54a   : > { %v1978_v45 = vmul.f32 0.70710677, %v1972_v44  ;;  %v1975_v55 = vmul.f32 0.5, %v1972_v44 }
 0x54c   : > { %7692 = verf.f32 %v1978_v45  ;;  %v7609_v45 = vld [vmem:[%s8730_s2] sm:$0xff]  }
 0x553   : > { %v7689_v46 = vpop.eup %7688 }
 0x554   : > { %v1985_v47 = vadd.f32 1.0, %v7689_v46  ;;  %v6460_v46 = vld [vmem:[%s8733_s11] ss:$0 sm:$0xff] }
 0x555   : > { %v7691_v48 = vpop.eup %7690 }
 0x556   : > { %v1983_v51 = vadd.f32 1.0, %v7691_v48  ;;  %v1988_v53 = vmul.f32 %v1985_v47, %v1976_v49 }
 0x558   : > { %v1986_v52 = vmul.f32 %v1983_v51, %v1974_v50  ;;  %v1991_v60 = vadd.f32 %v1988_v53, %v8119_v32  ;;  %v6455_v53 = vld [vmem:[%s8734_s15] ss:$0 sm:$0xff] }
 0x559   : > { %v7693_v54 = vpop.eup %7692 }
 0x55a   : > { %v1989_v56 = vadd.f32 %v1986_v52, %v8123_v35  ;;  %v1984_v57 = vadd.f32 1.0, %v7693_v54  ;;  %v2000_v63 = vsel %vm1574_vm8, %v1991_v60, 0.0 }
 0x55c   : > { %v1994_v58 = vsel %vm1567_vm7, %v1989_v56, 0.0  ;;  %v1987_v59 = vmul.f32 %v1984_v57, %v1975_v55 }
 0x55d   : > { %1995 = vadd.xlane.f32.xlu1 %v1994_v58 }
 0x55e   : > { %v1990_v61 = vadd.f32 %v1987_v59, %v8127_v38 }
 0x560   : > { %v1997_v62 = vsel %vm1567_vm7, %v1990_v61, 0.0 }
 0x561   : > { %1998 = vadd.xlane.f32.xlu0 %v1997_v62  ;;  %2001 = vadd.xlane.f32.xlu1 %v2000_v63 }
 0x5e6   : > { %v1996_v1 = vpop.xlane.xlu1 %1995 }
 0x5e7   : > { %v2004_v2 = vmul.f32 0.03125, %v1996_v1  ;;  %v7875_v1 = vmov 65535  }
 0x5e9   : > { %v2007_v3 = vsub.f32 %v1989_v56, %v2004_v2  ;;  %v2395_v2 = vsel %vm2393_vm10, 4294967295, %v7875_v1 }
 0x5ea   : > { %v1999_v35 = vpop.xlane.xlu0 %1998  ;;  %v2002_v12 = vpop.xlane.xlu1 %2001 }
 0x5eb   : > { %v2005_v4 = vmul.f32 0.03125, %v1999_v35  ;;  %v2006_v5 = vmul.f32 0.03125, %v2002_v12  ;;  %v2010_v6 = vmul.f32 %v2007_v3, %v2007_v3 }
 0x5ed   : > { %v2008_v32 = vsub.f32 %v1990_v61, %v2005_v4  ;;  %v2009_v7 = vsub.f32 %v1991_v60, %v2006_v5  ;;  %v2013_v38 = vsel %vm1567_vm7, %v2010_v6, 0.0  ;;  %v6465_v60 = vld [vmem:[%s8735_s16] ss:$0 sm:$0xff]  ;;  %v8194_v6 = vsel %vm2394_vm11, %v2395_v2, 0 }
 0x5ee   : > { %2014 = vadd.xlane.f32.xlu1 %v2013_v38 }
 0x5ef   : > { %v2011_v8 = vmul.f32 %v2008_v32, %v2008_v32  ;;  %v2012_v10 = vmul.f32 %v2009_v7, %v2009_v7 }
 0x5f1   : > { %v2016_v9 = vsel %vm1567_vm7, %v2011_v8, 0.0  ;;  %v2019_v11 = vsel %vm1574_vm8, %v2012_v10, 0.0 }
 0x5f2   : > { %2017 = vadd.xlane.f32.xlu1 %v2016_v9  ;;  %v7610_v9 = vld [vmem:[%s7964_s27 + $0x18] sm:$0xff]  }
 0x5f6   : > { %2020 = vadd.xlane.f32.xlu1 %v2019_v11 }
 0x677   : > { %v2015_v18 = vpop.xlane.xlu1 %2014 }
 0x678   : > { %v2022_v19 = vmul.f32 0.03125, %v2015_v18 }
 0x67a   : > { %v2025_v20 = vadd.f32 1e-05, %v2022_v19 }
 0x67b   : > { %v2018_v21 = vpop.xlane.xlu1 %2017 }
 0x67c   : > { %7694 = vrsqrt.f32 %v2025_v20  ;;  %v2023_v22 = vmul.f32 0.03125, %v2018_v21  ;;  %v7611_v20 = vld [vmem:[%s7964_s27 + $0x10] sm:$0xff]  }
 0x67e   : > { %v2026_v23 = vadd.f32 1e-05, %v2023_v22  ;;  %v8212_v22 = vld [vmem:[%s8209_s0] ss:$0 sm:$0xff] }
 0x67f   : > { %v2021_v24 = vpop.xlane.xlu1 %2020 }
 0x680   : > { %7696 = vrsqrt.f32 %v2026_v23  ;;  %v2024_v25 = vmul.f32 0.03125, %v2021_v24 }
 0x682   : > { %v2027_v26 = vadd.f32 1e-05, %v2024_v25 }
 0x684   : > { %7698 = vrsqrt.f32 %v2027_v26 }
 0x689   : > { %v7695_v27 = vpop.eup %7694 }
 0x68a   : > { %v2031_v0 = vmul.f32 %v7695_v27, %v2007_v3 }
 0x68c   : > { %v2040_v30 = vmul.f32 %v6452_v28, %v2031_v0 }
 0x68d   : > { %v7697_v29 = vpop.eup %7696 }
 0x68e   : > { %v2032_v31 = vmul.f32 %v7697_v29, %v2008_v32  ;;  %v8162_v37 = vadd.f32 %v6453_v33, %v2040_v30 }
 0x690   : > { %v2041_v34 = vmul.f32 %v6452_v28, %v2032_v31 }
 0x691   : > { %v7699_v36 = vpop.eup %7698 }
 0x692   : > { %v8164_v39 = vadd.f32 %v6453_v33, %v2041_v34  ;;  %v2033_v40 = vmul.f32 %v7699_v36, %v2009_v7 }
 0x694   : > { %v8168_v41 = vpack.c.bf16 %v8164_v39, %v8162_v37  ;;  %v2042_v42 = vmul.f32 %v6452_v28, %v2033_v40  ;;  %v6489_v28 = vld [vmem:[%s8733_s11 + $0x1] ss:$0 sm:$0xff] }
 0x696   : > { %v8170_v43 = vadd.f32 %v6453_v33, %v2042_v42  ;;  %7112 = vmatprep.mubr.msk.bf16.mxu0 %vm1567_vm7, %v8168_v41  ;;  %7120 = vmatprep.mubr.msk.bf16.mxu1 %vm1567_vm7, %v8168_v41 }
 0x698   : > { %v8178_v44 = vpack.c.bf16 %v8170_v43, %v8170_v43 }
 0x69a   : > { %7113 = vmatmul.mubr.msk.bf16.vlgmr.msra.gmra.mxu0 %vm1567_vm7, %v8178_v44  ;;  %7121 = vmatmul.mubr.msk.bf16.vlgmr.msra.gmra.mxu1 %vm1567_vm7, %v8178_v44 }
 0x69b   : > { %7125 = vmatpush3.bf16.msra.mxu0 %v7608_v17  ;;  %7128 = vmatprep.mubr.msk.bf16.mxu0 %vm1567_vm7, %v8168_v41 }
 0x69c   : > { %7126 = vmatprep.subr.bf16.mxu0 %v7609_v45 }
 0x69f   : > { %7127 = vmatpush3.bf16.msra.mxu0 %v7609_v45 }
 0x6a2   : > { %7129 = vmatmul.mubr.msk.bf16.vlgmr.msra.gmra.mxu0 %vm1567_vm7, %v8178_v44 }
 0x75a   : > { %v7114_v47 = vpop.f32.mrf.mxu0  ;;  %v7122_v48 = vpop.f32.mrf.mxu1 }
 0x75b   : > { %v2204_v49 = vadd.f32 %v7122_v48, %v6460_v46  ;;  %v2133_v7 = vadd.f32 %v7114_v47, %v6455_v53 }
 0x75c   : > { %v2124_v50 = vpop.f32.mrf.mxu0  ;;  %v2195_v51 = vpop.f32.mrf.mxu1 }
 0x75d   : > { %v2286_v52 = vpack.c.bf16 %v2204_v49, %v2204_v49  ;;  %v2125_v57 = vadd.f32 %v6455_v53, %v2124_v50  ;;  %v2196_v61 = vadd.f32 %v6460_v46, %v2195_v51  ;;  %v2282_v15 = vmul.f32 0.35355338, %v2133_v7 }
 0x75e   : > { %v7115_v54 = vpop.f32.mrf.mxu0  ;;  %v7123_v55 = vpop.f32.mrf.mxu1 }
 0x75f   : > { %v2298_v56 = vsel %vm2287_vm9, %v2286_v52, 0  ;;  %7518 = vmatprep.subr.msk.bf16.mxu1 %vm2287_vm9, %v2286_v52  ;;  %v2280_v35 = vmul.f32 0.35355338, %v2125_v57  ;;  %v2284_v19 = vpack.c.bf16 %v2282_v15, %v2282_v15  ;;  %v7615_v15 = vld [vmem:[%s8730_s2 + $0x10] sm:$0xff]  }
 0x760   : > { %v2127_v58 = vpop.f32.mrf.mxu0  ;;  %v2198_v59 = vpop.f32.mrf.mxu1  ;;  %7133 = vmatpush3.bf16.xpose.msra.mxu1 %v2298_v56 }
 0x761   : > { %v2128_v62 = vadd.f32 %v6455_v53, %v2127_v58  ;;  %v2199_v63 = vadd.f32 %v6460_v46, %v2198_v59 }
 0x762   : > { %v7130_v3 = vpop.f32.mrf.mxu0 }
 0x763   : > { %v2281_v12 = vmul.f32 0.35355338, %v2128_v62  ;;  %v2285_v4 = vpack.c.bf16 %v2199_v63, %v2196_v61  ;;  %v2275_v5 = vadd.f32 %v7130_v3, %v6465_v60  ;;  %v7612_v3 = vld [vmem:[%s7959_s20 + $0x18] sm:$0xff]  }
 0x764   : > { %v2266_v32 = vpop.f32.mrf.mxu0 }
 0x765   : > { %v2283_v38 = vpack.c.bf16 %v2281_v12, %v2280_v35  ;;  %v2386_v8 = vpack.c.bf16 %v2275_v5, %v2275_v5  ;;  %7519 = vmatprep.subr.msk.bf16.mxu1 %vm2287_vm9, %v2285_v4  ;;  %v2295_v13 = vsel %vm2287_vm9, %v2285_v4, 0  ;;  %v2267_v16 = vadd.f32 %v6465_v60, %v2266_v32 }
 0x766   : > { %v7131_v10 = vpop.f32.mrf.mxu0 }
 0x767   : > { %v2398_v11 = vand.u32 %v8194_v6, %v2386_v8  ;;  %7136 = vmatprep.mubr.msk.bf16.mxu1 %vm2287_vm9, %v2283_v38 }
 0x768   : > { %v2269_v14 = vpop.f32.mrf.mxu0  ;;  %7135 = vmatpush3.bf16.xpose.msra.mxu1 %v2295_v13  ;;  %v7613_v13 = vld [vmem:[%s7959_s20 + $0x10] sm:$0xff]  }
 0x769   : > { %v2270_v17 = vadd.f32 %v6465_v60, %v2269_v14  ;;  %7140 = vmatprep.subr.bf16.mxu0 %v2398_v11  ;;  %7156 = vmatprep.subr.bf16.mxu1 %v7610_v9  ;;  %v7614_v14 = vld [vmem:[%s8730_s2 + $0x18] sm:$0xff]  }
 0x76a   : > { %7141 = vmatpush3.bf16.msra.mxu0 %v2398_v11 }
 0x76b   : > { %v2385_v18 = vpack.c.bf16 %v2270_v17, %v2267_v16  ;;  %v2450_v16 = vld [vmem:[%s8737_s26] sm:$0xf] }
 0x76d   : > { %7142 = vmatprep.subr.bf16.mxu0 %v2385_v18 }
 0x76e   : > { %7143 = vmatpush3.bf16.msra.mxu0 %v2385_v18 }
 0x76f   : > { %7137 = vmatmul.mubr.msk.bf16.vlgmr.msra.gmra.mxu1 %vm2287_vm9, %v2284_v19  ;;  %7148 = vmatprep.subr.bf16.mxu0 %v7612_v3 }
 0x770   : > { %7157 = vmatpush3.bf16.msra.mxu1 %v7610_v9  ;;  %7160 = vmatprep.mubr.msk.bf16.mxu1 %vm1567_vm7, %v8168_v41 }
 0x771   : > { %7158 = vmatprep.subr.bf16.mxu1 %v7611_v20 }
 0x774   : > { %7159 = vmatpush3.bf16.msra.mxu1 %v7611_v20 }
 0x777   : > { %7161 = vmatmul.mubr.msk.bf16.vlgmr.msra.gmra.mxu1 %vm1567_vm7, %v8178_v44 }
 0x82f   : > { %v7138_v21 = vpop.f32.mrf.mxu1 }
 0x830   : > { %v2343_v26 = vadd.f32 %v7138_v21, %v8212_v22 }
 0x831   : > { %v2334_v23 = vpop.f32.mrf.mxu1 }
 0x832   : > { %v2335_v24 = vadd.f32 %v8212_v22, %v2334_v23  ;;  %v2356_v34 = vsel %vm2355_vm13, %v2343_v26, -inf  ;;  %v6479_v23 = vld [vmem:[%s8734_s15 + $0x1] ss:$0 sm:$0xff] }
 0x833   : > { %v7139_v25 = vpop.f32.mrf.mxu1 }
 0x834   : > { %v2349_v27 = vsel %vm2348_vm12, %v2335_v24, -inf }
 0x835   : > { %v2337_v0 = vpop.f32.mrf.mxu1  ;;  %2350 = vmax.xlane.f32.xlu1 %v2349_v27 }
 0x836   : > { %v2338_v29 = vadd.f32 %v8212_v22, %v2337_v0 }
 0x837   : > { %v7162_v30 = vpop.f32.mrf.mxu1 }
 0x838   : > { %v2592_v31 = vadd.f32 %v7162_v30, %v6489_v28  ;;  %v2352_v33 = vsel %vm2348_vm12, %v2338_v29, -inf }
 0x839   : > { %v2583_v36 = vpop.f32.mrf.mxu1  ;;  %2353 = vmax.xlane.f32.xlu0 %v2352_v33  ;;  %2357 = vmax.xlane.f32.xlu1 %v2356_v34 }
 0x83a   : > { %v2676_v40 = vpack.c.bf16 %v2592_v31, %v2592_v31  ;;  %v2584_v47 = vadd.f32 %v6489_v28, %v2583_v36 }
 0x83b   : > { %v7163_v42 = vpop.f32.mrf.mxu1 }
 0x83c   : > { %v2687_v45 = vsel %vm2287_vm9, %v2676_v40, 0  ;;  %7520 = vmatprep.subr.msk.bf16.mxu1 %vm2287_vm9, %v2676_v40 }
 0x83d   : > { %v2586_v46 = vpop.f32.mrf.mxu1  ;;  %7173 = vmatpush3.bf16.xpose.msra.mxu1 %v2687_v45 }
 0x83e   : > { %v2587_v48 = vadd.f32 %v6489_v28, %v2586_v46  ;;  %v6499_v28 = vld [vmem:[%s8735_s16 + $0x1] ss:$0 sm:$0xff] }
 0x840   : > { %v2675_v49 = vpack.c.bf16 %v2587_v48, %v2584_v47 }
 0x842   : > { %7521 = vmatprep.subr.msk.bf16.mxu1 %vm2287_vm9, %v2675_v49  ;;  %v2684_v50 = vsel %vm2287_vm9, %v2675_v49, 0 }
 0x845   : > { %7175 = vmatpush3.bf16.xpose.msra.mxu1 %v2684_v50  ;;  %v2900_v50 = vsel %vm2841_vm14, %v2450_v16, 0 }
 0x846   : > { %7523 = vmatprep.subr.msk.bf16.mxu1 %vm2841_vm14, %v2450_v16 }
 0x8be   : > { %v2351_v51 = vpop.xlane.xlu1 %2350 }
 0x8bf   : > { %v2359_v52 = vsub.f32 %v2335_v24, %v2351_v51  ;;  %v7616_v51 = vld [vmem:[%s7964_s27 + $0x28] sm:$0xff]  }
 0x8c1   : > { %v2362_v53 = vmul.f32 1.442695, %v2359_v52 }
 0x8c2   : > { %v2354_v54 = vpop.xlane.xlu0 %2353  ;;  %v2358_v55 = vpop.xlane.xlu1 %2357 }
 0x8c3   : > { %7700 = vpow2.f32 %v2362_v53  ;;  %v2360_v56 = vsub.f32 %v2338_v29, %v2354_v54  ;;  %v2361_v57 = vsub.f32 %v2343_v26, %v2358_v55 }
 0x8c5   : > { %v2364_v58 = vmul.f32 1.442695, %v2360_v56  ;;  %v2366_v59 = vmul.f32 1.442695, %v2361_v57  ;;  %v7617_v57 = vld [vmem:[%s7964_s27 + $0x20] sm:$0xff]  }
 0x8c7   : > { %7702 = vpow2.f32 %v2364_v58 }
 0x8c8   : > { %7704 = vpow2.f32 %v2366_v59 }
 0x8d0   : > { %v7701_v60 = vpop.eup %7700 }
 0x8d1   : > { %v2368_v61 = vsel %vm2348_vm12, %v7701_v60, 0.0 }
 0x8d2   : > { %2369 = vadd.xlane.f32.xlu0 %v2368_v61 }
 0x8d4   : > { %v7703_v62 = vpop.eup %7702 }
 0x8d5   : > { %v7705_v63 = vpop.eup %7704  ;;  %v2371_v1 = vsel %vm2348_vm12, %v7703_v62, 0.0 }
 0x8d6   : > { %2372 = vadd.xlane.f32.xlu1 %v2371_v1  ;;  %v2374_v2 = vsel %vm2355_vm13, %v7705_v63, 0.0 }
 0x8d7   : > { %2375 = vadd.xlane.f32.xlu0 %v2374_v2 }
 0x95b   : > { %v2370_v35 = vpop.xlane.xlu0 %2369 }
 0x95c   : > { %7706 = vrcp.f32 %v2370_v35 }
 0x95f   : > { %v2373_v12 = vpop.xlane.xlu1 %2372 }
 0x960   : > { %v2376_v4 = vpop.xlane.xlu0 %2375  ;;  %7708 = vrcp.f32 %v2373_v12 }
 0x961   : > { %7710 = vrcp.f32 %v2376_v4 }
 0x969   : > { %v7707_v5 = vpop.eup %7706 }
 0x96a   : > { %v2380_v38 = vmul.f32 %v7707_v5, %v7701_v60 }
 0x96d   : > { %v7709_v32 = vpop.eup %7708 }
 0x96e   : > { %v7711_v7 = vpop.eup %7710  ;;  %v2381_v8 = vmul.f32 %v7709_v32, %v7703_v62 }
 0x96f   : > { %v2382_v9 = vmul.f32 %v7711_v7, %v7705_v63  ;;  %v6528_v7 = vld [vmem:[%s8733_s11 + $0x2] ss:$0 sm:$0xff] }
 0x970   : > { %v2383_v10 = vpack.c.bf16 %v2381_v8, %v2380_v38 }
 0x971   : > { %v2384_v11 = vpack.c.bf16 %v2382_v9, %v2382_v9 }
 0x972   : > { %7144 = vmatprep.mubr.msk.bf16.mxu0 %vm2348_vm12, %v2383_v10 }
 0x973   : > { %7145 = vmatmul.mubr.msk.bf16.vlgmr.msra.gmra.mxu0 %vm2348_vm12, %v2384_v11 }
 0x974   : > { %7149 = vmatpush3.bf16.msra.mxu0 %v7612_v3  ;;  %7152 = vmatprep.mubr.msk.bf16.mxu0 %vm1567_vm7, %v8168_v41 }
 0x975   : > { %7150 = vmatprep.subr.bf16.mxu0 %v7613_v13 }
 0x978   : > { %7151 = vmatpush3.bf16.msra.mxu0 %v7613_v13 }
 0x979   : > { %7164 = vmatprep.subr.bf16.mxu0 %v7614_v14 }
 0x97b   : > { %7153 = vmatmul.mubr.msk.bf16.vlgmr.msra.gmra.mxu0 %vm1567_vm7, %v8178_v44 }
 0x97c   : > { %7165 = vmatpush3.bf16.msra.mxu0 %v7614_v14  ;;  %7168 = vmatprep.mubr.msk.bf16.mxu0 %vm1567_vm7, %v8168_v41 }
 0x97d   : > { %7166 = vmatprep.subr.bf16.mxu0 %v7615_v15 }
 0x980   : > { %7167 = vmatpush3.bf16.msra.mxu0 %v7615_v15 }
 0x983   : > { %7169 = vmatmul.mubr.msk.bf16.vlgmr.msra.gmra.mxu0 %vm1567_vm7, %v8178_v44 }
 0xa33   : > { %v7146_v17 = vpop.f32.mrf.mxu0 }
 0xa34   : > { %v2449_v56 = vpack.c.bf16 %v7146_v17, %v7146_v17 }
 0xa35   : > { %v2434_v18 = vpop.f32.mrf.mxu0 }
 0xa37   : > { %v7147_v19 = vpop.f32.mrf.mxu0 }
 0xa39   : > { %v2437_v20 = vpop.f32.mrf.mxu0 }
 0xa3a   : > { %v2448_v48 = vpack.c.bf16 %v2437_v20, %v2434_v18 }
 0xa3b   : > { %v7154_v21 = vpop.f32.mrf.mxu0 }
 0xa3c   : > { %v2519_v25 = vadd.f32 %v7154_v21, %v6479_v23 }
 0xa3d   : > { %v2510_v24 = vpop.f32.mrf.mxu0 }
 0xa3e   : > { %v2511_v27 = vadd.f32 %v6479_v23, %v2510_v24  ;;  %v2672_v30 = vmul.f32 0.35355338, %v2519_v25 }
 0xa3f   : > { %v7155_v26 = vpop.f32.mrf.mxu0 }
 0xa40   : > { %v2670_v33 = vmul.f32 0.35355338, %v2511_v27  ;;  %v2674_v46 = vpack.c.bf16 %v2672_v30, %v2672_v30 }
 0xa41   : > { %v2513_v0 = vpop.f32.mrf.mxu0 }
 0xa42   : > { %v2514_v29 = vadd.f32 %v6479_v23, %v2513_v0 }
 0xa43   : > { %v7170_v31 = vpop.f32.mrf.mxu0 }
 0xa44   : > { %v2671_v34 = vmul.f32 0.35355338, %v2514_v29  ;;  %v2665_v36 = vadd.f32 %v7170_v31, %v6499_v28 }
 0xa45   : > { %v2656_v40 = vpop.f32.mrf.mxu0 }
 0xa46   : > { %v2673_v42 = vpack.c.bf16 %v2671_v34, %v2670_v33  ;;  %v2773_v45 = vpack.c.bf16 %v2665_v36, %v2665_v36  ;;  %v2657_v53 = vadd.f32 %v6499_v28, %v2656_v40 }
 0xa47   : > { %v7171_v47 = vpop.f32.mrf.mxu0 }
 0xa48   : > { %v2781_v49 = vand.u32 %v2773_v45, %v8194_v6  ;;  %7176 = vmatprep.mubr.msk.bf16.mxu1 %vm2287_vm9, %v2673_v42 }
 0xa49   : > { %v2659_v52 = vpop.f32.mrf.mxu0  ;;  %7177 = vmatmul.mubr.msk.bf16.vlgmr.msra.gmra.mxu1 %vm2287_vm9, %v2674_v46 }
 0xa4a   : > { %v2660_v54 = vadd.f32 %v6499_v28, %v2659_v52  ;;  %7180 = vmatprep.subr.bf16.mxu0 %v2781_v49  ;;  %7196 = vmatprep.mubr.msk.bf16.mxu1 %vm2287_vm9, %v2448_v48 }
 0xa4b   : > { %7181 = vmatpush3.bf16.msra.mxu0 %v2781_v49  ;;  %7195 = vmatpush3.bf16.msra.mxu1 %v2900_v50 }
 0xa4c   : > { %v2772_v55 = vpack.c.bf16 %v2660_v54, %v2657_v53  ;;  %7208 = vmatprep.subr.bf16.mxu1 %v7616_v51  ;;  %v6508_v53 = vld [vmem:[%s8737_s26 + $0x4] sm:$0xf] }
 0xa4d   : > { %v2843_v54 = vsel %vm2841_vm14, %v6508_v53, 0 }
 0xa4e   : > { %7182 = vmatprep.subr.bf16.mxu0 %v2772_v55 }
 0xa4f   : > { %7183 = vmatpush3.bf16.msra.mxu0 %v2772_v55  ;;  %v7618_v55 = vld [vmem:[%s7959_s20 + $0x28] sm:$0xff]  }
 0xa50   : > { %7522 = vmatprep.subr.msk.bf16.mxu0 %vm2841_vm14, %v6508_v53 }
 0xa51   : > { %7197 = vmatmul.mubr.msk.bf16.vlgmr.msra.gmra.mxu1 %vm2287_vm9, %v2449_v56 }
 0xa52   : > { %7209 = vmatpush3.bf16.msra.mxu1 %v7616_v51  ;;  %7212 = vmatprep.mubr.msk.bf16.mxu1 %vm1567_vm7, %v8168_v41 }
 0xa53   : > { %7210 = vmatprep.subr.bf16.mxu1 %v7617_v57 }
 0xa56   : > { %7211 = vmatpush3.bf16.msra.mxu1 %v7617_v57 }
 0xa59   : > { %7213 = vmatmul.mubr.msk.bf16.vlgmr.msra.gmra.mxu1 %vm1567_vm7, %v8178_v44 }
 0xb09   : > { %v7178_v58 = vpop.f32.mrf.mxu1 }
 0xb0a   : > { %v2732_v62 = vadd.f32 %v7178_v58, %v8212_v22 }
 0xb0b   : > { %v2723_v59 = vpop.f32.mrf.mxu1 }
 0xb0c   : > { %v2724_v60 = vadd.f32 %v8212_v22, %v2723_v59  ;;  %v2743_v12 = vsel %vm2355_vm13, %v2732_v62, -inf }
 0xb0d   : > { %v7179_v61 = vpop.f32.mrf.mxu1 }
 0xb0e   : > { %v2737_v63 = vsel %vm2348_vm12, %v2724_v60, -inf }
 0xb0f   : > { %v2726_v1 = vpop.f32.mrf.mxu1  ;;  %2738 = vmax.xlane.f32.xlu1 %v2737_v63  ;;  %v7620_v63 = vld [vmem:[%s8730_s2 + $0x28] sm:$0xff]  }
 0xb10   : > { %v2727_v2 = vadd.f32 %v8212_v22, %v2726_v1  ;;  %v7621_v1 = vld [vmem:[%s8730_s2 + $0x20] sm:$0xff]  }
 0xb11   : > { %v8262_v3 = vpop.f32.mrf.mxu1 }
 0xb12   : > { %v2740_v35 = vsel %vm2348_vm12, %v2727_v2, -inf }
 0xb13   : > { %2741 = vmax.xlane.f32.xlu0 %v2740_v35  ;;  %2744 = vmax.xlane.f32.xlu1 %v2743_v12  ;;  %v8266_v4 = vpop.f32.mrf.mxu1 }
 0xb15   : > { %v7199_v5 = vpop.f32.mrf.mxu1 }
 0xb17   : > { %v8268_v32 = vpop.f32.mrf.mxu1 }
 0xb19   : > { %v7214_v38 = vpop.f32.mrf.mxu1 }
 0xb1a   : > { %v3091_v8 = vadd.f32 %v7214_v38, %v6528_v7 }
 0xb1b   : > { %v3082_v9 = vpop.f32.mrf.mxu1 }
 0xb1c   : > { %v3175_v10 = vpack.c.bf16 %v3091_v8, %v3091_v8  ;;  %v3083_v15 = vadd.f32 %v6528_v7, %v3082_v9  ;;  %v6518_v8 = vld [vmem:[%s8734_s15 + $0x2] ss:$0 sm:$0xff] }
 0xb1d   : > { %v7215_v11 = vpop.f32.mrf.mxu1 }
 0xb1e   : > { %v3186_v13 = vsel %vm2287_vm9, %v3175_v10, 0  ;;  %7524 = vmatprep.subr.msk.bf16.mxu1 %vm2287_vm9, %v3175_v10 }
 0xb1f   : > { %v3085_v14 = vpop.f32.mrf.mxu1  ;;  %7225 = vmatpush3.bf16.xpose.msra.mxu1 %v3186_v13 }
 0xb20   : > { %v3086_v16 = vadd.f32 %v6528_v7, %v3085_v14 }
 0xb22   : > { %v3174_v17 = vpack.c.bf16 %v3086_v16, %v3083_v15  ;;  %v6538_v15 = vld [vmem:[%s8735_s16 + $0x2] ss:$0 sm:$0xff] }
 0xb24   : > { %7525 = vmatprep.subr.msk.bf16.mxu1 %vm2287_vm9, %v3174_v17  ;;  %v3183_v18 = vsel %vm2287_vm9, %v3174_v17, 0 }
 0xb27   : > { %7227 = vmatpush3.bf16.xpose.msra.mxu1 %v3183_v18 }
 0xb98   : > { %v2739_v19 = vpop.xlane.xlu1 %2738 }
 0xb99   : > { %v2746_v20 = vsub.f32 %v2724_v60, %v2739_v19 }
 0xb9b   : > { %v2749_v21 = vmul.f32 1.442695, %v2746_v20 }
 0xb9c   : > { %v2742_v23 = vpop.xlane.xlu0 %2741  ;;  %v2745_v24 = vpop.xlane.xlu1 %2744 }
 0xb9d   : > { %7712 = vpow2.f32 %v2749_v21  ;;  %v2747_v25 = vsub.f32 %v2727_v2, %v2742_v23  ;;  %v2748_v26 = vsub.f32 %v2732_v62, %v2745_v24  ;;  %v7619_v62 = vld [vmem:[%s7959_s20 + $0x20] sm:$0xff]   ;;  %v7622_v2 = vld [vmem:[%s7959_s20 + $0x38] sm:$0xff]  }
 0xb9e   : > { %7246 = vmatprep.subr.bf16.mxu1 %v7622_v2 }
 0xb9f   : > { %v2751_v27 = vmul.f32 1.442695, %v2747_v25  ;;  %v2753_v0 = vmul.f32 1.442695, %v2748_v26 }
 0xba1   : > { %7714 = vpow2.f32 %v2751_v27 }
 0xba2   : > { %7716 = vpow2.f32 %v2753_v0 }
 0xbaa   : > { %v7713_v28 = vpop.eup %7712 }
 0xbab   : > { %v2755_v29 = vsel %vm2348_vm12, %v7713_v28, 0.0 }
 0xbac   : > { %2756 = vadd.xlane.f32.xlu0 %v2755_v29 }
 0xbae   : > { %v7715_v30 = vpop.eup %7714 }
 0xbaf   : > { %v7717_v31 = vpop.eup %7716  ;;  %v2758_v33 = vsel %vm2348_vm12, %v7715_v30, 0.0 }
 0xbb0   : > { %2759 = vadd.xlane.f32.xlu1 %v2758_v33  ;;  %v2761_v34 = vsel %vm2355_vm13, %v7717_v31, 0.0  ;;  %v7624_v33 = vld [vmem:[%s8730_s2 + $0x38] sm:$0xff]  }
 0xbb1   : > { %2762 = vadd.xlane.f32.xlu0 %v2761_v34 }
 0xc35   : > { %v2757_v36 = vpop.xlane.xlu0 %2756 }
 0xc36   : > { %7718 = vrcp.f32 %v2757_v36  ;;  %v7625_v36 = vld [vmem:[%s8730_s2 + $0x30] sm:$0xff]  }
 0xc39   : > { %v2760_v40 = vpop.xlane.xlu1 %2759 }
 0xc3a   : > { %v2763_v42 = vpop.xlane.xlu0 %2762  ;;  %7720 = vrcp.f32 %v2760_v40 }
 0xc3b   : > { %7722 = vrcp.f32 %v2763_v42 }
 0xc43   : > { %v7719_v45 = vpop.eup %7718 }
 0xc44   : > { %v2767_v48 = vmul.f32 %v7719_v45, %v7713_v28  ;;  %v7623_v28 = vld [vmem:[%s7959_s20 + $0x30] sm:$0xff]  }
 0xc47   : > { %v7721_v46 = vpop.eup %7720 }
 0xc48   : > { %v7723_v47 = vpop.eup %7722  ;;  %v2768_v49 = vmul.f32 %v7721_v46, %v7715_v30 }
 0xc49   : > { %v2769_v50 = vmul.f32 %v7723_v47, %v7717_v31 }
 0xc4a   : > { %v2770_v51 = vpack.c.bf16 %v2768_v49, %v2767_v48 }
 0xc4b   : > { %v2771_v52 = vpack.c.bf16 %v2769_v50, %v2769_v50  ;;  %v6555_v50 = vld [vmem:[%s8734_s15 + $0x3] ss:$0 sm:$0xff] }
 0xc4c   : > { %7184 = vmatprep.mubr.msk.bf16.mxu0 %vm2348_vm12, %v2770_v51 }
 0xc4d   : > { %7185 = vmatmul.mubr.msk.bf16.vlgmr.msra.gmra.mxu0 %vm2348_vm12, %v2771_v52 }
 0xc4e   : > { %7189 = vmatpush3.bf16.msra.mxu0 %v2843_v54 }
 0xc4f   : > { %7200 = vmatprep.subr.bf16.mxu0 %v7618_v55 }
 0xd0d   : > { %v7186_v56 = vpop.f32.mrf.mxu0 }
 0xd0e   : > { %v2832_v61 = vpack.c.bf16 %v7186_v56, %v7186_v56 }
 0xd0f   : > { %v2817_v57 = vpop.f32.mrf.mxu0 }
 0xd11   : > { %v7187_v58 = vpop.f32.mrf.mxu0 }
 0xd13   : > { %v2820_v59 = vpop.f32.mrf.mxu0 }
 0xd14   : > { %v2831_v60 = vpack.c.bf16 %v2820_v59, %v2817_v57 }
 0xd16   : > { %7190 = vmatprep.mubr.msk.bf16.mxu0 %vm2287_vm9, %v2831_v60  ;;  %v6575_v60 = vld [vmem:[%s8735_s16 + $0x3] ss:$0 sm:$0xff] }
 0xd17   : > { %7191 = vmatmul.mubr.msk.bf16.vlgmr.msra.gmra.mxu0 %vm2287_vm9, %v2832_v61 }
 0xd18   : > { %7201 = vmatpush3.bf16.msra.mxu0 %v7618_v55  ;;  %7204 = vmatprep.mubr.msk.bf16.mxu0 %vm1567_vm7, %v8168_v41 }
 0xd19   : > { %7202 = vmatprep.subr.bf16.mxu0 %v7619_v62 }
 0xd1c   : > { %7203 = vmatpush3.bf16.msra.mxu0 %v7619_v62 }
 0xd1d   : > { %7216 = vmatprep.subr.bf16.mxu0 %v7620_v63 }
 0xd1f   : > { %7205 = vmatmul.mubr.msk.bf16.vlgmr.msra.gmra.mxu0 %vm1567_vm7, %v8178_v44 }
 0xd20   : > { %7217 = vmatpush3.bf16.msra.mxu0 %v7620_v63  ;;  %7220 = vmatprep.mubr.msk.bf16.mxu0 %vm1567_vm7, %v8168_v41 }
 0xd21   : > { %7218 = vmatprep.subr.bf16.mxu0 %v7621_v1 }
 0xd24   : > { %7219 = vmatpush3.bf16.msra.mxu0 %v7621_v1 }
 0xd27   : > { %7221 = vmatmul.mubr.msk.bf16.vlgmr.msra.gmra.mxu0 %vm1567_vm7, %v8178_v44 }
 0xdd7   : > { %v8298_v35 = vpop.f32.mrf.mxu0 }
 0xdd9   : > { %v8300_v12 = vpop.f32.mrf.mxu0 }
 0xddb   : > { %v7193_v5 = vpop.f32.mrf.mxu0 }
 0xddd   : > { %v8302_v7 = vpop.f32.mrf.mxu0 }
 0xddf   : > { %v7206_v38 = vpop.f32.mrf.mxu0 }
 0xde0   : > { %v3018_v10 = vadd.f32 %v7206_v38, %v6518_v8 }
 0xde1   : > { %v3009_v9 = vpop.f32.mrf.mxu0 }
 0xde2   : > { %v3010_v13 = vadd.f32 %v6518_v8, %v3009_v9  ;;  %v3171_v17 = vmul.f32 0.35355338, %v3018_v10 }
 0xde3   : > { %v7207_v11 = vpop.f32.mrf.mxu0 }
 0xde4   : > { %v3169_v19 = vmul.f32 0.35355338, %v3010_v13  ;;  %v3173_v26 = vpack.c.bf16 %v3171_v17, %v3171_v17 }
 0xde5   : > { %v3012_v14 = vpop.f32.mrf.mxu0 }
 0xde6   : > { %v3013_v16 = vadd.f32 %v6518_v8, %v3012_v14 }
 0xde7   : > { %v7222_v18 = vpop.f32.mrf.mxu0 }
 0xde8   : > { %v3170_v20 = vmul.f32 0.35355338, %v3013_v16  ;;  %v3164_v21 = vadd.f32 %v7222_v18, %v6538_v15 }
 0xde9   : > { %v3155_v23 = vpop.f32.mrf.mxu0 }
 0xdea   : > { %v3172_v24 = vpack.c.bf16 %v3170_v20, %v3169_v19  ;;  %v3272_v25 = vpack.c.bf16 %v3164_v21, %v3164_v21  ;;  %v3156_v30 = vadd.f32 %v6538_v15, %v3155_v23 }
 0xdeb   : > { %v7223_v27 = vpop.f32.mrf.mxu0 }
 0xdec   : > { %v3280_v0 = vand.u32 %v3272_v25, %v8194_v6  ;;  %7228 = vmatprep.mubr.msk.bf16.mxu1 %vm2287_vm9, %v3172_v24 }
 0xded   : > { %v3158_v29 = vpop.f32.mrf.mxu0  ;;  %7229 = vmatmul.mubr.msk.bf16.vlgmr.msra.gmra.mxu1 %vm2287_vm9, %v3173_v26 }
 0xdee   : > { %v3159_v31 = vadd.f32 %v6538_v15, %v3158_v29  ;;  %7232 = vmatprep.subr.bf16.mxu0 %v3280_v0  ;;  %7247 = vmatpush3.bf16.msra.mxu1 %v7622_v2 }
 0xdef   : > { %7250 = vmatprep.mubr.msk.bf16.mxu1 %vm1567_vm7, %v8168_v41  ;;  %7233 = vmatpush3.bf16.msra.mxu0 %v3280_v0 }
 0xdf0   : > { %v3271_v34 = vpack.c.bf16 %v3159_v31, %v3156_v30  ;;  %7248 = vmatprep.subr.bf16.mxu1 %v7623_v28 }
 0xdf2   : > { %7234 = vmatprep.subr.bf16.mxu0 %v3271_v34  ;;  %7249 = vmatpush3.bf16.msra.mxu1 %v7623_v28 }
 0xdf3   : > { %7235 = vmatpush3.bf16.msra.mxu0 %v3271_v34  ;;  %7262 = vmatprep.subr.bf16.mxu1 %v7624_v33 }
 0xdf5   : > { %7251 = vmatmul.mubr.msk.bf16.vlgmr.msra.gmra.mxu1 %vm1567_vm7, %v8178_v44 }
 0xdf6   : > { %7263 = vmatpush3.bf16.msra.mxu1 %v7624_v33  ;;  %7266 = vmatprep.mubr.msk.bf16.mxu1 %vm1567_vm7, %v8168_v41 }
 0xdf7   : > { %7264 = vmatprep.subr.bf16.mxu1 %v7625_v36 }
 0xdfa   : > { %7265 = vmatpush3.bf16.msra.mxu1 %v7625_v36 }
 0xdfd   : > { %7267 = vmatmul.mubr.msk.bf16.vlgmr.msra.gmra.mxu1 %vm1567_vm7, %v8178_v44 }
 0xead   : > { %v7230_v40 = vpop.f32.mrf.mxu1 }
 0xeae   : > { %v3231_v47 = vadd.f32 %v7230_v40, %v8212_v22 }
 0xeaf   : > { %v3222_v42 = vpop.f32.mrf.mxu1 }
 0xeb0   : > { %v3223_v45 = vadd.f32 %v8212_v22, %v3222_v42  ;;  %v3242_v55 = vsel %vm2355_vm13, %v3231_v47, -inf }
 0xeb1   : > { %v7231_v46 = vpop.f32.mrf.mxu1 }
 0xeb2   : > { %v3236_v48 = vsel %vm2348_vm12, %v3223_v45, -inf }
 0xeb3   : > { %v3225_v49 = vpop.f32.mrf.mxu1  ;;  %3237 = vmax.xlane.f32.xlu1 %v3236_v48 }
 0xeb4   : > { %v3226_v51 = vadd.f32 %v8212_v22, %v3225_v49 }
 0xeb5   : > { %v7252_v52 = vpop.f32.mrf.mxu1 }
 0xeb6   : > { %v8325_v53 = vadd.f32 %v7252_v52, %v6555_v50  ;;  %v3239_v54 = vsel %vm2348_vm12, %v3226_v51, -inf  ;;  %v7626_v52 = vld [vmem:[%s7964_s27 + $0x38] sm:$0xff]  }
 0xeb7   : > { %v3453_v56 = vpop.f32.mrf.mxu1  ;;  %3240 = vmax.xlane.f32.xlu0 %v3239_v54  ;;  %3243 = vmax.xlane.f32.xlu1 %v3242_v55 }
 0xeb8   : > { %v3454_v58 = vadd.f32 %v6555_v50, %v3453_v56 }
 0xeb9   : > { %v7253_v57 = vpop.f32.mrf.mxu1 }
 0xeba   : > { %v8330_v63 = vmul.f32 0.35355338, %v3454_v58 }
 0xebb   : > { %v3456_v59 = vpop.f32.mrf.mxu1 }
 0xebc   : > { %v3457_v61 = vadd.f32 %v6555_v50, %v3456_v59  ;;  %v6547_v50 = vld [vmem:[%s8737_s26 + $0x8] sm:$0xf] }
 0xebd   : > { %v7268_v62 = vpop.f32.mrf.mxu1  ;;  %7526 = vmatprep.subr.msk.bf16.mxu0 %vm2841_vm14, %v6547_v50 }
 0xebe   : > { %v8332_v1 = vmul.f32 0.35355338, %v3457_v61  ;;  %v3608_v2 = vadd.f32 %v7268_v62, %v6575_v60  ;;  %v2945_v61 = vadd.f32 %v8262_v3, %v8298_v35 }
 0xebf   : > { %v3599_v5 = vpop.f32.mrf.mxu1 }
 0xec0   : > { %v3616_v38 = vpack.c.bf16 %v8332_v1, %v8330_v63  ;;  %v3716_v8 = vpack.c.bf16 %v3608_v2, %v3608_v2  ;;  %v3600_v13 = vadd.f32 %v6575_v60, %v3599_v5  ;;  %v2937_v2 = vadd.f32 %v8266_v4, %v8300_v12  ;;  %v6565_v63 = vld [vmem:[%s8733_s11 + $0x3] ss:$0 sm:$0xff] }
 0xec1   : > { %v7269_v9 = vpop.f32.mrf.mxu1 }
 0xec2   : > { %v3724_v10 = vand.u32 %v3716_v8, %v8194_v6 }
 0xec3   : > { %v3602_v11 = vpop.f32.mrf.mxu1 }
 0xec4   : > { %v3603_v14 = vadd.f32 %v6575_v60, %v3602_v11  ;;  %7278 = vmatprep.subr.bf16.mxu1 %v3724_v10  ;;  %v7627_v60 = vld [vmem:[%s7964_s27 + $0x30] sm:$0xff]  }
 0xec5   : > { %7279 = vmatpush3.bf16.msra.mxu1 %v3724_v10 }
 0xec6   : > { %v3715_v15 = vpack.c.bf16 %v3603_v14, %v3600_v13 }
 0xec8   : > { %7280 = vmatprep.subr.bf16.mxu1 %v3715_v15 }
 0xec9   : > { %7281 = vmatpush3.bf16.msra.mxu1 %v3715_v15 }
 0xf3c   : > { %v3238_v16 = vpop.xlane.xlu1 %3237 }
 0xf3d   : > { %v3245_v17 = vsub.f32 %v3223_v45, %v3238_v16 }
 0xf3f   : > { %v3248_v18 = vmul.f32 1.442695, %v3245_v17 }
 0xf40   : > { %v3241_v19 = vpop.xlane.xlu0 %3240  ;;  %v3244_v20 = vpop.xlane.xlu1 %3243 }
 0xf41   : > { %7724 = vpow2.f32 %v3248_v18  ;;  %v3246_v21 = vsub.f32 %v3226_v51, %v3241_v19  ;;  %v3247_v23 = vsub.f32 %v3231_v47, %v3244_v20  ;;  %v3341_v51 = vsel %vm2841_vm14, %v6547_v50, 0 }
 0xf43   : > { %v3250_v24 = vmul.f32 1.442695, %v3246_v21  ;;  %v3252_v25 = vmul.f32 1.442695, %v3247_v23 }
 0xf45   : > { %7726 = vpow2.f32 %v3250_v24 }
 0xf46   : > { %7728 = vpow2.f32 %v3252_v25 }
 0xf4e   : > { %v7725_v26 = vpop.eup %7724 }
 0xf4f   : > { %v3254_v27 = vsel %vm2348_vm12, %v7725_v26, 0.0 }
 0xf50   : > { %3255 = vadd.xlane.f32.xlu0 %v3254_v27 }
 0xf52   : > { %v7727_v0 = vpop.eup %7726 }
 0xf53   : > { %v7729_v28 = vpop.eup %7728  ;;  %v3257_v29 = vsel %vm2348_vm12, %v7727_v0, 0.0 }
 0xf54   : > { %3258 = vadd.xlane.f32.xlu1 %v3257_v29  ;;  %v3260_v30 = vsel %vm2355_vm13, %v7729_v28, 0.0 }
 0xf55   : > { %3261 = vadd.xlane.f32.xlu0 %v3260_v30 }
 0xfd9   : > { %v3256_v31 = vpop.xlane.xlu0 %3255 }
 0xfda   : > { %7730 = vrcp.f32 %v3256_v31 }
 0xfdd   : > { %v3259_v33 = vpop.xlane.xlu1 %3258 }
 0xfde   : > { %v3262_v34 = vpop.xlane.xlu0 %3261  ;;  %7732 = vrcp.f32 %v3259_v33 }
 0xfdf   : > { %7734 = vrcp.f32 %v3262_v34 }
 0xfe7   : > { %v7731_v36 = vpop.eup %7730 }
 0xfe8   : > { %v3266_v45 = vmul.f32 %v7731_v36, %v7725_v26 }
 0xfeb   : > { %v7733_v40 = vpop.eup %7732 }
 0xfec   : > { %v7735_v42 = vpop.eup %7734  ;;  %v3267_v46 = vmul.f32 %v7733_v40, %v7727_v0 }
 0xfed   : > { %v3268_v47 = vmul.f32 %v7735_v42, %v7729_v28 }
 0xfee   : > { %v3269_v48 = vpack.c.bf16 %v3267_v46, %v3266_v45 }
 0xfef   : > { %v3270_v49 = vpack.c.bf16 %v3268_v47, %v3268_v47 }
 0xff0   : > { %7236 = vmatprep.mubr.msk.bf16.mxu0 %vm2348_vm12, %v3269_v48 }
 0xff1   : > { %7237 = vmatmul.mubr.msk.bf16.vlgmr.msra.gmra.mxu0 %vm2348_vm12, %v3270_v49 }
 0xff2   : > { %7241 = vmatpush3.bf16.msra.mxu0 %v3341_v51 }
 0xff3   : > { %7254 = vmatprep.subr.bf16.mxu0 %v7626_v52 }
0x10b1   : > { %v7238_v54 = vpop.f32.mrf.mxu0 }
0x10b2   : > { %v3331_v59 = vpack.c.bf16 %v7238_v54, %v7238_v54 }
0x10b3   : > { %v3316_v55 = vpop.f32.mrf.mxu0 }
0x10b5   : > { %v7239_v56 = vpop.f32.mrf.mxu0 }
0x10b7   : > { %v3319_v57 = vpop.f32.mrf.mxu0 }
0x10b8   : > { %v3330_v58 = vpack.c.bf16 %v3319_v57, %v3316_v55 }
0x10ba   : > { %7242 = vmatprep.mubr.msk.bf16.mxu0 %vm2287_vm9, %v3330_v58 }
0x10bb   : > { %7243 = vmatmul.mubr.msk.bf16.vlgmr.msra.gmra.mxu0 %vm2287_vm9, %v3331_v59 }
0x10bc   : > { %7255 = vmatpush3.bf16.msra.mxu0 %v7626_v52  ;;  %7258 = vmatprep.mubr.msk.bf16.mxu0 %vm1567_vm7, %v8168_v41 }
0x10bd   : > { %7256 = vmatprep.subr.bf16.mxu0 %v7627_v60 }
0x10c0   : > { %7257 = vmatpush3.bf16.msra.mxu0 %v7627_v60 }
0x10c3   : > { %7259 = vmatmul.mubr.msk.bf16.vlgmr.msra.gmra.mxu0 %vm1567_vm7, %v8178_v44  ;;  %v2940_v44 = vadd.f32 %v8268_v32, %v8302_v7  ;;  %v3615_v7 = vmul.f32 0.35355338, %v8325_v53 }
0x10c4   : > { %7274 = vmatprep.mubr.msk.bf16.mxu0 %vm2287_vm9, %v3616_v38 }
0x10c5   : > { %v3617_v17 = vpack.c.bf16 %v3615_v7, %v3615_v7 }
0x117b   : > { %v7244_v62 = vpop.f32.mrf.mxu0 }
0x117c   : > { %v8361_v5 = vadd.f32 %v7244_v62, %v2945_v61  ;;  %v6584_v61 = vld [vmem:[%s8737_s26 + $0xc] sm:$0xf] }
0x117d   : > { %v3377_v41 = vpop.f32.mrf.mxu0  ;;  %7529 = vmatprep.subr.msk.bf16.mxu1 %vm2841_vm14, %v6584_v61  ;;  %v3785_v62 = vsel %vm2841_vm14, %v6584_v61, 0 }
0x117e   : > { %v8363_v8 = vadd.f32 %v3377_v41, %v2937_v2 }
0x117f   : > { %v7245_v9 = vpop.f32.mrf.mxu0 }
0x1181   : > { %v3380_v10 = vpop.f32.mrf.mxu0 }
0x1182   : > { %v8368_v1 = vadd.f32 %v3380_v10, %v2940_v44 }
0x1183   : > { %v7260_v38 = vpop.f32.mrf.mxu0 }
0x1184   : > { %v3535_v11 = vadd.f32 %v7260_v38, %v6565_v63 }
0x1185   : > { %v3526_v3 = vpop.f32.mrf.mxu0 }
0x1186   : > { %v3619_v35 = vpack.c.bf16 %v3535_v11, %v3535_v11  ;;  %v3527_v14 = vadd.f32 %v6565_v63, %v3526_v3  ;;  %v6587_v3 = vld [vmem:[%s8738_s1] ss:$0 sm:$0xff] }
0x1187   : > { %v7261_v13 = vpop.f32.mrf.mxu0 }
0x1188   : > { %v3630_v4 = vsel %vm2287_vm9, %v3619_v35, 0  ;;  %7527 = vmatprep.subr.msk.bf16.mxu0 %vm2287_vm9, %v3619_v35 }
0x1189   : > { %v3529_v12 = vpop.f32.mrf.mxu0  ;;  %7271 = vmatpush3.bf16.xpose.msra.mxu0 %v3630_v4 }
0x118a   : > { %v3530_v15 = vadd.f32 %v6565_v63, %v3529_v12 }
0x118c   : > { %v3618_v16 = vpack.c.bf16 %v3530_v15, %v3527_v14 }
0x118e   : > { %7528 = vmatprep.subr.msk.bf16.mxu0 %vm2287_vm9, %v3618_v16  ;;  %v3627_v32 = vsel %vm2287_vm9, %v3618_v16, 0 }
0x1191   : > { %7273 = vmatpush3.bf16.xpose.msra.mxu0 %v3627_v32 }
0x1198   : > { %7275 = vmatmul.mubr.msk.bf16.vlgmr.msra.gmra.mxu0 %vm2287_vm9, %v3617_v17 }
0x1258   : > { %v7276_v18 = vpop.f32.mrf.mxu0 }
0x1259   : > { %v3675_v23 = vadd.f32 %v7276_v18, %v8212_v22 }
0x125a   : > { %v3666_v19 = vpop.f32.mrf.mxu0 }
0x125b   : > { %v3667_v20 = vadd.f32 %v8212_v22, %v3666_v19  ;;  %v3686_v53 = vsel %vm2355_vm13, %v3675_v23, -inf }
0x125c   : > { %v7277_v21 = vpop.f32.mrf.mxu0 }
0x125d   : > { %v3680_v24 = vsel %vm2348_vm12, %v3667_v20, -inf }
0x125e   : > { %v3669_v25 = vpop.f32.mrf.mxu0  ;;  %3681 = vmax.xlane.f32.xlu1 %v3680_v24 }
0x125f   : > { %v3670_v26 = vadd.f32 %v8212_v22, %v3669_v25 }
0x1261   : > { %v3683_v27 = vsel %vm2348_vm12, %v3670_v26, -inf }
0x1262   : > { %3684 = vmax.xlane.f32.xlu0 %v3683_v27  ;;  %3687 = vmax.xlane.f32.xlu1 %v3686_v53 }
0x12e7   : > { %v3682_v0 = vpop.xlane.xlu1 %3681 }
0x12e8   : > { %v3689_v28 = vsub.f32 %v3667_v20, %v3682_v0 }
0x12ea   : > { %v3692_v29 = vmul.f32 1.442695, %v3689_v28 }
0x12eb   : > { %v3685_v30 = vpop.xlane.xlu0 %3684  ;;  %v3688_v31 = vpop.xlane.xlu1 %3687 }
0x12ec   : > { %7736 = vpow2.f32 %v3692_v29  ;;  %v3690_v33 = vsub.f32 %v3670_v26, %v3685_v30  ;;  %v3691_v34 = vsub.f32 %v3675_v23, %v3688_v31  ;;  %v7628_v30 = vld [vmem:[%s8739_s7 + $0x8] sm:$0xff]   ;;  %v7629_v31 = vld [vmem:[%s8739_s7] sm:$0xff]  }
0x12ed   : > { %7292 = vmatprep.subr.bf16.mxu0 %v7628_v30 }
0x12ee   : > { %v3694_v36 = vmul.f32 1.442695, %v3690_v33  ;;  %v3696_v40 = vmul.f32 1.442695, %v3691_v34  ;;  %7293 = vmatpush3.bf16.msra.mxu0 %v7628_v30 }
0x12ef   : > { %7294 = vmatprep.subr.bf16.mxu0 %v7629_v31 }
0x12f0   : > { %7738 = vpow2.f32 %v3694_v36 }
0x12f1   : > { %7740 = vpow2.f32 %v3696_v40 }
0x12f2   : > { %7295 = vmatpush3.bf16.msra.mxu0 %v7629_v31 }
0x12f9   : > { %v7737_v42 = vpop.eup %7736 }
0x12fa   : > { %v3698_v22 = vsel %vm2348_vm12, %v7737_v42, 0.0 }
0x12fb   : > { %3699 = vadd.xlane.f32.xlu0 %v3698_v22 }
0x12fd   : > { %v7739_v45 = vpop.eup %7738 }
0x12fe   : > { %v7741_v46 = vpop.eup %7740  ;;  %v3701_v47 = vsel %vm2348_vm12, %v7739_v45, 0.0 }
0x12ff   : > { %3702 = vadd.xlane.f32.xlu1 %v3701_v47  ;;  %v3704_v48 = vsel %vm2355_vm13, %v7741_v46, 0.0 }
0x1300   : > { %3705 = vadd.xlane.f32.xlu0 %v3704_v48 }
0x1384   : > { %v3700_v49 = vpop.xlane.xlu0 %3699 }
0x1385   : > { %7742 = vrcp.f32 %v3700_v49 }
0x1388   : > { %v3703_v50 = vpop.xlane.xlu1 %3702 }
0x1389   : > { %v3706_v51 = vpop.xlane.xlu0 %3705  ;;  %7744 = vrcp.f32 %v3703_v50  ;;  %v6588_v50 = vld [vmem:[%s8740_s10] ss:$0 sm:$0xff] }
0x138a   : > { %7746 = vrcp.f32 %v3706_v51 }
0x1392   : > { %v7743_v52 = vpop.eup %7742 }
0x1393   : > { %v3710_v56 = vmul.f32 %v7743_v52, %v7737_v42 }
0x1396   : > { %v7745_v54 = vpop.eup %7744 }
0x1397   : > { %v7747_v55 = vpop.eup %7746  ;;  %v3711_v57 = vmul.f32 %v7745_v54, %v7739_v45 }
0x1398   : > { %v3712_v58 = vmul.f32 %v7747_v55, %v7741_v46 }
0x1399   : > { %v3713_v59 = vpack.c.bf16 %v3711_v57, %v3710_v56  ;;  %v6589_v57 = vld [vmem:[%s8741_s18] ss:$0 sm:$0xff] }
0x139a   : > { %v3714_v60 = vpack.c.bf16 %v3712_v58, %v3712_v58 }
0x139b   : > { %7282 = vmatprep.mubr.msk.bf16.mxu1 %vm2348_vm12, %v3713_v59 }
0x139c   : > { %7283 = vmatmul.mubr.msk.bf16.vlgmr.msra.gmra.mxu1 %vm2348_vm12, %v3714_v60 }
0x139d   : > { %7287 = vmatpush3.bf16.msra.mxu1 %v3785_v62 }
0x145c   : > { %v7284_v2 = vpop.f32.mrf.mxu1 }
0x145d   : > { %v3775_v63 = vpack.c.bf16 %v7284_v2, %v7284_v2 }
0x145e   : > { %v3760_v41 = vpop.f32.mrf.mxu1 }
0x1460   : > { %v7285_v9 = vpop.f32.mrf.mxu1 }
0x1461   : > { %v7630_v9 = vld [vmem:[%s8742_s28 + $0x18] sm:$0xff]  }
0x1462   : > { %v3763_v44 = vpop.f32.mrf.mxu1  ;;  %7300 = vmatprep.subr.bf16.mxu1 %v7630_v9 }
0x1463   : > { %v3774_v10 = vpack.c.bf16 %v3763_v44, %v3760_v41  ;;  %v7631_v44 = vld [vmem:[%s8742_s28 + $0x10] sm:$0xff]  }
0x1465   : > { %7288 = vmatprep.mubr.msk.bf16.mxu1 %vm2287_vm9, %v3774_v10  ;;  %v7632_v10 = vld [vmem:[%s8742_s28 + $0x8] sm:$0xff]  }
0x1466   : > { %7289 = vmatmul.mubr.msk.bf16.vlgmr.msra.gmra.mxu1 %vm2287_vm9, %v3775_v63  ;;  %v7633_v63 = vld [vmem:[%s8742_s28] sm:$0xff]  }
0x1467   : > { %7301 = vmatpush3.bf16.msra.mxu1 %v7630_v9 }
0x1468   : > { %7302 = vmatprep.subr.bf16.mxu1 %v7631_v44 }
0x146b   : > { %7303 = vmatpush3.bf16.msra.mxu1 %v7631_v44 }
0x146c   : > { %7304 = vmatprep.subr.bf16.mxu1 %v7632_v10 }
0x146f   : > { %7305 = vmatpush3.bf16.msra.mxu1 %v7632_v10 }
0x1470   : > { %7306 = vmatprep.subr.bf16.mxu1 %v7633_v63 }
0x1473   : > { %7307 = vmatpush3.bf16.msra.mxu1 %v7633_v63 }
0x1526   : > { %v7290_v38 = vpop.f32.mrf.mxu1 }
0x1527   : > { %v3837_v11 = vadd.f32 %v7290_v38, %v8361_v5  ;;  %v6590_v38 = vld [vmem:[%s8743_s3] ss:$0 sm:$0xff] }
0x1528   : > { %v3821_v35 = vpop.f32.mrf.mxu1 }
0x1529   : > { %v3835_v13 = vadd.f32 %v3821_v35, %v8363_v8  ;;  %v3847_v12 = vadd.f32 %v6587_v3, %v3837_v11 }
0x152a   : > { %v7291_v4 = vpop.f32.mrf.mxu1 }
0x152b   : > { %v3845_v14 = vadd.f32 %v6587_v3, %v3835_v13  ;;  %v3850_v18 = vadd.f32 %v3847_v12, %v8170_v43 }
0x152c   : > { %v3824_v15 = vpop.f32.mrf.mxu1 }
0x152d   : > { %v3836_v16 = vadd.f32 %v3824_v15, %v8368_v1  ;;  %v3848_v32 = vadd.f32 %v3845_v14, %v8162_v37  ;;  %v3859_v8 = vsel %vm1574_vm8, %v3850_v18, 0.0 }
0x152f   : > { %v3846_v7 = vadd.f32 %v6587_v3, %v3836_v16  ;;  %v3853_v17 = vsel %vm1567_vm7, %v3848_v32, 0.0 }
0x1530   : > { %3854 = vadd.xlane.f32.xlu1 %v3853_v17 }
0x1531   : > { %v3849_v5 = vadd.f32 %v3846_v7, %v8164_v39 }
0x1533   : > { %v3856_v19 = vsel %vm1567_vm7, %v3849_v5, 0.0 }
0x1534   : > { %3857 = vadd.xlane.f32.xlu0 %v3856_v19  ;;  %3860 = vadd.xlane.f32.xlu1 %v3859_v8 }
0x15b9   : > { %v3855_v20 = vpop.xlane.xlu1 %3854 }
0x15ba   : > { %v3862_v21 = vmul.f32 0.03125, %v3855_v20 }
0x15bc   : > { %v3865_v23 = vsub.f32 %v3848_v32, %v3862_v21 }
0x15bd   : > { %v3858_v1 = vpop.xlane.xlu0 %3857  ;;  %v3861_v37 = vpop.xlane.xlu1 %3860 }
0x15be   : > { %v3863_v24 = vmul.f32 0.03125, %v3858_v1  ;;  %v3864_v25 = vmul.f32 0.03125, %v3861_v37  ;;  %v3868_v26 = vmul.f32 %v3865_v23, %v3865_v23 }
0x15c0   : > { %v3866_v43 = vsub.f32 %v3849_v5, %v3863_v24  ;;  %v3867_v27 = vsub.f32 %v3850_v18, %v3864_v25  ;;  %v3871_v39 = vsel %vm1567_vm7, %v3868_v26, 0.0 }
0x15c1   : > { %3872 = vadd.xlane.f32.xlu0 %v3871_v39 }
0x15c2   : > { %v3869_v53 = vmul.f32 %v3866_v43, %v3866_v43  ;;  %v3870_v0 = vmul.f32 %v3867_v27, %v3867_v27 }
0x15c4   : > { %v3874_v28 = vsel %vm1567_vm7, %v3869_v53, 0.0  ;;  %v3877_v29 = vsel %vm1574_vm8, %v3870_v0, 0.0 }
0x15c5   : > { %3875 = vadd.xlane.f32.xlu1 %v3874_v28  ;;  %3878 = vadd.xlane.f32.xlu0 %v3877_v29 }
0x164a   : > { %v3873_v33 = vpop.xlane.xlu0 %3872 }
0x164b   : > { %v3880_v34 = vmul.f32 0.03125, %v3873_v33 }
0x164d   : > { %v3883_v36 = vadd.f32 1e-05, %v3880_v34 }
0x164e   : > { %v3879_v40 = vpop.xlane.xlu0 %3878  ;;  %v3876_v42 = vpop.xlane.xlu1 %3875 }
0x164f   : > { %7748 = vrsqrt.f32 %v3883_v36  ;;  %v3882_v22 = vmul.f32 0.03125, %v3879_v40  ;;  %v3881_v45 = vmul.f32 0.03125, %v3876_v42 }
0x1651   : > { %v3885_v46 = vadd.f32 1e-05, %v3882_v22  ;;  %v3884_v47 = vadd.f32 1e-05, %v3881_v45 }
0x1653   : > { %7750 = vrsqrt.f32 %v3885_v46 }
0x1654   : > { %7752 = vrsqrt.f32 %v3884_v47 }
0x165c   : > { %v7749_v48 = vpop.eup %7748 }
0x165d   : > { %v3889_v49 = vmul.f32 %v7749_v48, %v3865_v23 }
0x165f   : > { %v3898_v56 = vmul.f32 %v6588_v50, %v3889_v49 }
0x1660   : > { %v7751_v51 = vpop.eup %7750 }
0x1661   : > { %v7753_v52 = vpop.eup %7752  ;;  %v3891_v54 = vmul.f32 %v7751_v51, %v3867_v27  ;;  %v3907_v61 = vadd.f32 %v6589_v57, %v3898_v56  ;;  %v6595_v27 = vld [vmem:[%s8024_s6] ss:$0 sm:$0xff] }
0x1662   : > { %v3890_v55 = vmul.f32 %v7753_v52, %v3866_v43 }
0x1663   : > { %v3900_v58 = vmul.f32 %v6588_v50, %v3891_v54 }
0x1664   : > { %v3899_v59 = vmul.f32 %v6588_v50, %v3890_v55 }
0x1665   : > { %v3909_v60 = vadd.f32 %v6589_v57, %v3900_v58 }
0x1666   : > { %v3908_v62 = vadd.f32 %v6589_v57, %v3899_v59 }
0x1667   : > { %v3911_v2 = vpack.c.bf16 %v3909_v60, %v3909_v60 }
0x1668   : > { %v3910_v41 = vpack.c.bf16 %v3908_v62, %v3907_v61 }
0x166a   : > { %7296 = vmatprep.mubr.msk.bf16.mxu0 %vm1567_vm7, %v3910_v41  ;;  %v7638_v41 = vld [vmem:[%s7964_s27 + $0x48] sm:$0xff]  }
0x166b   : > { %7297 = vmatmul.mubr.msk.bf16.vlgmr.msra.gmra.mxu0 %vm1567_vm7, %v3911_v2  ;;  %v7637_v2 = vld [vmem:[%s8730_s2 + $0x40] sm:$0xff]  }
0x172b   : > { %v7298_v11 = vpop.f32.mrf.mxu0 }
0x172c   : > { %v3984_v3 = vadd.f32 %v7298_v11, %v6590_v38 }
0x172d   : > { %v3975_v35 = vpop.f32.mrf.mxu0 }
0x172e   : > { %v3994_v13 = vmul.f32 0.70710677, %v3984_v3  ;;  %v3976_v4 = vadd.f32 %v6590_v38, %v3975_v35  ;;  %v3991_v8 = vmul.f32 0.5, %v3984_v3 }
0x172f   : > { %v7299_v12 = vpop.f32.mrf.mxu0 }
0x1730   : > { %v3992_v14 = vmul.f32 0.70710677, %v3976_v4  ;;  %7754 = verf.f32 %v3994_v13  ;;  %v3989_v20 = vmul.f32 0.5, %v3976_v4 }
0x1731   : > { %v3978_v15 = vpop.f32.mrf.mxu0 }
0x1732   : > { %7756 = verf.f32 %v3992_v14  ;;  %v3979_v16 = vadd.f32 %v6590_v38, %v3978_v15  ;;  %v6602_v14 = vld [vmem:[%s8029_s4] ss:$0 sm:$0xff] }
0x1734   : > { %v3993_v32 = vmul.f32 0.70710677, %v3979_v16  ;;  %v3990_v21 = vmul.f32 0.5, %v3979_v16 }
0x1736   : > { %7758 = verf.f32 %v3993_v32 }
0x173d   : > { %v7755_v7 = vpop.eup %7754 }
0x173e   : > { %v4000_v18 = vadd.f32 1.0, %v7755_v7 }
0x173f   : > { %v7757_v17 = vpop.eup %7756 }
0x1740   : > { %v3998_v5 = vadd.f32 1.0, %v7757_v17  ;;  %v4003_v1 = vmul.f32 %v4000_v18, %v3991_v8  ;;  %v6603_v18 = vld [vmem:[%s8034_s13] ss:$0 sm:$0xff] }
0x1742   : > { %v4001_v37 = vmul.f32 %v3998_v5, %v3989_v20  ;;  %v4005_v26 = vpack.c.bf16 %v4003_v1, %v4003_v1 }
0x1743   : > { %v7759_v19 = vpop.eup %7758 }
0x1744   : > { %v3999_v23 = vadd.f32 1.0, %v7759_v19 }
0x1746   : > { %v4002_v24 = vmul.f32 %v3999_v23, %v3990_v21 }
0x1748   : > { %v4004_v25 = vpack.c.bf16 %v4002_v24, %v4001_v37  ;;  %v7639_v37 = vld [vmem:[%s7964_s27 + $0x40] sm:$0xff]  }
0x1749   : > { %v6629_v24 = vld [vmem:[%s8735_s16 + $0x4] ss:$0 sm:$0xff] }
0x174a   : > { %7308 = vmatprep.mubr.msk.bf16.mxu1 %vm4045_vm15, %v4004_v25 }
0x174b   : > { %7309 = vmatmul.mubr.msk.bf16.vlgmr.msra.gmra.mxu1 %vm4045_vm15, %v4005_v26 }
0x180b   : > { %v7310_v43 = vpop.f32.mrf.mxu1 }
0x180c   : > { %v4095_v53 = vadd.f32 %v7310_v43, %v6595_v27 }
0x180d   : > { %v4086_v39 = vpop.f32.mrf.mxu1 }
0x180e   : > { %v4087_v0 = vadd.f32 %v6595_v27, %v4086_v39  ;;  %v4102_v34 = vadd.f32 %v4095_v53, %v3909_v60  ;;  %v7634_v60 = vld [vmem:[%s7959_s20 + $0x48] sm:$0xff]  }
0x180f   : > { %v7311_v28 = vpop.f32.mrf.mxu1  ;;  %7312 = vmatprep.subr.bf16.mxu0 %v7634_v60 }
0x1810   : > { %v4100_v29 = vadd.f32 %v4087_v0, %v3907_v61  ;;  %v4111_v42 = vsel %vm1574_vm8, %v4102_v34, 0.0  ;;  %v7635_v61 = vld [vmem:[%s8730_s2 + $0x48] sm:$0xff]   ;;  %7313 = vmatpush3.bf16.msra.mxu0 %v7634_v60  ;;  %v6609_v0 = vld [vmem:[%s8734_s15 + $0x4] ss:$0 sm:$0xff] }
0x1811   : > { %v4089_v30 = vpop.f32.mrf.mxu1  ;;  %7328 = vmatprep.subr.bf16.mxu1 %v7635_v61 }
0x1812   : > { %v4090_v31 = vadd.f32 %v6595_v27, %v4089_v30  ;;  %v4105_v33 = vsel %vm1567_vm7, %v4100_v29, 0.0  ;;  %7329 = vmatpush3.bf16.msra.mxu1 %v7635_v61  ;;  %v7640_v61 = vld [vmem:[%s7964_s27 + $0x58] sm:$0xff]  }
0x1813   : > { %4106 = vadd.xlane.f32.xlu1 %v4105_v33  ;;  %7330 = vmatprep.subr.bf16.mxu1 %v7637_v2 }
0x1814   : > { %v4101_v36 = vadd.f32 %v4090_v31, %v3908_v62  ;;  %v7636_v62 = vld [vmem:[%s7959_s20 + $0x40] sm:$0xff]  }
0x1815   : > { %7314 = vmatprep.subr.bf16.mxu0 %v7636_v62 }
0x1816   : > { %v4108_v40 = vsel %vm1567_vm7, %v4101_v36, 0.0  ;;  %7315 = vmatpush3.bf16.msra.mxu0 %v7636_v62  ;;  %7331 = vmatpush3.bf16.msra.mxu1 %v7637_v2 }
0x1817   : > { %4109 = vadd.xlane.f32.xlu0 %v4108_v40  ;;  %4112 = vadd.xlane.f32.xlu1 %v4111_v42 }
0x1818   : > { %7320 = vmatprep.subr.bf16.mxu0 %v7638_v41 }
0x189c   : > { %v4107_v22 = vpop.xlane.xlu1 %4106 }
0x189d   : > { %v4114_v45 = vmul.f32 0.03125, %v4107_v22 }
0x189f   : > { %v4117_v46 = vsub.f32 %v4100_v29, %v4114_v45 }
0x18a0   : > { %v4110_v47 = vpop.xlane.xlu0 %4109  ;;  %v4113_v48 = vpop.xlane.xlu1 %4112 }
0x18a1   : > { %v4115_v49 = vmul.f32 0.03125, %v4110_v47  ;;  %v4116_v50 = vmul.f32 0.03125, %v4113_v48  ;;  %v4120_v51 = vmul.f32 %v4117_v46, %v4117_v46 }
0x18a3   : > { %v4118_v52 = vsub.f32 %v4101_v36, %v4115_v49  ;;  %v4119_v54 = vsub.f32 %v4102_v34, %v4116_v50  ;;  %v4123_v55 = vsel %vm1567_vm7, %v4120_v51, 0.0  ;;  %v6619_v36 = vld [vmem:[%s8733_s11 + $0x4] ss:$0 sm:$0xff] }
0x18a4   : > { %4124 = vadd.xlane.f32.xlu0 %v4123_v55 }
0x18a5   : > { %v4121_v56 = vmul.f32 %v4118_v52, %v4118_v52  ;;  %v4122_v57 = vmul.f32 %v4119_v54, %v4119_v54 }
0x18a7   : > { %v4126_v58 = vsel %vm1567_vm7, %v4121_v56, 0.0  ;;  %v4129_v59 = vsel %vm1574_vm8, %v4122_v57, 0.0 }
0x18a8   : > { %4127 = vadd.xlane.f32.xlu1 %v4126_v58  ;;  %4130 = vadd.xlane.f32.xlu0 %v4129_v59 }
0x192d   : > { %v4125_v9 = vpop.xlane.xlu0 %4124 }
0x192e   : > { %v4132_v44 = vmul.f32 0.03125, %v4125_v9  ;;  %v7641_v9 = vld [vmem:[%s7964_s27 + $0x50] sm:$0xff]  }
0x1930   : > { %v4135_v10 = vadd.f32 1e-05, %v4132_v44 }
0x1931   : > { %v4131_v63 = vpop.xlane.xlu0 %4130  ;;  %v4128_v38 = vpop.xlane.xlu1 %4127 }
0x1932   : > { %7760 = vrsqrt.f32 %v4135_v10  ;;  %v4134_v11 = vmul.f32 0.03125, %v4131_v63  ;;  %v4133_v3 = vmul.f32 0.03125, %v4128_v38  ;;  %v8476_v63 = vld [vmem:[%s8209_s0] ss:$0 sm:$0xff]  ;;  %s8744_s0 = smul.u32 24, %s8746_s23 }
0x1934   : > { %v4137_v35 = vadd.f32 1e-05, %v4134_v11  ;;  %v4136_v13 = vadd.f32 1e-05, %v4133_v3 }
0x1936   : > { %7762 = vrsqrt.f32 %v4137_v35 }
0x1937   : > { %7764 = vrsqrt.f32 %v4136_v13 }
0x193f   : > { %v7761_v4 = vpop.eup %7760 }
0x1940   : > { %v4141_v12 = vmul.f32 %v7761_v4, %v4117_v46  ;;  %v6654_v4 = vld [vmem:[%s8733_s11 + $0x5] ss:$0 sm:$0xff] }
0x1942   : > { %v4150_v7 = vmul.f32 %v6602_v14, %v4141_v12 }
0x1943   : > { %v7763_v15 = vpop.eup %7762 }
0x1944   : > { %v7765_v16 = vpop.eup %7764  ;;  %v4143_v32 = vmul.f32 %v7763_v15, %v4119_v54  ;;  %v8434_v20 = vadd.f32 %v6603_v18, %v4150_v7 }
0x1945   : > { %v4142_v17 = vmul.f32 %v7765_v16, %v4118_v52 }
0x1946   : > { %v4152_v5 = vmul.f32 %v6602_v14, %v4143_v32 }
0x1947   : > { %v4151_v19 = vmul.f32 %v6602_v14, %v4142_v17 }
0x1948   : > { %v8432_v8 = vadd.f32 %v6603_v18, %v4152_v5 }
0x1949   : > { %v8436_v21 = vadd.f32 %v6603_v18, %v4151_v19 }
0x194a   : > { %v8440_v23 = vpack.c.bf16 %v8432_v8, %v8432_v8 }
0x194b   : > { %v8444_v1 = vpack.c.bf16 %v8436_v21, %v8434_v20 }
0x194d   : > { %7316 = vmatprep.mubr.msk.bf16.mxu0 %vm1567_vm7, %v8444_v1  ;;  %7332 = vmatprep.mubr.msk.bf16.mxu1 %vm1567_vm7, %v8444_v1 }
0x194e   : > { %7317 = vmatmul.mubr.msk.bf16.vlgmr.msra.gmra.mxu0 %vm1567_vm7, %v8440_v23  ;;  %7333 = vmatmul.mubr.msk.bf16.vlgmr.msra.gmra.mxu1 %vm1567_vm7, %v8440_v23 }
0x194f   : > { %7321 = vmatpush3.bf16.msra.mxu0 %v7638_v41  ;;  %7324 = vmatprep.mubr.msk.bf16.mxu0 %vm1567_vm7, %v8444_v1 }
0x1950   : > { %7322 = vmatprep.subr.bf16.mxu0 %v7639_v37 }
0x1953   : > { %7323 = vmatpush3.bf16.msra.mxu0 %v7639_v37 }
0x1956   : > { %7325 = vmatmul.mubr.msk.bf16.vlgmr.msra.gmra.mxu0 %vm1567_vm7, %v8440_v23 }
0x1a0e   : > { %v7318_v25 = vpop.f32.mrf.mxu0  ;;  %v7334_v26 = vpop.f32.mrf.mxu1 }
0x1a0f   : > { %v4384_v43 = vadd.f32 %v7334_v26, %v6629_v24  ;;  %v4238_v60 = vadd.f32 %v7318_v25, %v6609_v0 }
0x1a10   : > { %v4229_v27 = vpop.f32.mrf.mxu0  ;;  %v4375_v39 = vpop.f32.mrf.mxu1 }
0x1a11   : > { %v4492_v53 = vpack.c.bf16 %v4384_v43, %v4384_v43  ;;  %v4230_v31 = vadd.f32 %v6609_v0, %v4229_v27  ;;  %v4376_v40 = vadd.f32 %v6629_v24, %v4375_v39  ;;  %v4391_v2 = vmul.f32 0.35355338, %v4238_v60  ;;  %v7645_v60 = vld [vmem:[%s8730_s2 + $0x50] sm:$0xff]  }
0x1a12   : > { %v7319_v28 = vpop.f32.mrf.mxu0  ;;  %v7335_v29 = vpop.f32.mrf.mxu1 }
0x1a13   : > { %v4500_v30 = vand.u32 %v4492_v53, %v8194_v6  ;;  %v4389_v46 = vmul.f32 0.35355338, %v4230_v31  ;;  %v4393_v41 = vpack.c.bf16 %v4391_v2, %v4391_v2 }
0x1a14   : > { %v4232_v33 = vpop.f32.mrf.mxu0  ;;  %v4378_v34 = vpop.f32.mrf.mxu1 }
0x1a15   : > { %v4233_v42 = vadd.f32 %v6609_v0, %v4232_v33  ;;  %v4379_v22 = vadd.f32 %v6629_v24, %v4378_v34  ;;  %7344 = vmatprep.subr.bf16.mxu1 %v4500_v30 }
0x1a16   : > { %v7326_v45 = vpop.f32.mrf.mxu0  ;;  %7345 = vmatpush3.bf16.msra.mxu1 %v4500_v30 }
0x1a17   : > { %v4390_v47 = vmul.f32 0.35355338, %v4233_v42  ;;  %v4491_v48 = vpack.c.bf16 %v4379_v22, %v4376_v40  ;;  %v4311_v49 = vadd.f32 %v7326_v45, %v6619_v36  ;;  %v7642_v45 = vld [vmem:[%s7959_s20 + $0x58] sm:$0xff]  }
0x1a18   : > { %v4302_v50 = vpop.f32.mrf.mxu0 }
0x1a19   : > { %v4392_v51 = vpack.c.bf16 %v4390_v47, %v4389_v46  ;;  %v4395_v52 = vpack.c.bf16 %v4311_v49, %v4311_v49  ;;  %7346 = vmatprep.subr.bf16.mxu1 %v4491_v48  ;;  %v4303_v57 = vadd.f32 %v6619_v36, %v4302_v50 }
0x1a1a   : > { %v7327_v54 = vpop.f32.mrf.mxu0  ;;  %7347 = vmatpush3.bf16.msra.mxu1 %v4491_v48 }
0x1a1b   : > { %v4406_v55 = vsel %vm2287_vm9, %v4395_v52, 0  ;;  %7530 = vmatprep.subr.msk.bf16.mxu0 %vm2287_vm9, %v4395_v52  ;;  %7340 = vmatprep.mubr.msk.bf16.mxu0 %vm2287_vm9, %v4392_v51 }
0x1a1c   : > { %v4305_v56 = vpop.f32.mrf.mxu0  ;;  %7337 = vmatpush3.bf16.xpose.msra.mxu0 %v4406_v55  ;;  %7352 = vmatprep.subr.bf16.mxu1 %v7642_v45 }
0x1a1d   : > { %v4306_v58 = vadd.f32 %v6619_v36, %v4305_v56 }
0x1a1f   : > { %v4394_v59 = vpack.c.bf16 %v4306_v58, %v4303_v57  ;;  %v7643_v58 = vld [vmem:[%s7959_s20 + $0x50] sm:$0xff]  }
0x1a21   : > { %7531 = vmatprep.subr.msk.bf16.mxu0 %vm2287_vm9, %v4394_v59  ;;  %v4403_v62 = vsel %vm2287_vm9, %v4394_v59, 0  ;;  %v7644_v59 = vld [vmem:[%s8730_s2 + $0x58] sm:$0xff]  }
0x1a24   : > { %7339 = vmatpush3.bf16.xpose.msra.mxu0 %v4403_v62 }
0x1a25   : > { %7360 = vmatprep.subr.bf16.mxu0 %v7640_v61 }
0x1a2b   : > { %7341 = vmatmul.mubr.msk.bf16.vlgmr.msra.gmra.mxu0 %vm2287_vm9, %v4393_v41 }
0x1a2c   : > { %7361 = vmatpush3.bf16.msra.mxu0 %v7640_v61  ;;  %7364 = vmatprep.mubr.msk.bf16.mxu0 %vm1567_vm7, %v8444_v1  ;;  %v6638_v61 = vld [vmem:[%s8737_s26 + $0x10] sm:$0xf] }
0x1a2d   : > { %7362 = vmatprep.subr.bf16.mxu0 %v7641_v9 }
0x1a30   : > { %7363 = vmatpush3.bf16.msra.mxu0 %v7641_v9 }
0x1a33   : > { %7365 = vmatmul.mubr.msk.bf16.vlgmr.msra.gmra.mxu0 %vm1567_vm7, %v8440_v23 }
0x1aeb   : > { %v7342_v44 = vpop.f32.mrf.mxu0 }
0x1aec   : > { %v4451_v3 = vadd.f32 %v8476_v63, %v7342_v44 }
0x1aed   : > { %v4442_v10 = vpop.f32.mrf.mxu0 }
0x1aee   : > { %v4443_v38 = vadd.f32 %v8476_v63, %v4442_v10  ;;  %v4462_v32 = vsel %vm2355_vm13, %v4451_v3, -inf  ;;  %v6644_v10 = vld [vmem:[%s8734_s15 + $0x5] ss:$0 sm:$0xff] }
0x1aef   : > { %v7343_v11 = vpop.f32.mrf.mxu0 }
0x1af0   : > { %v4456_v35 = vsel %vm2348_vm12, %v4443_v38, -inf }
0x1af1   : > { %v4445_v13 = vpop.f32.mrf.mxu0  ;;  %4457 = vmax.xlane.f32.xlu1 %v4456_v35 }
0x1af2   : > { %v4446_v12 = vadd.f32 %v8476_v63, %v4445_v13 }
0x1af3   : > { %v7366_v14 = vpop.f32.mrf.mxu0 }
0x1af4   : > { %v4695_v15 = vadd.f32 %v7366_v14, %v6654_v4  ;;  %v4459_v16 = vsel %vm2348_vm12, %v4446_v12, -inf }
0x1af5   : > { %v4686_v7 = vpop.f32.mrf.mxu0  ;;  %4460 = vmax.xlane.f32.xlu0 %v4459_v16  ;;  %4463 = vmax.xlane.f32.xlu1 %v4462_v32 }
0x1af6   : > { %v4779_v17 = vpack.c.bf16 %v4695_v15, %v4695_v15  ;;  %v4687_v37 = vadd.f32 %v6654_v4, %v4686_v7 }
0x1af7   : > { %v7367_v18 = vpop.f32.mrf.mxu0 }
0x1af8   : > { %v4790_v5 = vsel %vm2287_vm9, %v4779_v17, 0  ;;  %7532 = vmatprep.subr.msk.bf16.mxu0 %vm2287_vm9, %v4779_v17 }
0x1af9   : > { %v4689_v19 = vpop.f32.mrf.mxu0  ;;  %7377 = vmatpush3.bf16.xpose.msra.mxu0 %v4790_v5 }
0x1afa   : > { %v4690_v24 = vadd.f32 %v6654_v4, %v4689_v19  ;;  %v6664_v4 = vld [vmem:[%s8735_s16 + $0x5] ss:$0 sm:$0xff] }
0x1afc   : > { %v4778_v25 = vpack.c.bf16 %v4690_v24, %v4687_v37 }
0x1afe   : > { %7533 = vmatprep.subr.msk.bf16.mxu0 %vm2287_vm9, %v4778_v25  ;;  %v4787_v26 = vsel %vm2287_vm9, %v4778_v25, 0 }
0x1b01   : > { %7379 = vmatpush3.bf16.xpose.msra.mxu0 %v4787_v26  ;;  %v5002_v26 = vsel %vm2841_vm14, %v6638_v61, 0 }
0x1b02   : > { %7535 = vmatprep.subr.msk.bf16.mxu0 %vm2841_vm14, %v6638_v61 }
0x1b7a   : > { %v4458_v43 = vpop.xlane.xlu1 %4457 }
0x1b7b   : > { %v4465_v27 = vsub.f32 %v4443_v38, %v4458_v43  ;;  %v7646_v43 = vld [vmem:[%s7964_s27 + $0x68] sm:$0xff]  }
0x1b7d   : > { %v4468_v39 = vmul.f32 1.442695, %v4465_v27 }
0x1b7e   : > { %v4461_v53 = vpop.xlane.xlu0 %4460  ;;  %v4464_v0 = vpop.xlane.xlu1 %4463 }
0x1b7f   : > { %7766 = vpow2.f32 %v4468_v39  ;;  %v4466_v28 = vsub.f32 %v4446_v12, %v4461_v53  ;;  %v4467_v29 = vsub.f32 %v4451_v3, %v4464_v0 }
0x1b81   : > { %v4470_v30 = vmul.f32 1.442695, %v4466_v28  ;;  %v4472_v31 = vmul.f32 1.442695, %v4467_v29  ;;  %v7647_v29 = vld [vmem:[%s7964_s27 + $0x60] sm:$0xff]  }
0x1b83   : > { %7768 = vpow2.f32 %v4470_v30 }
0x1b84   : > { %7770 = vpow2.f32 %v4472_v31 }
0x1b8c   : > { %v7767_v33 = vpop.eup %7766 }
0x1b8d   : > { %v4474_v34 = vsel %vm2348_vm12, %v7767_v33, 0.0 }
0x1b8e   : > { %4475 = vadd.xlane.f32.xlu0 %v4474_v34 }
0x1b90   : > { %v7769_v36 = vpop.eup %7768 }
0x1b91   : > { %v7771_v40 = vpop.eup %7770  ;;  %v4477_v42 = vsel %vm2348_vm12, %v7769_v36, 0.0 }
0x1b92   : > { %4478 = vadd.xlane.f32.xlu1 %v4477_v42  ;;  %v4480_v22 = vsel %vm2355_vm13, %v7771_v40, 0.0 }
0x1b93   : > { %4481 = vadd.xlane.f32.xlu0 %v4480_v22 }
0x1c17   : > { %v4476_v46 = vpop.xlane.xlu0 %4475 }
0x1c18   : > { %7772 = vrcp.f32 %v4476_v46 }
0x1c1b   : > { %v4479_v47 = vpop.xlane.xlu1 %4478 }
0x1c1c   : > { %v4482_v48 = vpop.xlane.xlu0 %4481  ;;  %7774 = vrcp.f32 %v4479_v47 }
0x1c1d   : > { %7776 = vrcp.f32 %v4482_v48 }
0x1c25   : > { %v7773_v49 = vpop.eup %7772 }
0x1c26   : > { %v4486_v52 = vmul.f32 %v7773_v49, %v7767_v33 }
0x1c29   : > { %v7775_v50 = vpop.eup %7774 }
0x1c2a   : > { %v7777_v51 = vpop.eup %7776  ;;  %v4487_v54 = vmul.f32 %v7775_v50, %v7769_v36 }
0x1c2b   : > { %v4488_v55 = vmul.f32 %v7777_v51, %v7771_v40  ;;  %v6693_v51 = vld [vmem:[%s8733_s11 + $0x6] ss:$0 sm:$0xff] }
0x1c2c   : > { %v4489_v56 = vpack.c.bf16 %v4487_v54, %v4486_v52 }
0x1c2d   : > { %v4490_v57 = vpack.c.bf16 %v4488_v55, %v4488_v55 }
0x1c2e   : > { %7348 = vmatprep.mubr.msk.bf16.mxu1 %vm2348_vm12, %v4489_v56 }
0x1c2f   : > { %7349 = vmatmul.mubr.msk.bf16.vlgmr.msra.gmra.mxu1 %vm2348_vm12, %v4490_v57 }
0x1c30   : > { %7353 = vmatpush3.bf16.msra.mxu1 %v7642_v45  ;;  %7356 = vmatprep.mubr.msk.bf16.mxu1 %vm1567_vm7, %v8444_v1 }
0x1c31   : > { %7354 = vmatprep.subr.bf16.mxu1 %v7643_v58 }
0x1c34   : > { %7355 = vmatpush3.bf16.msra.mxu1 %v7643_v58 }
0x1c35   : > { %7368 = vmatprep.subr.bf16.mxu1 %v7644_v59 }
0x1c37   : > { %7357 = vmatmul.mubr.msk.bf16.vlgmr.msra.gmra.mxu1 %vm1567_vm7, %v8440_v23 }
0x1c38   : > { %7369 = vmatpush3.bf16.msra.mxu1 %v7644_v59  ;;  %7372 = vmatprep.mubr.msk.bf16.mxu1 %vm1567_vm7, %v8444_v1 }
0x1c39   : > { %7370 = vmatprep.subr.bf16.mxu1 %v7645_v60 }
0x1c3c   : > { %7371 = vmatpush3.bf16.msra.mxu1 %v7645_v60 }
0x1c3f   : > { %7373 = vmatmul.mubr.msk.bf16.vlgmr.msra.gmra.mxu1 %vm1567_vm7, %v8440_v23 }
0x1cef   : > { %v7350_v62 = vpop.f32.mrf.mxu1 }
0x1cf0   : > { %v4551_v28 = vpack.c.bf16 %v7350_v62, %v7350_v62 }
0x1cf1   : > { %v4536_v2 = vpop.f32.mrf.mxu1 }
0x1cf3   : > { %v7351_v41 = vpop.f32.mrf.mxu1 }
0x1cf5   : > { %v4539_v9 = vpop.f32.mrf.mxu1 }
0x1cf6   : > { %v4550_v24 = vpack.c.bf16 %v4539_v9, %v4536_v2 }
0x1cf7   : > { %v7358_v44 = vpop.f32.mrf.mxu1 }
0x1cf8   : > { %v4622_v11 = vadd.f32 %v7358_v44, %v6644_v10 }
0x1cf9   : > { %v4613_v38 = vpop.f32.mrf.mxu1 }
0x1cfa   : > { %v4614_v35 = vadd.f32 %v6644_v10, %v4613_v38  ;;  %v4775_v14 = vmul.f32 0.35355338, %v4622_v11 }
0x1cfb   : > { %v7359_v3 = vpop.f32.mrf.mxu1 }
0x1cfc   : > { %v4773_v16 = vmul.f32 0.35355338, %v4614_v35  ;;  %v4777_v19 = vpack.c.bf16 %v4775_v14, %v4775_v14 }
0x1cfd   : > { %v4616_v13 = vpop.f32.mrf.mxu1 }
0x1cfe   : > { %v4617_v12 = vadd.f32 %v6644_v10, %v4616_v13 }
0x1cff   : > { %v7374_v15 = vpop.f32.mrf.mxu1 }
0x1d00   : > { %v4774_v32 = vmul.f32 0.35355338, %v4617_v12  ;;  %v4768_v7 = vadd.f32 %v7374_v15, %v6664_v4 }
0x1d01   : > { %v4759_v17 = vpop.f32.mrf.mxu1 }
0x1d02   : > { %v4776_v18 = vpack.c.bf16 %v4774_v32, %v4773_v16  ;;  %v4876_v5 = vpack.c.bf16 %v4768_v7, %v4768_v7  ;;  %v4760_v39 = vadd.f32 %v6664_v4, %v4759_v17 }
0x1d03   : > { %v7375_v37 = vpop.f32.mrf.mxu1 }
0x1d04   : > { %v4884_v25 = vand.u32 %v4876_v5, %v8194_v6  ;;  %7380 = vmatprep.mubr.msk.bf16.mxu0 %vm2287_vm9, %v4776_v18 }
0x1d05   : > { %v4762_v27 = vpop.f32.mrf.mxu1  ;;  %7381 = vmatmul.mubr.msk.bf16.vlgmr.msra.gmra.mxu0 %vm2287_vm9, %v4777_v19 }
0x1d06   : > { %v4763_v53 = vadd.f32 %v6664_v4, %v4762_v27  ;;  %7384 = vmatprep.subr.bf16.mxu1 %v4884_v25  ;;  %7400 = vmatprep.mubr.msk.bf16.mxu0 %vm2287_vm9, %v4550_v24 }
0x1d07   : > { %7385 = vmatpush3.bf16.msra.mxu1 %v4884_v25  ;;  %7399 = vmatpush3.bf16.msra.mxu0 %v5002_v26 }
0x1d08   : > { %v4875_v0 = vpack.c.bf16 %v4763_v53, %v4760_v39  ;;  %7412 = vmatprep.subr.bf16.mxu0 %v7646_v43  ;;  %v6673_v39 = vld [vmem:[%s8737_s26 + $0x14] sm:$0xf] }
0x1d09   : > { %v4945_v53 = vsel %vm2841_vm14, %v6673_v39, 0 }
0x1d0a   : > { %7386 = vmatprep.subr.bf16.mxu1 %v4875_v0 }
0x1d0b   : > { %7387 = vmatpush3.bf16.msra.mxu1 %v4875_v0  ;;  %v7648_v0 = vld [vmem:[%s7959_s20 + $0x68] sm:$0xff]  }
0x1d0c   : > { %7534 = vmatprep.subr.msk.bf16.mxu1 %vm2841_vm14, %v6673_v39 }
0x1d0d   : > { %7401 = vmatmul.mubr.msk.bf16.vlgmr.msra.gmra.mxu0 %vm2287_vm9, %v4551_v28 }
0x1d0e   : > { %7413 = vmatpush3.bf16.msra.mxu0 %v7646_v43  ;;  %7416 = vmatprep.mubr.msk.bf16.mxu0 %vm1567_vm7, %v8444_v1 }
0x1d0f   : > { %7414 = vmatprep.subr.bf16.mxu0 %v7647_v29 }
0x1d12   : > { %7415 = vmatpush3.bf16.msra.mxu0 %v7647_v29 }
0x1d15   : > { %7417 = vmatmul.mubr.msk.bf16.vlgmr.msra.gmra.mxu0 %vm1567_vm7, %v8440_v23 }
0x1dc5   : > { %v7382_v30 = vpop.f32.mrf.mxu0 }
0x1dc6   : > { %v4835_v36 = vadd.f32 %v8476_v63, %v7382_v30 }
0x1dc7   : > { %v4826_v31 = vpop.f32.mrf.mxu0 }
0x1dc8   : > { %v4827_v33 = vadd.f32 %v8476_v63, %v4826_v31  ;;  %v4846_v47 = vsel %vm2355_vm13, %v4835_v36, -inf }
0x1dc9   : > { %v7383_v34 = vpop.f32.mrf.mxu0 }
0x1dca   : > { %v4840_v40 = vsel %vm2348_vm12, %v4827_v33, -inf }
0x1dcb   : > { %v4829_v42 = vpop.f32.mrf.mxu0  ;;  %4841 = vmax.xlane.f32.xlu1 %v4840_v40  ;;  %v7650_v40 = vld [vmem:[%s8730_s2 + $0x68] sm:$0xff]  }
0x1dcc   : > { %v4830_v22 = vadd.f32 %v8476_v63, %v4829_v42  ;;  %v7651_v42 = vld [vmem:[%s8730_s2 + $0x60] sm:$0xff]  }
0x1dcd   : > { %v8526_v45 = vpop.f32.mrf.mxu0 }
0x1dce   : > { %v4843_v46 = vsel %vm2348_vm12, %v4830_v22, -inf }
0x1dcf   : > { %4844 = vmax.xlane.f32.xlu0 %v4843_v46  ;;  %4847 = vmax.xlane.f32.xlu1 %v4846_v47  ;;  %v8530_v48 = vpop.f32.mrf.mxu0 }
0x1dd1   : > { %v7403_v49 = vpop.f32.mrf.mxu0 }
0x1dd3   : > { %v8532_v50 = vpop.f32.mrf.mxu0 }
0x1dd5   : > { %v7418_v52 = vpop.f32.mrf.mxu0 }
0x1dd6   : > { %v5193_v54 = vadd.f32 %v7418_v52, %v6693_v51 }
0x1dd7   : > { %v5184_v55 = vpop.f32.mrf.mxu0 }
0x1dd8   : > { %v5277_v56 = vpack.c.bf16 %v5193_v54, %v5193_v54  ;;  %v5185_v60 = vadd.f32 %v6693_v51, %v5184_v55  ;;  %v6683_v54 = vld [vmem:[%s8734_s15 + $0x6] ss:$0 sm:$0xff] }
0x1dd9   : > { %v7419_v57 = vpop.f32.mrf.mxu0 }
0x1dda   : > { %v5288_v58 = vsel %vm2287_vm9, %v5277_v56, 0  ;;  %7536 = vmatprep.subr.msk.bf16.mxu0 %vm2287_vm9, %v5277_v56 }
0x1ddb   : > { %v5187_v59 = vpop.f32.mrf.mxu0  ;;  %7429 = vmatpush3.bf16.xpose.msra.mxu0 %v5288_v58 }
0x1ddc   : > { %v5188_v61 = vadd.f32 %v6693_v51, %v5187_v59 }
0x1dde   : > { %v5276_v62 = vpack.c.bf16 %v5188_v61, %v5185_v60  ;;  %v6703_v60 = vld [vmem:[%s8735_s16 + $0x6] ss:$0 sm:$0xff] }
0x1de0   : > { %7537 = vmatprep.subr.msk.bf16.mxu0 %vm2287_vm9, %v5276_v62  ;;  %v5285_v2 = vsel %vm2287_vm9, %v5276_v62, 0 }
0x1de3   : > { %7431 = vmatpush3.bf16.xpose.msra.mxu0 %v5285_v2 }
0x1e54   : > { %v4842_v41 = vpop.xlane.xlu1 %4841 }
0x1e55   : > { %v4849_v9 = vsub.f32 %v4827_v33, %v4842_v41 }
0x1e57   : > { %v4852_v44 = vmul.f32 1.442695, %v4849_v9 }
0x1e58   : > { %v4845_v10 = vpop.xlane.xlu0 %4844  ;;  %v4848_v38 = vpop.xlane.xlu1 %4847 }
0x1e59   : > { %7778 = vpow2.f32 %v4852_v44  ;;  %v4850_v11 = vsub.f32 %v4830_v22, %v4845_v10  ;;  %v4851_v3 = vsub.f32 %v4835_v36, %v4848_v38  ;;  %v7649_v36 = vld [vmem:[%s7959_s20 + $0x60] sm:$0xff]   ;;  %v7652_v22 = vld [vmem:[%s7959_s20 + $0x78] sm:$0xff]  }
0x1e5a   : > { %7450 = vmatprep.subr.bf16.mxu0 %v7652_v22 }
0x1e5b   : > { %v4854_v35 = vmul.f32 1.442695, %v4850_v11  ;;  %v4856_v13 = vmul.f32 1.442695, %v4851_v3 }
0x1e5d   : > { %7780 = vpow2.f32 %v4854_v35 }
0x1e5e   : > { %7782 = vpow2.f32 %v4856_v13 }
0x1e66   : > { %v7779_v4 = vpop.eup %7778 }
0x1e67   : > { %v4858_v12 = vsel %vm2348_vm12, %v7779_v4, 0.0 }
0x1e68   : > { %4859 = vadd.xlane.f32.xlu0 %v4858_v12 }
0x1e6a   : > { %v7781_v14 = vpop.eup %7780 }
0x1e6b   : > { %v7783_v15 = vpop.eup %7782  ;;  %v4861_v16 = vsel %vm2348_vm12, %v7781_v14, 0.0 }
0x1e6c   : > { %4862 = vadd.xlane.f32.xlu1 %v4861_v16  ;;  %v4864_v32 = vsel %vm2355_vm13, %v7783_v15, 0.0  ;;  %v7654_v16 = vld [vmem:[%s8730_s2 + $0x78] sm:$0xff]  }
0x1e6d   : > { %4865 = vadd.xlane.f32.xlu0 %v4864_v32 }
0x1ef1   : > { %v4860_v7 = vpop.xlane.xlu0 %4859 }
0x1ef2   : > { %7784 = vrcp.f32 %v4860_v7  ;;  %v7655_v7 = vld [vmem:[%s8730_s2 + $0x70] sm:$0xff]  }
0x1ef5   : > { %v4863_v17 = vpop.xlane.xlu1 %4862 }
0x1ef6   : > { %v4866_v18 = vpop.xlane.xlu0 %4865  ;;  %7786 = vrcp.f32 %v4863_v17 }
0x1ef7   : > { %7788 = vrcp.f32 %v4866_v18 }
0x1eff   : > { %v7785_v5 = vpop.eup %7784 }
0x1f00   : > { %v4870_v24 = vmul.f32 %v7785_v5, %v7779_v4  ;;  %v7653_v4 = vld [vmem:[%s7959_s20 + $0x70] sm:$0xff]  }
0x1f03   : > { %v7787_v19 = vpop.eup %7786 }
0x1f04   : > { %v7789_v37 = vpop.eup %7788  ;;  %v4871_v25 = vmul.f32 %v7787_v19, %v7781_v14 }
0x1f05   : > { %v4872_v26 = vmul.f32 %v7789_v37, %v7783_v15 }
0x1f06   : > { %v4873_v43 = vpack.c.bf16 %v4871_v25, %v4870_v24 }
0x1f07   : > { %v4874_v27 = vpack.c.bf16 %v4872_v26, %v4872_v26  ;;  %v6720_v26 = vld [vmem:[%s8734_s15 + $0x7] ss:$0 sm:$0xff] }
0x1f08   : > { %7388 = vmatprep.mubr.msk.bf16.mxu1 %vm2348_vm12, %v4873_v43 }
0x1f09   : > { %7389 = vmatmul.mubr.msk.bf16.vlgmr.msra.gmra.mxu1 %vm2348_vm12, %v4874_v27 }
0x1f0a   : > { %7393 = vmatpush3.bf16.msra.mxu1 %v4945_v53 }
0x1f0b   : > { %7404 = vmatprep.subr.bf16.mxu1 %v7648_v0 }
0x1fc9   : > { %v7390_v28 = vpop.f32.mrf.mxu1 }
0x1fca   : > { %v4935_v34 = vpack.c.bf16 %v7390_v28, %v7390_v28 }
0x1fcb   : > { %v4920_v29 = vpop.f32.mrf.mxu1 }
0x1fcd   : > { %v7391_v30 = vpop.f32.mrf.mxu1 }
0x1fcf   : > { %v4923_v31 = vpop.f32.mrf.mxu1 }
0x1fd0   : > { %v4934_v33 = vpack.c.bf16 %v4923_v31, %v4920_v29 }
0x1fd2   : > { %7394 = vmatprep.mubr.msk.bf16.mxu1 %vm2287_vm9, %v4934_v33  ;;  %v6740_v33 = vld [vmem:[%s8735_s16 + $0x7] ss:$0 sm:$0xff] }
0x1fd3   : > { %7395 = vmatmul.mubr.msk.bf16.vlgmr.msra.gmra.mxu1 %vm2287_vm9, %v4935_v34 }
0x1fd4   : > { %7405 = vmatpush3.bf16.msra.mxu1 %v7648_v0  ;;  %7408 = vmatprep.mubr.msk.bf16.mxu1 %vm1567_vm7, %v8444_v1 }
0x1fd5   : > { %7406 = vmatprep.subr.bf16.mxu1 %v7649_v36 }
0x1fd8   : > { %7407 = vmatpush3.bf16.msra.mxu1 %v7649_v36 }
0x1fd9   : > { %7420 = vmatprep.subr.bf16.mxu1 %v7650_v40 }
0x1fdb   : > { %7409 = vmatmul.mubr.msk.bf16.vlgmr.msra.gmra.mxu1 %vm1567_vm7, %v8440_v23 }
0x1fdc   : > { %7421 = vmatpush3.bf16.msra.mxu1 %v7650_v40  ;;  %7424 = vmatprep.mubr.msk.bf16.mxu1 %vm1567_vm7, %v8444_v1 }
0x1fdd   : > { %7422 = vmatprep.subr.bf16.mxu1 %v7651_v42 }
0x1fe0   : > { %7423 = vmatpush3.bf16.msra.mxu1 %v7651_v42 }
0x1fe3   : > { %7425 = vmatmul.mubr.msk.bf16.vlgmr.msra.gmra.mxu1 %vm1567_vm7, %v8440_v23 }
0x2093   : > { %v8562_v46 = vpop.f32.mrf.mxu1 }
0x2095   : > { %v8564_v47 = vpop.f32.mrf.mxu1 }
0x2097   : > { %v7397_v49 = vpop.f32.mrf.mxu1 }
0x2099   : > { %v8566_v51 = vpop.f32.mrf.mxu1 }
0x209b   : > { %v7410_v52 = vpop.f32.mrf.mxu1 }
0x209c   : > { %v5120_v56 = vadd.f32 %v7410_v52, %v6683_v54 }
0x209d   : > { %v5111_v55 = vpop.f32.mrf.mxu1 }
0x209e   : > { %v5112_v58 = vadd.f32 %v6683_v54, %v5111_v55  ;;  %v5273_v62 = vmul.f32 0.35355338, %v5120_v56 }
0x209f   : > { %v7411_v57 = vpop.f32.mrf.mxu1 }
0x20a0   : > { %v5271_v41 = vmul.f32 0.35355338, %v5112_v58  ;;  %v5275_v3 = vpack.c.bf16 %v5273_v62, %v5273_v62 }
0x20a1   : > { %v5114_v59 = vpop.f32.mrf.mxu1 }
0x20a2   : > { %v5115_v61 = vadd.f32 %v6683_v54, %v5114_v59 }
0x20a3   : > { %v7426_v2 = vpop.f32.mrf.mxu1 }
0x20a4   : > { %v5272_v9 = vmul.f32 0.35355338, %v5115_v61  ;;  %v5266_v44 = vadd.f32 %v7426_v2, %v6703_v60 }
0x20a5   : > { %v5257_v10 = vpop.f32.mrf.mxu1 }
0x20a6   : > { %v5274_v38 = vpack.c.bf16 %v5272_v9, %v5271_v41  ;;  %v5374_v11 = vpack.c.bf16 %v5266_v44, %v5266_v44  ;;  %v5258_v14 = vadd.f32 %v6703_v60, %v5257_v10 }
0x20a7   : > { %v7427_v35 = vpop.f32.mrf.mxu1 }
0x20a8   : > { %v5382_v13 = vand.u32 %v5374_v11, %v8194_v6  ;;  %7432 = vmatprep.mubr.msk.bf16.mxu0 %vm2287_vm9, %v5274_v38 }
0x20a9   : > { %v5260_v12 = vpop.f32.mrf.mxu1  ;;  %7433 = vmatmul.mubr.msk.bf16.vlgmr.msra.gmra.mxu0 %vm2287_vm9, %v5275_v3 }
0x20aa   : > { %v5261_v15 = vadd.f32 %v6703_v60, %v5260_v12  ;;  %7436 = vmatprep.subr.bf16.mxu1 %v5382_v13  ;;  %7451 = vmatpush3.bf16.msra.mxu0 %v7652_v22 }
0x20ab   : > { %7454 = vmatprep.mubr.msk.bf16.mxu0 %vm1567_vm7, %v8444_v1  ;;  %7437 = vmatpush3.bf16.msra.mxu1 %v5382_v13 }
0x20ac   : > { %v5373_v32 = vpack.c.bf16 %v5261_v15, %v5258_v14  ;;  %7452 = vmatprep.subr.bf16.mxu0 %v7653_v4 }
0x20ae   : > { %7438 = vmatprep.subr.bf16.mxu1 %v5373_v32  ;;  %7453 = vmatpush3.bf16.msra.mxu0 %v7653_v4 }
0x20af   : > { %7439 = vmatpush3.bf16.msra.mxu1 %v5373_v32  ;;  %7466 = vmatprep.subr.bf16.mxu0 %v7654_v16 }
0x20b1   : > { %7455 = vmatmul.mubr.msk.bf16.vlgmr.msra.gmra.mxu0 %vm1567_vm7, %v8440_v23 }
0x20b2   : > { %7467 = vmatpush3.bf16.msra.mxu0 %v7654_v16  ;;  %7470 = vmatprep.mubr.msk.bf16.mxu0 %vm1567_vm7, %v8444_v1 }
0x20b3   : > { %7468 = vmatprep.subr.bf16.mxu0 %v7655_v7 }
0x20b6   : > { %7469 = vmatpush3.bf16.msra.mxu0 %v7655_v7 }
0x20b9   : > { %7471 = vmatmul.mubr.msk.bf16.vlgmr.msra.gmra.mxu0 %vm1567_vm7, %v8440_v23 }
0x2169   : > { %v7434_v17 = vpop.f32.mrf.mxu0 }
0x216a   : > { %v5333_v37 = vadd.f32 %v8476_v63, %v7434_v17 }
0x216b   : > { %v5324_v18 = vpop.f32.mrf.mxu0 }
0x216c   : > { %v5325_v5 = vadd.f32 %v8476_v63, %v5324_v18  ;;  %v5344_v0 = vsel %vm2355_vm13, %v5333_v37, -inf }
0x216d   : > { %v7435_v19 = vpop.f32.mrf.mxu0 }
0x216e   : > { %v5338_v24 = vsel %vm2348_vm12, %v5325_v5, -inf }
0x216f   : > { %v5327_v25 = vpop.f32.mrf.mxu0  ;;  %5339 = vmax.xlane.f32.xlu1 %v5338_v24 }
0x2170   : > { %v5328_v43 = vadd.f32 %v8476_v63, %v5327_v25  ;;  %v6712_v25 = vld [vmem:[%s8737_s26 + $0x18] sm:$0xf] }
0x2171   : > { %v7456_v27 = vpop.f32.mrf.mxu0  ;;  %7538 = vmatprep.subr.msk.bf16.mxu1 %vm2841_vm14, %v6712_v25 }
0x2172   : > { %v8589_v39 = vadd.f32 %v7456_v27, %v6720_v26  ;;  %v5341_v53 = vsel %vm2348_vm12, %v5328_v43, -inf }
0x2173   : > { %v5555_v28 = vpop.f32.mrf.mxu0  ;;  %5342 = vmax.xlane.f32.xlu0 %v5341_v53  ;;  %5345 = vmax.xlane.f32.xlu1 %v5344_v0 }
0x2174   : > { %v5556_v30 = vadd.f32 %v6720_v26, %v5555_v28 }
0x2175   : > { %v7457_v29 = vpop.f32.mrf.mxu0 }
0x2176   : > { %v8594_v40 = vmul.f32 0.35355338, %v5556_v30 }
0x2177   : > { %v5558_v31 = vpop.f32.mrf.mxu0 }
0x2178   : > { %v5559_v34 = vadd.f32 %v6720_v26, %v5558_v31  ;;  %v5443_v26 = vsel %vm2841_vm14, %v6712_v25, 0  ;;  %v7657_v31 = vld [vmem:[%s7964_s27 + $0x70] sm:$0xff]  }
0x2179   : > { %v7472_v36 = vpop.f32.mrf.mxu0 }
0x217a   : > { %v8596_v42 = vmul.f32 0.35355338, %v5559_v34  ;;  %v5710_v22 = vadd.f32 %v7472_v36, %v6740_v33  ;;  %v5039_v36 = vadd.f32 %v8530_v48, %v8564_v47 }
0x217b   : > { %v5701_v49 = vpop.f32.mrf.mxu0 }
0x217c   : > { %v5718_v52 = vpack.c.bf16 %v8596_v42, %v8594_v40  ;;  %v5818_v54 = vpack.c.bf16 %v5710_v22, %v5710_v22  ;;  %v5702_v58 = vadd.f32 %v6740_v33, %v5701_v49  ;;  %v6730_v40 = vld [vmem:[%s8733_s11 + $0x7] ss:$0 sm:$0xff] }
0x217d   : > { %v7473_v55 = vpop.f32.mrf.mxu0 }
0x217e   : > { %v5826_v56 = vand.u32 %v5818_v54, %v8194_v6 }
0x217f   : > { %v5704_v57 = vpop.f32.mrf.mxu0 }
0x2180   : > { %v5705_v59 = vadd.f32 %v6740_v33, %v5704_v57  ;;  %7482 = vmatprep.subr.bf16.mxu0 %v5826_v56  ;;  %v5047_v33 = vadd.f32 %v8526_v45, %v8562_v46 }
0x2181   : > { %7483 = vmatpush3.bf16.msra.mxu0 %v5826_v56 }
0x2182   : > { %v5817_v60 = vpack.c.bf16 %v5705_v59, %v5702_v58 }
0x2184   : > { %7484 = vmatprep.subr.bf16.mxu0 %v5817_v60 }
0x2185   : > { %7485 = vmatpush3.bf16.msra.mxu0 %v5817_v60 }
0x21f8   : > { %v5340_v61 = vpop.xlane.xlu1 %5339 }
0x21f9   : > { %v5347_v62 = vsub.f32 %v5325_v5, %v5340_v61 }
0x21fb   : > { %v5350_v2 = vmul.f32 1.442695, %v5347_v62 }
0x21fc   : > { %v5343_v41 = vpop.xlane.xlu0 %5342  ;;  %v5346_v9 = vpop.xlane.xlu1 %5345 }
0x21fd   : > { %7790 = vpow2.f32 %v5350_v2  ;;  %v5348_v44 = vsub.f32 %v5328_v43, %v5343_v41  ;;  %v5349_v10 = vsub.f32 %v5333_v37, %v5346_v9  ;;  %v7656_v43 = vld [vmem:[%s7964_s27 + $0x78] sm:$0xff]  }
0x21ff   : > { %v5352_v38 = vmul.f32 1.442695, %v5348_v44  ;;  %v5354_v11 = vmul.f32 1.442695, %v5349_v10 }
0x2201   : > { %7792 = vpow2.f32 %v5352_v38 }
0x2202   : > { %7794 = vpow2.f32 %v5354_v11 }
0x220a   : > { %v7791_v6 = vpop.eup %7790 }
0x220b   : > { %v5356_v3 = vsel %vm2348_vm12, %v7791_v6, 0.0 }
0x220c   : > { %5357 = vadd.xlane.f32.xlu0 %v5356_v3 }
0x220e   : > { %v7793_v35 = vpop.eup %7792 }
0x220f   : > { %v7795_v13 = vpop.eup %7794  ;;  %v5359_v4 = vsel %vm2348_vm12, %v7793_v35, 0.0 }
0x2210   : > { %5360 = vadd.xlane.f32.xlu1 %v5359_v4  ;;  %v5362_v12 = vsel %vm2355_vm13, %v7795_v13, 0.0 }
0x2211   : > { %5363 = vadd.xlane.f32.xlu0 %v5362_v12 }
0x2295   : > { %v5358_v14 = vpop.xlane.xlu0 %5357 }
0x2296   : > { %7796 = vrcp.f32 %v5358_v14 }
0x2299   : > { %v5361_v15 = vpop.xlane.xlu1 %5360 }
0x229a   : > { %v5364_v16 = vpop.xlane.xlu0 %5363  ;;  %7798 = vrcp.f32 %v5361_v15 }
0x229b   : > { %7800 = vrcp.f32 %v5364_v16 }
0x22a3   : > { %v7797_v32 = vpop.eup %7796 }
0x22a4   : > { %v5368_v18 = vmul.f32 %v7797_v32, %v7791_v6 }
0x22a7   : > { %v7799_v7 = vpop.eup %7798 }
0x22a8   : > { %v7801_v17 = vpop.eup %7800  ;;  %v5369_v5 = vmul.f32 %v7799_v7, %v7793_v35 }
0x22a9   : > { %v5370_v19 = vmul.f32 %v7801_v17, %v7795_v13 }
0x22aa   : > { %v5371_v37 = vpack.c.bf16 %v5369_v5, %v5368_v18 }
0x22ab   : > { %v5372_v24 = vpack.c.bf16 %v5370_v19, %v5370_v19 }
0x22ac   : > { %7440 = vmatprep.mubr.msk.bf16.mxu1 %vm2348_vm12, %v5371_v37 }
0x22ad   : > { %7441 = vmatmul.mubr.msk.bf16.vlgmr.msra.gmra.mxu1 %vm2348_vm12, %v5372_v24 }
0x22ae   : > { %7445 = vmatpush3.bf16.msra.mxu1 %v5443_v26 }
0x22af   : > { %7458 = vmatprep.subr.bf16.mxu1 %v7656_v43 }
0x236d   : > { %v7442_v27 = vpop.f32.mrf.mxu1 }
0x236e   : > { %v5433_v30 = vpack.c.bf16 %v7442_v27, %v7442_v27 }
0x236f   : > { %v5418_v53 = vpop.f32.mrf.mxu1 }
0x2371   : > { %v7443_v0 = vpop.f32.mrf.mxu1 }
0x2373   : > { %v5421_v28 = vpop.f32.mrf.mxu1 }
0x2374   : > { %v5432_v29 = vpack.c.bf16 %v5421_v28, %v5418_v53 }
0x2376   : > { %7446 = vmatprep.mubr.msk.bf16.mxu1 %vm2287_vm9, %v5432_v29 }
0x2377   : > { %7447 = vmatmul.mubr.msk.bf16.vlgmr.msra.gmra.mxu1 %vm2287_vm9, %v5433_v30 }
0x2378   : > { %7459 = vmatpush3.bf16.msra.mxu1 %v7656_v43  ;;  %7462 = vmatprep.mubr.msk.bf16.mxu1 %vm1567_vm7, %v8444_v1 }
0x2379   : > { %7460 = vmatprep.subr.bf16.mxu1 %v7657_v31 }
0x237c   : > { %7461 = vmatpush3.bf16.msra.mxu1 %v7657_v31  ;;  %v6749_v31 = vld [vmem:[%s8737_s26 + $0x1c] sm:$0xf] }
0x237d   : > { %7541 = vmatprep.subr.msk.bf16.mxu0 %vm2841_vm14, %v6749_v31 }
0x237f   : > { %7463 = vmatmul.mubr.msk.bf16.vlgmr.msra.gmra.mxu1 %vm1567_vm7, %v8440_v23  ;;  %v5042_v23 = vadd.f32 %v8532_v50, %v8566_v51  ;;  %v5717_v51 = vmul.f32 0.35355338, %v8589_v39 }
0x2380   : > { %7478 = vmatprep.mubr.msk.bf16.mxu1 %vm2287_vm9, %v5718_v52 }
0x2381   : > { %v5719_v61 = vpack.c.bf16 %v5717_v51, %v5717_v51 }
0x2437   : > { %v7448_v34 = vpop.f32.mrf.mxu1 }
0x2438   : > { %v8625_v22 = vadd.f32 %v7448_v34, %v5047_v33  ;;  %v5887_v33 = vsel %vm2841_vm14, %v6749_v31, 0 }
0x2439   : > { %v5479_v1 = vpop.f32.mrf.mxu1 }
0x243a   : > { %v8627_v49 = vadd.f32 %v5479_v1, %v5039_v36 }
0x243b   : > { %v7449_v54 = vpop.f32.mrf.mxu1 }
0x243d   : > { %v5482_v55 = vpop.f32.mrf.mxu1 }
0x243e   : > { %v8632_v42 = vadd.f32 %v5482_v55, %v5042_v23 }
0x243f   : > { %v7464_v52 = vpop.f32.mrf.mxu1 }
0x2440   : > { %v5637_v56 = vadd.f32 %v7464_v52, %v6730_v40 }
0x2441   : > { %v5628_v45 = vpop.f32.mrf.mxu1 }
0x2442   : > { %v5721_v46 = vpack.c.bf16 %v5637_v56, %v5637_v56  ;;  %v5629_v58 = vadd.f32 %v6730_v40, %v5628_v45  ;;  %v6753_v56 = vld [vmem:[%s8738_s1 + $0x1] ss:$0 sm:$0xff]  ;;  %s992_s1 = scalar_lea.vmem %s8039_s12, %s8744_s0 }
0x2443   : > { %v7465_v57 = vpop.f32.mrf.mxu1 }
0x2444   : > { %v5732_v48 = vsel %vm2287_vm9, %v5721_v46, 0  ;;  %7539 = vmatprep.subr.msk.bf16.mxu1 %vm2287_vm9, %v5721_v46 }
0x2445   : > { %v5631_v47 = vpop.f32.mrf.mxu1  ;;  %7475 = vmatpush3.bf16.xpose.msra.mxu1 %v5732_v48 }
0x2446   : > { %v5632_v59 = vadd.f32 %v6730_v40, %v5631_v47 }
0x2448   : > { %v5720_v60 = vpack.c.bf16 %v5632_v59, %v5629_v58 }
0x244a   : > { %7540 = vmatprep.subr.msk.bf16.mxu1 %vm2287_vm9, %v5720_v60  ;;  %v5729_v50 = vsel %vm2287_vm9, %v5720_v60, 0 }
0x244d   : > { %7477 = vmatpush3.bf16.xpose.msra.mxu1 %v5729_v50 }
0x2454   : > { %7479 = vmatmul.mubr.msk.bf16.vlgmr.msra.gmra.mxu1 %vm2287_vm9, %v5719_v61 }
0x2514   : > { %v7480_v62 = vpop.f32.mrf.mxu1 }
0x2515   : > { %v5777_v44 = vadd.f32 %v8476_v63, %v7480_v62 }
0x2516   : > { %v5768_v2 = vpop.f32.mrf.mxu1 }
0x2517   : > { %v5769_v41 = vadd.f32 %v8476_v63, %v5768_v2  ;;  %v5788_v39 = vsel %vm2355_vm13, %v5777_v44, -inf }
0x2518   : > { %v7481_v9 = vpop.f32.mrf.mxu1 }
0x2519   : > { %v5782_v10 = vsel %vm2348_vm12, %v5769_v41, -inf }
0x251a   : > { %v5771_v38 = vpop.f32.mrf.mxu1  ;;  %5783 = vmax.xlane.f32.xlu1 %v5782_v10 }
0x251b   : > { %v5772_v11 = vadd.f32 %v8476_v63, %v5771_v38 }
0x251d   : > { %v5785_v6 = vsel %vm2348_vm12, %v5772_v11, -inf }
0x251e   : > { %5786 = vmax.xlane.f32.xlu0 %v5785_v6  ;;  %5789 = vmax.xlane.f32.xlu1 %v5788_v39 }
0x25a3   : > { %v5784_v3 = vpop.xlane.xlu1 %5783 }
0x25a4   : > { %v5791_v35 = vsub.f32 %v5769_v41, %v5784_v3 }
0x25a6   : > { %v5794_v13 = vmul.f32 1.442695, %v5791_v35 }
0x25a7   : > { %v5787_v4 = vpop.xlane.xlu0 %5786  ;;  %v5790_v12 = vpop.xlane.xlu1 %5789 }
0x25a8   : > { %7802 = vpow2.f32 %v5794_v13  ;;  %v5792_v14 = vsub.f32 %v5772_v11, %v5787_v4  ;;  %v5793_v15 = vsub.f32 %v5777_v44, %v5790_v12  ;;  %v7658_v13 = vld [vmem:[%s8739_s7 + $0x18] sm:$0xff]   ;;  %v7659_v4 = vld [vmem:[%s8739_s7 + $0x10] sm:$0xff]  }
0x25a9   : > { %7496 = vmatprep.subr.bf16.mxu1 %v7658_v13 }
0x25aa   : > { %v5796_v16 = vmul.f32 1.442695, %v5792_v14  ;;  %v5798_v32 = vmul.f32 1.442695, %v5793_v15  ;;  %7497 = vmatpush3.bf16.msra.mxu1 %v7658_v13 }
0x25ab   : > { %7498 = vmatprep.subr.bf16.mxu1 %v7659_v4 }
0x25ac   : > { %7804 = vpow2.f32 %v5796_v16 }
0x25ad   : > { %7806 = vpow2.f32 %v5798_v32 }
0x25ae   : > { %7499 = vmatpush3.bf16.msra.mxu1 %v7659_v4 }
0x25b5   : > { %v7803_v7 = vpop.eup %7802 }
0x25b6   : > { %v5800_v63 = vsel %vm2348_vm12, %v7803_v7, 0.0 }
0x25b7   : > { %5801 = vadd.xlane.f32.xlu0 %v5800_v63 }
0x25b9   : > { %v7805_v17 = vpop.eup %7804 }
0x25ba   : > { %v7807_v18 = vpop.eup %7806  ;;  %v5803_v5 = vsel %vm2348_vm12, %v7805_v17, 0.0 }
0x25bb   : > { %5804 = vadd.xlane.f32.xlu1 %v5803_v5  ;;  %v5806_v19 = vsel %vm2355_vm13, %v7807_v18, 0.0 }
0x25bc   : > { %5807 = vadd.xlane.f32.xlu0 %v5806_v19 }
0x2640   : > { %v5802_v37 = vpop.xlane.xlu0 %5801 }
0x2641   : > { %7808 = vrcp.f32 %v5802_v37  ;;  %v6756_v37 = vld [vmem:[%s8740_s10 + $0x1] ss:$0 sm:$0xff] }
0x2644   : > { %v5805_v24 = vpop.xlane.xlu1 %5804 }
0x2645   : > { %v5808_v25 = vpop.xlane.xlu0 %5807  ;;  %7810 = vrcp.f32 %v5805_v24 }
0x2646   : > { %7812 = vrcp.f32 %v5808_v25 }
0x264e   : > { %v7809_v26 = vpop.eup %7808 }
0x264f   : > { %v5812_v53 = vmul.f32 %v7809_v26, %v7803_v7 }
0x2652   : > { %v7811_v43 = vpop.eup %7810 }
0x2653   : > { %v7813_v27 = vpop.eup %7812  ;;  %v5813_v0 = vmul.f32 %v7811_v43, %v7805_v17 }
0x2654   : > { %v5814_v28 = vmul.f32 %v7813_v27, %v7807_v18 }
0x2655   : > { %v5815_v29 = vpack.c.bf16 %v5813_v0, %v5812_v53  ;;  %v6757_v53 = vld [vmem:[%s8741_s18 + $0x1] ss:$0 sm:$0xff] }
0x2656   : > { %v5816_v30 = vpack.c.bf16 %v5814_v28, %v5814_v28 }
0x2657   : > { %7486 = vmatprep.mubr.msk.bf16.mxu0 %vm2348_vm12, %v5815_v29 }
0x2658   : > { %7487 = vmatmul.mubr.msk.bf16.vlgmr.msra.gmra.mxu0 %vm2348_vm12, %v5816_v30 }
0x2659   : > { %7491 = vmatpush3.bf16.msra.mxu0 %v5887_v33 }
0x2718   : > { %v7488_v34 = vpop.f32.mrf.mxu0 }
0x2719   : > { %v5877_v55 = vpack.c.bf16 %v7488_v34, %v7488_v34 }
0x271a   : > { %v5862_v36 = vpop.f32.mrf.mxu0 }
0x271c   : > { %v7489_v1 = vpop.f32.mrf.mxu0 }
0x271d   : > { %v7661_v1 = vld [vmem:[%s8742_s28 + $0x30] sm:$0xff]  }
0x271e   : > { %v5865_v54 = vpop.f32.mrf.mxu0 }
0x271f   : > { %v5876_v23 = vpack.c.bf16 %v5865_v54, %v5862_v36  ;;  %v7660_v36 = vld [vmem:[%s8742_s28 + $0x38] sm:$0xff]   ;;  %v7662_v54 = vld [vmem:[%s8742_s28 + $0x28] sm:$0xff]  }
0x2720   : > { %7504 = vmatprep.subr.bf16.mxu0 %v7660_v36 }
0x2721   : > { %7492 = vmatprep.mubr.msk.bf16.mxu0 %vm2287_vm9, %v5876_v23  ;;  %v7663_v23 = vld [vmem:[%s8742_s28 + $0x20] sm:$0xff]  }
0x2722   : > { %7493 = vmatmul.mubr.msk.bf16.vlgmr.msra.gmra.mxu0 %vm2287_vm9, %v5877_v55  ;;  %v6763_v55 = vld [vmem:[%s8743_s3 + $0x1] ss:$0 sm:$0xff] }
0x2723   : > { %7505 = vmatpush3.bf16.msra.mxu0 %v7660_v36 }
0x2724   : > { %7506 = vmatprep.subr.bf16.mxu0 %v7661_v1 }
0x2727   : > { %7507 = vmatpush3.bf16.msra.mxu0 %v7661_v1 }
0x2728   : > { %7508 = vmatprep.subr.bf16.mxu0 %v7662_v54 }
0x272b   : > { %7509 = vmatpush3.bf16.msra.mxu0 %v7662_v54 }
0x272c   : > { %7510 = vmatprep.subr.bf16.mxu0 %v7663_v23 }
0x272f   : > { %7511 = vmatpush3.bf16.msra.mxu0 %v7663_v23 }
0x27e2   : > { %v7494_v40 = vpop.f32.mrf.mxu0 }
0x27e3   : > { %v5939_v52 = vadd.f32 %v7494_v40, %v8625_v22 }
0x27e4   : > { %v5923_v45 = vpop.f32.mrf.mxu0 }
0x27e5   : > { %v5937_v46 = vadd.f32 %v5923_v45, %v8627_v49  ;;  %v5950_v48 = vadd.f32 %v6753_v56, %v5939_v52 }
0x27e6   : > { %v7495_v57 = vpop.f32.mrf.mxu0 }
0x27e7   : > { %v5948_v47 = vadd.f32 %v6753_v56, %v5937_v46  ;;  %v5953_v61 = vadd.f32 %v5950_v48, %v8432_v8 }
0x27e8   : > { %v5926_v58 = vpop.f32.mrf.mxu0 }
0x27e9   : > { %v5938_v59 = vadd.f32 %v5926_v58, %v8632_v42  ;;  %v5951_v60 = vadd.f32 %v5948_v47, %v8434_v20  ;;  %v5964_v49 = vsel %vm1574_vm8, %v5953_v61, 0.0 }
0x27eb   : > { %v5949_v50 = vadd.f32 %v6753_v56, %v5938_v59  ;;  %v5958_v51 = vsel %vm1567_vm7, %v5951_v60, 0.0 }
0x27ec   : > { %5959 = vadd.xlane.f32.xlu1 %v5958_v51 }
0x27ed   : > { %v5952_v22 = vadd.f32 %v5949_v50, %v8436_v21 }
0x27ef   : > { %v5961_v62 = vsel %vm1567_vm7, %v5952_v22, 0.0 }
0x27f0   : > { %5962 = vadd.xlane.f32.xlu0 %v5961_v62  ;;  %5965 = vadd.xlane.f32.xlu1 %v5964_v49 }
0x2875   : > { %v5960_v2 = vpop.xlane.xlu1 %5959 }
0x2876   : > { %v5967_v41 = vmul.f32 0.03125, %v5960_v2 }
0x2878   : > { %v5970_v9 = vsub.f32 %v5951_v60, %v5967_v41 }
0x2879   : > { %v5963_v42 = vpop.xlane.xlu0 %5962  ;;  %v5966_v20 = vpop.xlane.xlu1 %5965 }
0x287a   : > { %v5968_v44 = vmul.f32 0.03125, %v5963_v42  ;;  %v5969_v10 = vmul.f32 0.03125, %v5966_v20  ;;  %v5973_v38 = vmul.f32 %v5970_v9, %v5970_v9 }
0x287c   : > { %v5971_v8 = vsub.f32 %v5952_v22, %v5968_v44  ;;  %v5972_v11 = vsub.f32 %v5953_v61, %v5969_v10  ;;  %v5976_v21 = vsel %vm1567_vm7, %v5973_v38, 0.0 }
0x287d   : > { %5977 = vadd.xlane.f32.xlu0 %v5976_v21 }
0x287e   : > { %v5974_v6 = vmul.f32 %v5971_v8, %v5971_v8  ;;  %v5975_v39 = vmul.f32 %v5972_v11, %v5972_v11 }
0x2880   : > { %v5979_v3 = vsel %vm1567_vm7, %v5974_v6, 0.0  ;;  %v5982_v35 = vsel %vm1574_vm8, %v5975_v39, 0.0 }
0x2881   : > { %5980 = vadd.xlane.f32.xlu1 %v5979_v3  ;;  %5983 = vadd.xlane.f32.xlu0 %v5982_v35 }
0x2906   : > { %v5978_v12 = vpop.xlane.xlu0 %5977 }
0x2907   : > { %v5985_v14 = vmul.f32 0.03125, %v5978_v12 }
0x2909   : > { %v5988_v15 = vadd.f32 1e-05, %v5985_v14 }
0x290a   : > { %v5984_v16 = vpop.xlane.xlu0 %5983  ;;  %v5981_v32 = vpop.xlane.xlu1 %5980 }
0x290b   : > { %7814 = vrsqrt.f32 %v5988_v15  ;;  %v5987_v7 = vmul.f32 0.03125, %v5984_v16  ;;  %v5986_v63 = vmul.f32 0.03125, %v5981_v32 }
0x290d   : > { %v5990_v17 = vadd.f32 1e-05, %v5987_v7  ;;  %v5989_v18 = vadd.f32 1e-05, %v5986_v63 }
0x290f   : > { %7816 = vrsqrt.f32 %v5990_v17 }
0x2910   : > { %7818 = vrsqrt.f32 %v5989_v18 }
0x2918   : > { %v7815_v5 = vpop.eup %7814 }
0x2919   : > { %v5994_v19 = vmul.f32 %v7815_v5, %v5970_v9 }
0x291b   : > { %v6003_v27 = vmul.f32 %v6756_v37, %v5994_v19 }
0x291c   : > { %v7817_v24 = vpop.eup %7816 }
0x291d   : > { %v7819_v25 = vpop.eup %7818  ;;  %v5996_v26 = vmul.f32 %v7817_v24, %v5972_v11  ;;  %v6012_v30 = vadd.f32 %v6757_v53, %v6003_v27 }
0x291e   : > { %v5995_v43 = vmul.f32 %v7819_v25, %v5971_v8  ;;  %v6777_v8 = vld [vmem:[%s8024_s6 + $0x1] ss:$0 sm:$0xff] }
0x291f   : > { %v6005_v0 = vmul.f32 %v6756_v37, %v5996_v26 }
0x2920   : > { %v6004_v28 = vmul.f32 %v6756_v37, %v5995_v43 }
0x2921   : > { %v6014_v29 = vadd.f32 %v6757_v53, %v6005_v0 }
0x2922   : > { %v6013_v31 = vadd.f32 %v6757_v53, %v6004_v28 }
0x2923   : > { %v6016_v33 = vpack.c.bf16 %v6014_v29, %v6014_v29 }
0x2924   : > { %v6015_v34 = vpack.c.bf16 %v6013_v31, %v6012_v30 }
0x2926   : > { %7500 = vmatprep.mubr.msk.bf16.mxu1 %vm1567_vm7, %v6015_v34 }
0x2927   : > { %7501 = vmatmul.mubr.msk.bf16.vlgmr.msra.gmra.mxu1 %vm1567_vm7, %v6016_v33 }
0x29e7   : > { %v7502_v40 = vpop.f32.mrf.mxu1 }
0x29e8   : > { %v6091_v52 = vadd.f32 %v7502_v40, %v6763_v55 }
0x29e9   : > { %v6082_v56 = vpop.f32.mrf.mxu1 }
0x29ea   : > { %v6101_v45 = vmul.f32 0.70710677, %v6091_v52  ;;  %v6083_v46 = vadd.f32 %v6763_v55, %v6082_v56  ;;  %v6098_v62 = vmul.f32 0.5, %v6091_v52  ;;  %v6787_v52 = vld [vmem:[%s8034_s13 + $0x1] ss:$0 sm:$0xff] }
0x29eb   : > { %v7503_v57 = vpop.f32.mrf.mxu1 }
0x29ec   : > { %v6099_v48 = vmul.f32 0.70710677, %v6083_v46  ;;  %7820 = verf.f32 %v6101_v45  ;;  %v6096_v49 = vmul.f32 0.5, %v6083_v46 }
0x29ed   : > { %v6085_v47 = vpop.f32.mrf.mxu1 }
0x29ee   : > { %7822 = verf.f32 %v6099_v48  ;;  %v6086_v58 = vadd.f32 %v6763_v55, %v6085_v47  ;;  %v6786_v55 = vld [vmem:[%s8029_s4 + $0x1] ss:$0 sm:$0xff] }
0x29f0   : > { %v6100_v59 = vmul.f32 0.70710677, %v6086_v58  ;;  %v6097_v2 = vmul.f32 0.5, %v6086_v58 }
0x29f2   : > { %7824 = verf.f32 %v6100_v59 }
0x29f9   : > { %v7821_v60 = vpop.eup %7820 }
0x29fa   : > { %v6107_v51 = vadd.f32 1.0, %v7821_v60 }
0x29fb   : > { %v7823_v50 = vpop.eup %7822 }
0x29fc   : > { %v6105_v61 = vadd.f32 1.0, %v7823_v50  ;;  %v6110_v9 = vmul.f32 %v6107_v51, %v6098_v62 }
0x29fe   : > { %v6108_v42 = vmul.f32 %v6105_v61, %v6096_v49  ;;  %v6112_v10 = vpack.c.bf16 %v6110_v9, %v6110_v9 }
0x29ff   : > { %v7825_v22 = vpop.eup %7824 }
0x2a00   : > { %v6106_v41 = vadd.f32 1.0, %v7825_v22 }
0x2a02   : > { %v6109_v20 = vmul.f32 %v6106_v41, %v6097_v2 }
0x2a04   : > { %v6111_v44 = vpack.c.bf16 %v6109_v20, %v6108_v42 }
0x2a06   : > { %7512 = vmatprep.mubr.msk.bf16.mxu0 %vm4045_vm15, %v6111_v44 }
0x2a07   : > { %7513 = vmatmul.mubr.msk.bf16.vlgmr.msra.gmra.mxu0 %vm4045_vm15, %v6112_v10 }
0x2ac7   : > { %v7514_v38 = vpop.f32.mrf.mxu0 }
0x2ac8   : > { %v6203_v21 = vadd.f32 %v7514_v38, %v6777_v8 }
0x2ac9   : > { %v6194_v11 = vpop.f32.mrf.mxu0 }
0x2aca   : > { %v6195_v6 = vadd.f32 %v6777_v8, %v6194_v11  ;;  %v6210_v12 = vadd.f32 %v6203_v21, %v6014_v29 }
0x2acb   : > { %v7515_v39 = vpop.f32.mrf.mxu0 }
0x2acc   : > { %v6208_v3 = vadd.f32 %v6195_v6, %v6012_v30  ;;  %v6221_v16 = vsel %vm1574_vm8, %v6210_v12, 0.0 }
0x2acd   : > { %v6197_v35 = vpop.f32.mrf.mxu0 }
0x2ace   : > { %v6198_v13 = vadd.f32 %v6777_v8, %v6197_v35  ;;  %v6215_v4 = vsel %vm1567_vm7, %v6208_v3, 0.0 }
0x2acf   : > { %6216 = vadd.xlane.f32.xlu1 %v6215_v4 }
0x2ad0   : > { %v6209_v14 = vadd.f32 %v6198_v13, %v6013_v31 }
0x2ad2   : > { %v6218_v15 = vsel %vm1567_vm7, %v6209_v14, 0.0 }
0x2ad3   : > { %6219 = vadd.xlane.f32.xlu0 %v6218_v15  ;;  %6222 = vadd.xlane.f32.xlu1 %v6221_v16 }
0x2b58   : > { %v6217_v32 = vpop.xlane.xlu1 %6216 }
0x2b59   : > { %v6224_v7 = vmul.f32 0.03125, %v6217_v32 }
0x2b5b   : > { %v6227_v63 = vsub.f32 %v6208_v3, %v6224_v7 }
0x2b5c   : > { %v6220_v17 = vpop.xlane.xlu0 %6219  ;;  %v6223_v18 = vpop.xlane.xlu1 %6222 }
0x2b5d   : > { %v6225_v5 = vmul.f32 0.03125, %v6220_v17  ;;  %v6226_v19 = vmul.f32 0.03125, %v6223_v18  ;;  %v6230_v37 = vmul.f32 %v6227_v63, %v6227_v63 }
0x2b5f   : > { %v6228_v24 = vsub.f32 %v6209_v14, %v6225_v5  ;;  %v6229_v25 = vsub.f32 %v6210_v12, %v6226_v19  ;;  %v6233_v26 = vsel %vm1567_vm7, %v6230_v37, 0.0 }
0x2b60   : > { %6234 = vadd.xlane.f32.xlu0 %v6233_v26 }
0x2b61   : > { %v6231_v43 = vmul.f32 %v6228_v24, %v6228_v24  ;;  %v6232_v27 = vmul.f32 %v6229_v25, %v6229_v25 }
0x2b63   : > { %v6236_v53 = vsel %vm1567_vm7, %v6231_v43, 0.0  ;;  %v6239_v0 = vsel %vm1574_vm8, %v6232_v27, 0.0 }
0x2b64   : > { %6237 = vadd.xlane.f32.xlu1 %v6236_v53  ;;  %6240 = vadd.xlane.f32.xlu0 %v6239_v0 }
0x2be9   : > { %v6235_v28 = vpop.xlane.xlu0 %6234 }
0x2bea   : > { %v6242_v29 = vmul.f32 0.03125, %v6235_v28 }
0x2bec   : > { %v6245_v30 = vadd.f32 1e-05, %v6242_v29 }
0x2bed   : > { %v6241_v31 = vpop.xlane.xlu0 %6240  ;;  %v6238_v33 = vpop.xlane.xlu1 %6237 }
0x2bee   : > { %7826 = vrsqrt.f32 %v6245_v30  ;;  %v6244_v34 = vmul.f32 0.03125, %v6241_v31  ;;  %v6243_v36 = vmul.f32 0.03125, %v6238_v33 }
0x2bf0   : > { %v6247_v1 = vadd.f32 1e-05, %v6244_v34  ;;  %v6246_v54 = vadd.f32 1e-05, %v6243_v36 }
0x2bf2   : > { %7828 = vrsqrt.f32 %v6247_v1 }
0x2bf3   : > { %7830 = vrsqrt.f32 %v6246_v54 }
0x2bfb   : > { %v7827_v23 = vpop.eup %7826 }
0x2bfc   : > { %v6251_v40 = vmul.f32 %v7827_v23, %v6227_v63 }
0x2bfe   : > { %v6260_v56 = vmul.f32 %v6786_v55, %v6251_v40 }
0x2bff   : > { %v7829_v45 = vpop.eup %7828 }
0x2c00   : > { %v7831_v46 = vpop.eup %7830  ;;  %v6269_v57 = vadd.f32 %v6787_v52, %v6260_v56  ;;  %v6253_v48 = vmul.f32 %v7829_v45, %v6229_v25 }
0x2c01   : > { %v6252_v47 = vmul.f32 %v7831_v46, %v6228_v24 }
0x2c02   : > { %6272 = vst.msk [vmem:[%s992_s1] sm:$0xff] %vm1567_vm7, %v6269_v57  ;;  %v6262_v58 = vmul.f32 %v6786_v55, %v6253_v48 }
0x2c03   : > { %v6261_v59 = vmul.f32 %v6786_v55, %v6252_v47 }
0x2c04   : > { %v6271_v60 = vadd.f32 %v6787_v52, %v6262_v58 }
0x2c05   : > { %v6270_v50 = vadd.f32 %v6787_v52, %v6261_v59 }
0x2c06   : > { %6274 = vst.msk [vmem:[%s992_s1 + $0x10] sm:$0x7] %vm1574_vm8, %v6271_v60 }
0x2c07   : > { %6273 = vst.msk [vmem:[%s992_s1 + $0x8] sm:$0xff] %vm1567_vm7, %v6270_v50 }
0x2c08 PF: > { %s73_s22 = sadd.s32 1, %s7839_s22  }
0x2c09   : > { %p70_p4 = scmp.ge.s32.totalorder %s73_s22, 4  }
0x2c0b   :  { %72 = sbr.rel (!%p70_p4) target bundleno = 48 (0x30), region = 283 }

</bundles_post_ra>
